<compile_context>
chip_gen: v7x
topology: tpu7x:2x2x1
jax: 0.10.0
libtpu: 0.0.40
codegen_flags: <defaults>
</compile_context>

<pallas_src>
import functools

import jax
import jax.numpy as jnp
import numpy as np
from jax.experimental import pallas as pl
from jax.experimental.pallas import tpu as pltpu

PAD = 2        # spatial margin kept around every activation (covers dilation <= 2)
CSLOT = 8      # per-source channel slot (sublanes); all layer widths <= 8
CMAX = 16      # widest conv input (decoder concat: 2 * mid_channels)
EPS = 1e-5
SLOPE = 0.2


def _round_up(a, b):
    return (a + b - 1) // b * b


# ------------------------------ weight packing --------------------------------
def _pack_weight(w_hwio, src_sizes):
    """(3,3,cin,cout) HWIO -> (9, CSLOT, CMAX) per-tap (cout, cin) matrices.

    Input channels are split per concat-source and each source block is padded to the
    CSLOT-wide sublane slot it occupies in the kernel's activation slab.
    """
    kh, kw, cin, cout = w_hwio.shape
    assert kh == 3 and kw == 3 and sum(src_sizes) == cin and cout <= CSLOT
    wt = jnp.transpose(w_hwio, (0, 1, 3, 2)).reshape(9, cout, cin)   # tap-major
    blocks, c0 = [], 0
    for sz in src_sizes:
        blocks.append(jnp.pad(wt[:, :, c0:c0 + sz],
                              ((0, 0), (0, CSLOT - cout), (0, CSLOT - sz))))
        c0 += sz
    w9 = jnp.concatenate(blocks, axis=2) if len(blocks) > 1 else blocks[0]
    return jnp.pad(w9, ((0, 0), (0, 0), (0, CMAX - w9.shape[2])))


# ------------------------------ fused Pallas kernel ----------------------------
def _unet_kernel(x_ref, w_ref, mask_ref, o_ref, *, depth, Wp, LB, inv_hw):
    mask = mask_ref[...]                       # (CSLOT, LB): 1.0 on the H*W valid pixels

    def conv_block(lidx, src, dil):
        """conv3x3(dilation=dil) + affine-free InstanceNorm + LeakyReLU(0.2).

        src: (C, LB) lane-dense activation slab, zero outside the valid pixels.
        Returns a (CSLOT, LB) activation that is zero outside the valid pixels (so it
        doubles as the next conv's zero padding).  The conv bias is omitted: it cancels
        exactly against the InstanceNorm mean subtraction (affine-free 'in' norm only).
        """
        cin = src.shape[0]
        offs = [dh * Wp + dw for dh in (-dil, 0, dil) for dw in (-dil, 0, dil)]
        y = None
        for t, s in enumerate(offs):
            # shifted[:, p] == src[:, p + s] for every valid pixel p; roll wrap-around
            # only touches lanes that the mask zeroes.  Rotation runs on the idle XLU.
            shifted = src if s == 0 else pltpu.roll(src, (-s) % LB, axis=1)
            w_t = w_ref[lidx * 9 + t][:, :cin]             # (CSLOT, cin) tap weights
            c = jnp.dot(w_t, shifted, preferred_element_type=jnp.float32)
            y = c if y is None else y + c
        ym = y * mask
        s1 = jnp.sum(ym, axis=1, keepdims=True)
        s2 = jnp.sum(ym * ym, axis=1, keepdims=True)
        mean = s1 * inv_hw
        var = jnp.maximum(s2 * inv_hw - mean * mean, 0.0)   # single-pass variance
        yn = (ym - mean) * jax.lax.rsqrt(var + EPS)
        return jnp.maximum(yn, SLOPE * yn) * mask           # LeakyReLU + re-zero margins

    lidx = 0
    hin = conv_block(lidx, x_ref[...], 1); lidx += 1        # input conv
    h, skips = hin, []
    for _ in range(depth - 1):                              # encoders
        h = conv_block(lidx, h, 1); lidx += 1
        skips.append(h)
    h = conv_block(lidx, h, 2); lidx += 1                   # dilated bottom
    for h_enc in skips[::-1]:                               # decoders: torch.cat([h, h_enc])
        h = conv_block(lidx, jnp.concatenate([h, h_enc], axis=0), 1); lidx += 1
    o_ref[...] = h + hin                                    # residual


# ------------------------------ wrapper ----------------------------------------
def unet_flat_forward(x_nchw, params, *, depth):
    """x_nchw: (N, in_channels, H, W) NCHW.  Returns (N, out_channels, H, W)."""
    N, cin, H, W = x_nchw.shape
    out_ch = params["input"][0].shape[3]
    mid_ch = params["bottom"][0].shape[3]
    assert max(cin, out_ch, mid_ch) <= CSLOT and 2 * mid_ch <= CMAX

    Hp, Wp = H + 2 * PAD, W + 2 * PAD
    LP = Hp * Wp                                # flattened padded spatial (lanes)
    LB = _round_up(LP, 128)                     # lane-aligned slab width
    # Every (dilated) tap read of a *valid* output pixel stays inside [0, LP); the spare
    # lanes [LP, LB) and any roll wrap-around only feed pixels that the mask zeroes.

    # Input: pad channels to the 8-sublane slot, add the spatial margin, flatten HW onto
    # lanes and pad to the lane-aligned width.
    xp = jnp.pad(x_nchw, ((0, 0), (0, CSLOT - cin), (PAD, PAD), (PAD, PAD)))
    xf = jnp.pad(xp.reshape(N, CSLOT, LP), ((0, 0), (0, 0), (0, LB - LP)))

    rows = (jnp.arange(Hp) >= PAD) & (jnp.arange(Hp) < PAD + H)
    cols = (jnp.arange(Wp) >= PAD) & (jnp.arange(Wp) < PAD + W)
    vmask = (rows[:, None] & cols[None, :]).reshape(1, LP).astype(jnp.float32)
    vmask = jnp.broadcast_to(jnp.pad(vmask, ((0, 0), (0, LB - LP))), (CSLOT, LB))

    # All conv weights as one (L*9, CSLOT, CMAX) tap tensor (single input, single DMA).
    packs = [(params["input"][0], [cin])]
    packs += [(w, [w.shape[2]]) for (w, _) in params["encoders"]]
    packs += [(params["bottom"][0], [mid_ch])]
    packs += [(w, [mid_ch, mid_ch]) for (w, _) in params["decoders"]]
    w_all = jnp.concatenate([_pack_weight(w, s) for (w, s) in packs], axis=0)
    L = len(packs)

    kernel = functools.partial(_unet_kernel, depth=depth, Wp=Wp, LB=LB,
                               inv_hw=1.0 / (H * W))

    out = pl.pallas_call(
        kernel,
        out_shape=jax.ShapeDtypeStruct((N, CSLOT, LB), jnp.float32),
        grid=(N,),
        in_specs=[
            pl.BlockSpec((None, CSLOT, LB), lambda n: (n, 0, 0)),     # per-sample input
            pl.BlockSpec((L * 9, CSLOT, CMAX), lambda n: (0, 0, 0)),  # all weights (once)
            pl.BlockSpec((CSLOT, LB), lambda n: (0, 0)),              # valid-pixel mask
        ],
        out_specs=pl.BlockSpec((None, CSLOT, LB), lambda n: (n, 0, 0)),
        compiler_params=pltpu.CompilerParams(
            dimension_semantics=("parallel",)),   # v7x: batch split across TensorCores
    )(xf, w_all, vmask)

    out = out[:, :out_ch, :LP].reshape(N, out_ch, Hp, Wp)
    return out[:, :, PAD:PAD + H, PAD:PAD + W]


# ------------------------------ parameter init ---------------------------------
def init_params(key, depth, in_ch, out_ch, mid_ch):
    def conv_init(k, cin, cout):
        kw_, kb = jax.random.split(k)
        scale = 1.0 / np.sqrt(cin * 9)
        w = jax.random.normal(kw_, (3, 3, cin, cout), jnp.float32) * scale
        b = jax.random.normal(kb, (cout,), jnp.float32) * 0.01
        return w, b

    ki = iter(jax.random.split(key, 2 * depth))
    params = {"input": conv_init(next(ki), in_ch, out_ch)}
    enc = [conv_init(next(ki), out_ch, mid_ch)]
    for _ in range(depth - 2):
        enc.append(conv_init(next(ki), mid_ch, mid_ch))
    params["encoders"] = enc
    params["bottom"] = conv_init(next(ki), mid_ch, mid_ch)
    dec = []
    for _ in range(depth - 2):
        dec.append(conv_init(next(ki), mid_ch * 2, mid_ch))
    dec.append(conv_init(next(ki), mid_ch * 2, out_ch))
    params["decoders"] = dec
    return params


# ------------------------------ pure-JAX reference ------------------------------
def conv_block_ref(x, w, b, dilation, padding):
    y = jax.lax.conv_general_dilated(
        x, w, window_strides=(1, 1),
        padding=[(padding, padding), (padding, padding)],
        rhs_dilation=(dilation, dilation),
        dimension_numbers=("NCHW", "HWIO", "NCHW"),
        precision=jax.lax.Precision.HIGHEST)
    y = y + b[None, :, None, None]
    mean = jnp.mean(y, axis=(2, 3), keepdims=True)
    var = jnp.mean(jnp.square(y - mean), axis=(2, 3), keepdims=True)
    y = (y - mean) * jax.lax.rsqrt(var + 1e-5)
    return jnp.where(y > 0, y, 0.2 * y)


def unet_flat_ref(x, params):
    h = conv_block_ref(x, *params["input"], dilation=1, padding=1)
    hin = h
    hs = []
    for (w, b) in params["encoders"]:
        h = conv_block_ref(h, w, b, 1, 1)
        hs.append(h)
    h = conv_block_ref(h, *params["bottom"], dilation=2, padding=2)
    for (w, b), h_enc in zip(params["decoders"], hs[::-1]):
        h = conv_block_ref(jnp.concatenate([h, h_enc], axis=1), w, b, 1, 1)
    return h + hin


# ----------------------------------- main ---------------------------------------
if __name__ == "__main__":
    depth, in_ch, out_ch, mid_ch = 3, 4, 8, 8
    N, H, W = 2, 16, 16

    key = jax.random.PRNGKey(0)
    k_x, k_p = jax.random.split(key)
    x = jax.random.normal(k_x, (N, in_ch, H, W), jnp.float32)  # NCHW like PyTorch
    params = init_params(k_p, depth, in_ch, out_ch, mid_ch)

    fwd = jax.jit(functools.partial(unet_flat_forward, depth=depth))
    out = jax.block_until_ready(fwd(x, params))

    ref = jax.block_until_ready(unet_flat_ref(x, params))
    assert out.shape == (N, out_ch, H, W), out.shape
    assert np.all(np.isfinite(np.asarray(out)))
    np.testing.assert_allclose(np.asarray(out), np.asarray(ref), atol=3e-2, rtol=3e-2)

    # TODO(synk): spectral_norm (use_sn=True) and BatchNorm running-stats ('bn') paths
    # are not exercised; the bias/mean cancellation used in-kernel is only valid for the
    # affine-free InstanceNorm ('in') configuration implemented here.
    print("KERNEL_OK")
</pallas_src>

<mosaic_0001>
module attributes {stable_mosaic.version = 11 : i64} {
  func.func @_unet_kernel(%arg0: i32, %arg1: memref<1x8x512xf32, #tpu.memory_space<vmem>>, %arg2: memref<54x8x16xf32, #tpu.memory_space<vmem>>, %arg3: memref<8x512xf32, #tpu.memory_space<vmem>>, %arg4: memref<1x8x512xf32, #tpu.memory_space<vmem>>) attributes {dimension_semantics = [#tpu.dimension_semantics<parallel>], iteration_bounds = array<i64: 2>, scalar_prefetch = 0 : i64, scratch_operands = 0 : i64, tpu.core_type = #tpu.core_type<tc>, window_params = [{transform_indices = @transform_0, window_bounds = array<i64: 1, 8, 512>}, {pipeline_mode = #tpu.pipeline_mode<synchronous>, transform_indices = @transform_1, window_bounds = array<i64: 54, 8, 16>}, {pipeline_mode = #tpu.pipeline_mode<synchronous>, transform_indices = @transform_2, window_bounds = array<i64: 8, 512>}, {transform_indices = @transform_3, window_bounds = array<i64: 1, 8, 512>}]} {
    %c0 = arith.constant 0 : index
    %c0_0 = arith.constant 0 : index
    %0 = vector.load %arg3[%c0, %c0_0] : memref<8x512xf32, #tpu.memory_space<vmem>>, vector<8x512xf32>
    %c0_1 = arith.constant 0 : index
    %c0_2 = arith.constant 0 : index
    %c0_3 = arith.constant 0 : index
    %1 = vector.load %arg1[%c0_1, %c0_2, %c0_3] : memref<1x8x512xf32, #tpu.memory_space<vmem>>, vector<1x8x512xf32>
    %2 = vector.shape_cast %1 : vector<1x8x512xf32> to vector<8x512xf32>
    %c21_i32 = arith.constant 21 : i32
    %3 = tpu.dynamic_rotate %2 by %c21_i32 dim 1 : vector<8x512xf32>, i32 -> vector<8x512xf32>
    %c0_4 = arith.constant 0 : index
    %c0_5 = arith.constant 0 : index
    %c0_6 = arith.constant 0 : index
    %4 = vector.load %arg2[%c0_4, %c0_5, %c0_6] : memref<54x8x16xf32, #tpu.memory_space<vmem>>, vector<1x8x16xf32>
    %5 = vector.shape_cast %4 : vector<1x8x16xf32> to vector<8x16xf32>
    %6 = vector.extract_strided_slice %5 {offsets = [0, 0], sizes = [8, 8], strides = [1, 1]} : vector<8x16xf32> to vector<8x8xf32>
    %cst = arith.constant dense<0.000000e+00> : vector<8x512xf32>
    %7 = tpu.matmul %6, %3, %cst {dimension_numbers = #tpu.dot_dimension_numbers<[1], [0], [0], [1], [0, 0, 1, 1], [], []>} : vector<8x8xf32>, vector<8x512xf32>, vector<8x512xf32> -> vector<8x512xf32>
    %c20_i32 = arith.constant 20 : i32
    %8 = tpu.dynamic_rotate %2 by %c20_i32 dim 1 : vector<8x512xf32>, i32 -> vector<8x512xf32>
    %c1 = arith.constant 1 : index
    %c0_7 = arith.constant 0 : index
    %c0_8 = arith.constant 0 : index
    %9 = vector.load %arg2[%c1, %c0_7, %c0_8] : memref<54x8x16xf32, #tpu.memory_space<vmem>>, vector<1x8x16xf32>
    %10 = vector.shape_cast %9 : vector<1x8x16xf32> to vector<8x16xf32>
    %11 = vector.extract_strided_slice %10 {offsets = [0, 0], sizes = [8, 8], strides = [1, 1]} : vector<8x16xf32> to vector<8x8xf32>
    %cst_9 = arith.constant dense<0.000000e+00> : vector<8x512xf32>
    %12 = tpu.matmul %11, %8, %cst_9 {dimension_numbers = #tpu.dot_dimension_numbers<[1], [0], [0], [1], [0, 0, 1, 1], [], []>} : vector<8x8xf32>, vector<8x512xf32>, vector<8x512xf32> -> vector<8x512xf32>
    %13 = arith.addf %7, %12 : vector<8x512xf32>
    %c19_i32 = arith.constant 19 : i32
    %14 = tpu.dynamic_rotate %2 by %c19_i32 dim 1 : vector<8x512xf32>, i32 -> vector<8x512xf32>
    %c2 = arith.constant 2 : index
    %c0_10 = arith.constant 0 : index
    %c0_11 = arith.constant 0 : index
    %15 = vector.load %arg2[%c2, %c0_10, %c0_11] : memref<54x8x16xf32, #tpu.memory_space<vmem>>, vector<1x8x16xf32>
    %16 = vector.shape_cast %15 : vector<1x8x16xf32> to vector<8x16xf32>
    %17 = vector.extract_strided_slice %16 {offsets = [0, 0], sizes = [8, 8], strides = [1, 1]} : vector<8x16xf32> to vector<8x8xf32>
    %cst_12 = arith.constant dense<0.000000e+00> : vector<8x512xf32>
    %18 = tpu.matmul %17, %14, %cst_12 {dimension_numbers = #tpu.dot_dimension_numbers<[1], [0], [0], [1], [0, 0, 1, 1], [], []>} : vector<8x8xf32>, vector<8x512xf32>, vector<8x512xf32> -> vector<8x512xf32>
    %19 = arith.addf %13, %18 : vector<8x512xf32>
    %c1_i32 = arith.constant 1 : i32
    %20 = tpu.dynamic_rotate %2 by %c1_i32 dim 1 : vector<8x512xf32>, i32 -> vector<8x512xf32>
    %c3 = arith.constant 3 : index
    %c0_13 = arith.constant 0 : index
    %c0_14 = arith.constant 0 : index
    %21 = vector.load %arg2[%c3, %c0_13, %c0_14] : memref<54x8x16xf32, #tpu.memory_space<vmem>>, vector<1x8x16xf32>
    %22 = vector.shape_cast %21 : vector<1x8x16xf32> to vector<8x16xf32>
    %23 = vector.extract_strided_slice %22 {offsets = [0, 0], sizes = [8, 8], strides = [1, 1]} : vector<8x16xf32> to vector<8x8xf32>
    %cst_15 = arith.constant dense<0.000000e+00> : vector<8x512xf32>
    %24 = tpu.matmul %23, %20, %cst_15 {dimension_numbers = #tpu.dot_dimension_numbers<[1], [0], [0], [1], [0, 0, 1, 1], [], []>} : vector<8x8xf32>, vector<8x512xf32>, vector<8x512xf32> -> vector<8x512xf32>
    %25 = arith.addf %19, %24 : vector<8x512xf32>
    %c4 = arith.constant 4 : index
    %c0_16 = arith.constant 0 : index
    %c0_17 = arith.constant 0 : index
    %26 = vector.load %arg2[%c4, %c0_16, %c0_17] : memref<54x8x16xf32, #tpu.memory_space<vmem>>, vector<1x8x16xf32>
    %27 = vector.shape_cast %26 : vector<1x8x16xf32> to vector<8x16xf32>
    %28 = vector.extract_strided_slice %27 {offsets = [0, 0], sizes = [8, 8], strides = [1, 1]} : vector<8x16xf32> to vector<8x8xf32>
    %cst_18 = arith.constant dense<0.000000e+00> : vector<8x512xf32>
    %29 = tpu.matmul %28, %2, %cst_18 {dimension_numbers = #tpu.dot_dimension_numbers<[1], [0], [0], [1], [0, 0, 1, 1], [], []>} : vector<8x8xf32>, vector<8x512xf32>, vector<8x512xf32> -> vector<8x512xf32>
    %30 = arith.addf %25, %29 : vector<8x512xf32>
    %c511_i32 = arith.constant 511 : i32
    %31 = tpu.dynamic_rotate %2 by %c511_i32 dim 1 : vector<8x512xf32>, i32 -> vector<8x512xf32>
    %c5 = arith.constant 5 : index
    %c0_19 = arith.constant 0 : index
    %c0_20 = arith.constant 0 : index
    %32 = vector.load %arg2[%c5, %c0_19, %c0_20] : memref<54x8x16xf32, #tpu.memory_space<vmem>>, vector<1x8x16xf32>
    %33 = vector.shape_cast %32 : vector<1x8x16xf32> to vector<8x16xf32>
    %34 = vector.extract_strided_slice %33 {offsets = [0, 0], sizes = [8, 8], strides = [1, 1]} : vector<8x16xf32> to vector<8x8xf32>
    %cst_21 = arith.constant dense<0.000000e+00> : vector<8x512xf32>
    %35 = tpu.matmul %34, %31, %cst_21 {dimension_numbers = #tpu.dot_dimension_numbers<[1], [0], [0], [1], [0, 0, 1, 1], [], []>} : vector<8x8xf32>, vector<8x512xf32>, vector<8x512xf32> -> vector<8x512xf32>
    %36 = arith.addf %30, %35 : vector<8x512xf32>
    %c493_i32 = arith.constant 493 : i32
    %37 = tpu.dynamic_rotate %2 by %c493_i32 dim 1 : vector<8x512xf32>, i32 -> vector<8x512xf32>
    %c6 = arith.constant 6 : index
    %c0_22 = arith.constant 0 : index
    %c0_23 = arith.constant 0 : index
    %38 = vector.load %arg2[%c6, %c0_22, %c0_23] : memref<54x8x16xf32, #tpu.memory_space<vmem>>, vector<1x8x16xf32>
    %39 = vector.shape_cast %38 : vector<1x8x16xf32> to vector<8x16xf32>
    %40 = vector.extract_strided_slice %39 {offsets = [0, 0], sizes = [8, 8], strides = [1, 1]} : vector<8x16xf32> to vector<8x8xf32>
    %cst_24 = arith.constant dense<0.000000e+00> : vector<8x512xf32>
    %41 = tpu.matmul %40, %37, %cst_24 {dimension_numbers = #tpu.dot_dimension_numbers<[1], [0], [0], [1], [0, 0, 1, 1], [], []>} : vector<8x8xf32>, vector<8x512xf32>, vector<8x512xf32> -> vector<8x512xf32>
    %42 = arith.addf %36, %41 : vector<8x512xf32>
    %c492_i32 = arith.constant 492 : i32
    %43 = tpu.dynamic_rotate %2 by %c492_i32 dim 1 : vector<8x512xf32>, i32 -> vector<8x512xf32>
    %c7 = arith.constant 7 : index
    %c0_25 = arith.constant 0 : index
    %c0_26 = arith.constant 0 : index
    %44 = vector.load %arg2[%c7, %c0_25, %c0_26] : memref<54x8x16xf32, #tpu.memory_space<vmem>>, vector<1x8x16xf32>
    %45 = vector.shape_cast %44 : vector<1x8x16xf32> to vector<8x16xf32>
    %46 = vector.extract_strided_slice %45 {offsets = [0, 0], sizes = [8, 8], strides = [1, 1]} : vector<8x16xf32> to vector<8x8xf32>
    %cst_27 = arith.constant dense<0.000000e+00> : vector<8x512xf32>
    %47 = tpu.matmul %46, %43, %cst_27 {dimension_numbers = #tpu.dot_dimension_numbers<[1], [0], [0], [1], [0, 0, 1, 1], [], []>} : vector<8x8xf32>, vector<8x512xf32>, vector<8x512xf32> -> vector<8x512xf32>
    %48 = arith.addf %42, %47 : vector<8x512xf32>
    %c491_i32 = arith.constant 491 : i32
    %49 = tpu.dynamic_rotate %2 by %c491_i32 dim 1 : vector<8x512xf32>, i32 -> vector<8x512xf32>
    %c8 = arith.constant 8 : index
    %c0_28 = arith.constant 0 : index
    %c0_29 = arith.constant 0 : index
    %50 = vector.load %arg2[%c8, %c0_28, %c0_29] : memref<54x8x16xf32, #tpu.memory_space<vmem>>, vector<1x8x16xf32>
    %51 = vector.shape_cast %50 : vector<1x8x16xf32> to vector<8x16xf32>
    %52 = vector.extract_strided_slice %51 {offsets = [0, 0], sizes = [8, 8], strides = [1, 1]} : vector<8x16xf32> to vector<8x8xf32>
    %cst_30 = arith.constant dense<0.000000e+00> : vector<8x512xf32>
    %53 = tpu.matmul %52, %49, %cst_30 {dimension_numbers = #tpu.dot_dimension_numbers<[1], [0], [0], [1], [0, 0, 1, 1], [], []>} : vector<8x8xf32>, vector<8x512xf32>, vector<8x512xf32> -> vector<8x512xf32>
    %54 = arith.addf %48, %53 : vector<8x512xf32>
    %55 = arith.mulf %54, %0 : vector<8x512xf32>
    %cst_31 = arith.constant dense<0.000000e+00> : vector<8xf32>
    %56 = vector.multi_reduction <add>, %55, %cst_31 [1] : vector<8x512xf32> to vector<8xf32>
    %57 = vector.shape_cast %56 : vector<8xf32> to vector<8x1xf32>
    %58 = arith.mulf %55, %55 : vector<8x512xf32>
    %cst_32 = arith.constant dense<0.000000e+00> : vector<8xf32>
    %59 = vector.multi_reduction <add>, %58, %cst_32 [1] : vector<8x512xf32> to vector<8xf32>
    %60 = vector.shape_cast %59 : vector<8xf32> to vector<8x1xf32>
    %cst_33 = arith.constant 3.906250e-03 : f32
    %61 = vector.broadcast %cst_33 : f32 to vector<8x1xf32>
    %62 = arith.mulf %57, %61 : vector<8x1xf32>
    %cst_34 = arith.constant 3.906250e-03 : f32
    %63 = vector.broadcast %cst_34 : f32 to vector<8x1xf32>
    %64 = arith.mulf %60, %63 : vector<8x1xf32>
    %65 = arith.mulf %62, %62 : vector<8x1xf32>
    %66 = arith.subf %64, %65 : vector<8x1xf32>
    %cst_35 = arith.constant 0.000000e+00 : f32
    %67 = vector.broadcast %cst_35 : f32 to vector<8x1xf32>
    %68 = arith.maximumf %66, %67 : vector<8x1xf32>
    %69 = vector.broadcast %62 : vector<8x1xf32> to vector<8x512xf32>
    %70 = arith.subf %55, %69 : vector<8x512xf32>
    %cst_36 = arith.constant 9.99999974E-6 : f32
    %71 = vector.broadcast %cst_36 : f32 to vector<8x1xf32>
    %72 = arith.addf %68, %71 : vector<8x1xf32>
    %73 = math.rsqrt %72 : vector<8x1xf32>
    %74 = vector.broadcast %73 : vector<8x1xf32> to vector<8x512xf32>
    %75 = arith.mulf %70, %74 : vector<8x512xf32>
    %cst_37 = arith.constant 2.000000e-01 : f32
    %76 = vector.broadcast %cst_37 : f32 to vector<8x512xf32>
    %77 = arith.mulf %76, %75 : vector<8x512xf32>
    %78 = arith.maximumf %75, %77 : vector<8x512xf32>
    %79 = arith.mulf %78, %0 : vector<8x512xf32>
    %c21_i32_38 = arith.constant 21 : i32
    %80 = tpu.dynamic_rotate %79 by %c21_i32_38 dim 1 : vector<8x512xf32>, i32 -> vector<8x512xf32>
    %c9 = arith.constant 9 : index
    %c0_39 = arith.constant 0 : index
    %c0_40 = arith.constant 0 : index
    %81 = vector.load %arg2[%c9, %c0_39, %c0_40] : memref<54x8x16xf32, #tpu.memory_space<vmem>>, vector<1x8x16xf32>
    %82 = vector.shape_cast %81 : vector<1x8x16xf32> to vector<8x16xf32>
    %83 = vector.extract_strided_slice %82 {offsets = [0, 0], sizes = [8, 8], strides = [1, 1]} : vector<8x16xf32> to vector<8x8xf32>
    %cst_41 = arith.constant dense<0.000000e+00> : vector<8x512xf32>
    %84 = tpu.matmul %83, %80, %cst_41 {dimension_numbers = #tpu.dot_dimension_numbers<[1], [0], [0], [1], [0, 0, 1, 1], [], []>} : vector<8x8xf32>, vector<8x512xf32>, vector<8x512xf32> -> vector<8x512xf32>
    %c20_i32_42 = arith.constant 20 : i32
    %85 = tpu.dynamic_rotate %79 by %c20_i32_42 dim 1 : vector<8x512xf32>, i32 -> vector<8x512xf32>
    %c10 = arith.constant 10 : index
    %c0_43 = arith.constant 0 : index
    %c0_44 = arith.constant 0 : index
    %86 = vector.load %arg2[%c10, %c0_43, %c0_44] : memref<54x8x16xf32, #tpu.memory_space<vmem>>, vector<1x8x16xf32>
    %87 = vector.shape_cast %86 : vector<1x8x16xf32> to vector<8x16xf32>
    %88 = vector.extract_strided_slice %87 {offsets = [0, 0], sizes = [8, 8], strides = [1, 1]} : vector<8x16xf32> to vector<8x8xf32>
    %cst_45 = arith.constant dense<0.000000e+00> : vector<8x512xf32>
    %89 = tpu.matmul %88, %85, %cst_45 {dimension_numbers = #tpu.dot_dimension_numbers<[1], [0], [0], [1], [0, 0, 1, 1], [], []>} : vector<8x8xf32>, vector<8x512xf32>, vector<8x512xf32> -> vector<8x512xf32>
    %90 = arith.addf %84, %89 : vector<8x512xf32>
    %c19_i32_46 = arith.constant 19 : i32
    %91 = tpu.dynamic_rotate %79 by %c19_i32_46 dim 1 : vector<8x512xf32>, i32 -> vector<8x512xf32>
    %c11 = arith.constant 11 : index
    %c0_47 = arith.constant 0 : index
    %c0_48 = arith.constant 0 : index
    %92 = vector.load %arg2[%c11, %c0_47, %c0_48] : memref<54x8x16xf32, #tpu.memory_space<vmem>>, vector<1x8x16xf32>
    %93 = vector.shape_cast %92 : vector<1x8x16xf32> to vector<8x16xf32>
    %94 = vector.extract_strided_slice %93 {offsets = [0, 0], sizes = [8, 8], strides = [1, 1]} : vector<8x16xf32> to vector<8x8xf32>
    %cst_49 = arith.constant dense<0.000000e+00> : vector<8x512xf32>
    %95 = tpu.matmul %94, %91, %cst_49 {dimension_numbers = #tpu.dot_dimension_numbers<[1], [0], [0], [1], [0, 0, 1, 1], [], []>} : vector<8x8xf32>, vector<8x512xf32>, vector<8x512xf32> -> vector<8x512xf32>
    %96 = arith.addf %90, %95 : vector<8x512xf32>
    %c1_i32_50 = arith.constant 1 : i32
    %97 = tpu.dynamic_rotate %79 by %c1_i32_50 dim 1 : vector<8x512xf32>, i32 -> vector<8x512xf32>
    %c12 = arith.constant 12 : index
    %c0_51 = arith.constant 0 : index
    %c0_52 = arith.constant 0 : index
    %98 = vector.load %arg2[%c12, %c0_51, %c0_52] : memref<54x8x16xf32, #tpu.memory_space<vmem>>, vector<1x8x16xf32>
    %99 = vector.shape_cast %98 : vector<1x8x16xf32> to vector<8x16xf32>
    %100 = vector.extract_strided_slice %99 {offsets = [0, 0], sizes = [8, 8], strides = [1, 1]} : vector<8x16xf32> to vector<8x8xf32>
    %cst_53 = arith.constant dense<0.000000e+00> : vector<8x512xf32>
    %101 = tpu.matmul %100, %97, %cst_53 {dimension_numbers = #tpu.dot_dimension_numbers<[1], [0], [0], [1], [0, 0, 1, 1], [], []>} : vector<8x8xf32>, vector<8x512xf32>, vector<8x512xf32> -> vector<8x512xf32>
    %102 = arith.addf %96, %101 : vector<8x512xf32>
    %c13 = arith.constant 13 : index
    %c0_54 = arith.constant 0 : index
    %c0_55 = arith.constant 0 : index
    %103 = vector.load %arg2[%c13, %c0_54, %c0_55] : memref<54x8x16xf32, #tpu.memory_space<vmem>>, vector<1x8x16xf32>
    %104 = vector.shape_cast %103 : vector<1x8x16xf32> to vector<8x16xf32>
    %105 = vector.extract_strided_slice %104 {offsets = [0, 0], sizes = [8, 8], strides = [1, 1]} : vector<8x16xf32> to vector<8x8xf32>
    %cst_56 = arith.constant dense<0.000000e+00> : vector<8x512xf32>
    %106 = tpu.matmul %105, %79, %cst_56 {dimension_numbers = #tpu.dot_dimension_numbers<[1], [0], [0], [1], [0, 0, 1, 1], [], []>} : vector<8x8xf32>, vector<8x512xf32>, vector<8x512xf32> -> vector<8x512xf32>
    %107 = arith.addf %102, %106 : vector<8x512xf32>
    %c511_i32_57 = arith.constant 511 : i32
    %108 = tpu.dynamic_rotate %79 by %c511_i32_57 dim 1 : vector<8x512xf32>, i32 -> vector<8x512xf32>
    %c14 = arith.constant 14 : index
    %c0_58 = arith.constant 0 : index
    %c0_59 = arith.constant 0 : index
    %109 = vector.load %arg2[%c14, %c0_58, %c0_59] : memref<54x8x16xf32, #tpu.memory_space<vmem>>, vector<1x8x16xf32>
    %110 = vector.shape_cast %109 : vector<1x8x16xf32> to vector<8x16xf32>
    %111 = vector.extract_strided_slice %110 {offsets = [0, 0], sizes = [8, 8], strides = [1, 1]} : vector<8x16xf32> to vector<8x8xf32>
    %cst_60 = arith.constant dense<0.000000e+00> : vector<8x512xf32>
    %112 = tpu.matmul %111, %108, %cst_60 {dimension_numbers = #tpu.dot_dimension_numbers<[1], [0], [0], [1], [0, 0, 1, 1], [], []>} : vector<8x8xf32>, vector<8x512xf32>, vector<8x512xf32> -> vector<8x512xf32>
    %113 = arith.addf %107, %112 : vector<8x512xf32>
    %c493_i32_61 = arith.constant 493 : i32
    %114 = tpu.dynamic_rotate %79 by %c493_i32_61 dim 1 : vector<8x512xf32>, i32 -> vector<8x512xf32>
    %c15 = arith.constant 15 : index
    %c0_62 = arith.constant 0 : index
    %c0_63 = arith.constant 0 : index
    %115 = vector.load %arg2[%c15, %c0_62, %c0_63] : memref<54x8x16xf32, #tpu.memory_space<vmem>>, vector<1x8x16xf32>
    %116 = vector.shape_cast %115 : vector<1x8x16xf32> to vector<8x16xf32>
    %117 = vector.extract_strided_slice %116 {offsets = [0, 0], sizes = [8, 8], strides = [1, 1]} : vector<8x16xf32> to vector<8x8xf32>
    %cst_64 = arith.constant dense<0.000000e+00> : vector<8x512xf32>
    %118 = tpu.matmul %117, %114, %cst_64 {dimension_numbers = #tpu.dot_dimension_numbers<[1], [0], [0], [1], [0, 0, 1, 1], [], []>} : vector<8x8xf32>, vector<8x512xf32>, vector<8x512xf32> -> vector<8x512xf32>
    %119 = arith.addf %113, %118 : vector<8x512xf32>
    %c492_i32_65 = arith.constant 492 : i32
    %120 = tpu.dynamic_rotate %79 by %c492_i32_65 dim 1 : vector<8x512xf32>, i32 -> vector<8x512xf32>
    %c16 = arith.constant 16 : index
    %c0_66 = arith.constant 0 : index
    %c0_67 = arith.constant 0 : index
    %121 = vector.load %arg2[%c16, %c0_66, %c0_67] : memref<54x8x16xf32, #tpu.memory_space<vmem>>, vector<1x8x16xf32>
    %122 = vector.shape_cast %121 : vector<1x8x16xf32> to vector<8x16xf32>
    %123 = vector.extract_strided_slice %122 {offsets = [0, 0], sizes = [8, 8], strides = [1, 1]} : vector<8x16xf32> to vector<8x8xf32>
    %cst_68 = arith.constant dense<0.000000e+00> : vector<8x512xf32>
    %124 = tpu.matmul %123, %120, %cst_68 {dimension_numbers = #tpu.dot_dimension_numbers<[1], [0], [0], [1], [0, 0, 1, 1], [], []>} : vector<8x8xf32>, vector<8x512xf32>, vector<8x512xf32> -> vector<8x512xf32>
    %125 = arith.addf %119, %124 : vector<8x512xf32>
    %c491_i32_69 = arith.constant 491 : i32
    %126 = tpu.dynamic_rotate %79 by %c491_i32_69 dim 1 : vector<8x512xf32>, i32 -> vector<8x512xf32>
    %c17 = arith.constant 17 : index
    %c0_70 = arith.constant 0 : index
    %c0_71 = arith.constant 0 : index
    %127 = vector.load %arg2[%c17, %c0_70, %c0_71] : memref<54x8x16xf32, #tpu.memory_space<vmem>>, vector<1x8x16xf32>
    %128 = vector.shape_cast %127 : vector<1x8x16xf32> to vector<8x16xf32>
    %129 = vector.extract_strided_slice %128 {offsets = [0, 0], sizes = [8, 8], strides = [1, 1]} : vector<8x16xf32> to vector<8x8xf32>
    %cst_72 = arith.constant dense<0.000000e+00> : vector<8x512xf32>
    %130 = tpu.matmul %129, %126, %cst_72 {dimension_numbers = #tpu.dot_dimension_numbers<[1], [0], [0], [1], [0, 0, 1, 1], [], []>} : vector<8x8xf32>, vector<8x512xf32>, vector<8x512xf32> -> vector<8x512xf32>
    %131 = arith.addf %125, %130 : vector<8x512xf32>
    %132 = arith.mulf %131, %0 : vector<8x512xf32>
    %cst_73 = arith.constant dense<0.000000e+00> : vector<8xf32>
    %133 = vector.multi_reduction <add>, %132, %cst_73 [1] : vector<8x512xf32> to vector<8xf32>
    %134 = vector.shape_cast %133 : vector<8xf32> to vector<8x1xf32>
    %135 = arith.mulf %132, %132 : vector<8x512xf32>
    %cst_74 = arith.constant dense<0.000000e+00> : vector<8xf32>
    %136 = vector.multi_reduction <add>, %135, %cst_74 [1] : vector<8x512xf32> to vector<8xf32>
    %137 = vector.shape_cast %136 : vector<8xf32> to vector<8x1xf32>
    %cst_75 = arith.constant 3.906250e-03 : f32
    %138 = vector.broadcast %cst_75 : f32 to vector<8x1xf32>
    %139 = arith.mulf %134, %138 : vector<8x1xf32>
    %cst_76 = arith.constant 3.906250e-03 : f32
    %140 = vector.broadcast %cst_76 : f32 to vector<8x1xf32>
    %141 = arith.mulf %137, %140 : vector<8x1xf32>
    %142 = arith.mulf %139, %139 : vector<8x1xf32>
    %143 = arith.subf %141, %142 : vector<8x1xf32>
    %cst_77 = arith.constant 0.000000e+00 : f32
    %144 = vector.broadcast %cst_77 : f32 to vector<8x1xf32>
    %145 = arith.maximumf %143, %144 : vector<8x1xf32>
    %146 = vector.broadcast %139 : vector<8x1xf32> to vector<8x512xf32>
    %147 = arith.subf %132, %146 : vector<8x512xf32>
    %cst_78 = arith.constant 9.99999974E-6 : f32
    %148 = vector.broadcast %cst_78 : f32 to vector<8x1xf32>
    %149 = arith.addf %145, %148 : vector<8x1xf32>
    %150 = math.rsqrt %149 : vector<8x1xf32>
    %151 = vector.broadcast %150 : vector<8x1xf32> to vector<8x512xf32>
    %152 = arith.mulf %147, %151 : vector<8x512xf32>
    %cst_79 = arith.constant 2.000000e-01 : f32
    %153 = vector.broadcast %cst_79 : f32 to vector<8x512xf32>
    %154 = arith.mulf %153, %152 : vector<8x512xf32>
    %155 = arith.maximumf %152, %154 : vector<8x512xf32>
    %156 = arith.mulf %155, %0 : vector<8x512xf32>
    %c21_i32_80 = arith.constant 21 : i32
    %157 = tpu.dynamic_rotate %156 by %c21_i32_80 dim 1 : vector<8x512xf32>, i32 -> vector<8x512xf32>
    %c18 = arith.constant 18 : index
    %c0_81 = arith.constant 0 : index
    %c0_82 = arith.constant 0 : index
    %158 = vector.load %arg2[%c18, %c0_81, %c0_82] : memref<54x8x16xf32, #tpu.memory_space<vmem>>, vector<1x8x16xf32>
    %159 = vector.shape_cast %158 : vector<1x8x16xf32> to vector<8x16xf32>
    %160 = vector.extract_strided_slice %159 {offsets = [0, 0], sizes = [8, 8], strides = [1, 1]} : vector<8x16xf32> to vector<8x8xf32>
    %cst_83 = arith.constant dense<0.000000e+00> : vector<8x512xf32>
    %161 = tpu.matmul %160, %157, %cst_83 {dimension_numbers = #tpu.dot_dimension_numbers<[1], [0], [0], [1], [0, 0, 1, 1], [], []>} : vector<8x8xf32>, vector<8x512xf32>, vector<8x512xf32> -> vector<8x512xf32>
    %c20_i32_84 = arith.constant 20 : i32
    %162 = tpu.dynamic_rotate %156 by %c20_i32_84 dim 1 : vector<8x512xf32>, i32 -> vector<8x512xf32>
    %c19 = arith.constant 19 : index
    %c0_85 = arith.constant 0 : index
    %c0_86 = arith.constant 0 : index
    %163 = vector.load %arg2[%c19, %c0_85, %c0_86] : memref<54x8x16xf32, #tpu.memory_space<vmem>>, vector<1x8x16xf32>
    %164 = vector.shape_cast %163 : vector<1x8x16xf32> to vector<8x16xf32>
    %165 = vector.extract_strided_slice %164 {offsets = [0, 0], sizes = [8, 8], strides = [1, 1]} : vector<8x16xf32> to vector<8x8xf32>
    %cst_87 = arith.constant dense<0.000000e+00> : vector<8x512xf32>
    %166 = tpu.matmul %165, %162, %cst_87 {dimension_numbers = #tpu.dot_dimension_numbers<[1], [0], [0], [1], [0, 0, 1, 1], [], []>} : vector<8x8xf32>, vector<8x512xf32>, vector<8x512xf32> -> vector<8x512xf32>
    %167 = arith.addf %161, %166 : vector<8x512xf32>
    %c19_i32_88 = arith.constant 19 : i32
    %168 = tpu.dynamic_rotate %156 by %c19_i32_88 dim 1 : vector<8x512xf32>, i32 -> vector<8x512xf32>
    %c20 = arith.constant 20 : index
    %c0_89 = arith.constant 0 : index
    %c0_90 = arith.constant 0 : index
    %169 = vector.load %arg2[%c20, %c0_89, %c0_90] : memref<54x8x16xf32, #tpu.memory_space<vmem>>, vector<1x8x16xf32>
    %170 = vector.shape_cast %169 : vector<1x8x16xf32> to vector<8x16xf32>
    %171 = vector.extract_strided_slice %170 {offsets = [0, 0], sizes = [8, 8], strides = [1, 1]} : vector<8x16xf32> to vector<8x8xf32>
    %cst_91 = arith.constant dense<0.000000e+00> : vector<8x512xf32>
    %172 = tpu.matmul %171, %168, %cst_91 {dimension_numbers = #tpu.dot_dimension_numbers<[1], [0], [0], [1], [0, 0, 1, 1], [], []>} : vector<8x8xf32>, vector<8x512xf32>, vector<8x512xf32> -> vector<8x512xf32>
    %173 = arith.addf %167, %172 : vector<8x512xf32>
    %c1_i32_92 = arith.constant 1 : i32
    %174 = tpu.dynamic_rotate %156 by %c1_i32_92 dim 1 : vector<8x512xf32>, i32 -> vector<8x512xf32>
    %c21 = arith.constant 21 : index
    %c0_93 = arith.constant 0 : index
    %c0_94 = arith.constant 0 : index
    %175 = vector.load %arg2[%c21, %c0_93, %c0_94] : memref<54x8x16xf32, #tpu.memory_space<vmem>>, vector<1x8x16xf32>
    %176 = vector.shape_cast %175 : vector<1x8x16xf32> to vector<8x16xf32>
    %177 = vector.extract_strided_slice %176 {offsets = [0, 0], sizes = [8, 8], strides = [1, 1]} : vector<8x16xf32> to vector<8x8xf32>
    %cst_95 = arith.constant dense<0.000000e+00> : vector<8x512xf32>
    %178 = tpu.matmul %177, %174, %cst_95 {dimension_numbers = #tpu.dot_dimension_numbers<[1], [0], [0], [1], [0, 0, 1, 1], [], []>} : vector<8x8xf32>, vector<8x512xf32>, vector<8x512xf32> -> vector<8x512xf32>
    %179 = arith.addf %173, %178 : vector<8x512xf32>
    %c22 = arith.constant 22 : index
    %c0_96 = arith.constant 0 : index
    %c0_97 = arith.constant 0 : index
    %180 = vector.load %arg2[%c22, %c0_96, %c0_97] : memref<54x8x16xf32, #tpu.memory_space<vmem>>, vector<1x8x16xf32>
    %181 = vector.shape_cast %180 : vector<1x8x16xf32> to vector<8x16xf32>
    %182 = vector.extract_strided_slice %181 {offsets = [0, 0], sizes = [8, 8], strides = [1, 1]} : vector<8x16xf32> to vector<8x8xf32>
    %cst_98 = arith.constant dense<0.000000e+00> : vector<8x512xf32>
    %183 = tpu.matmul %182, %156, %cst_98 {dimension_numbers = #tpu.dot_dimension_numbers<[1], [0], [0], [1], [0, 0, 1, 1], [], []>} : vector<8x8xf32>, vector<8x512xf32>, vector<8x512xf32> -> vector<8x512xf32>
    %184 = arith.addf %179, %183 : vector<8x512xf32>
    %c511_i32_99 = arith.constant 511 : i32
    %185 = tpu.dynamic_rotate %156 by %c511_i32_99 dim 1 : vector<8x512xf32>, i32 -> vector<8x512xf32>
    %c23 = arith.constant 23 : index
    %c0_100 = arith.constant 0 : index
    %c0_101 = arith.constant 0 : index
    %186 = vector.load %arg2[%c23, %c0_100, %c0_101] : memref<54x8x16xf32, #tpu.memory_space<vmem>>, vector<1x8x16xf32>
    %187 = vector.shape_cast %186 : vector<1x8x16xf32> to vector<8x16xf32>
    %188 = vector.extract_strided_slice %187 {offsets = [0, 0], sizes = [8, 8], strides = [1, 1]} : vector<8x16xf32> to vector<8x8xf32>
    %cst_102 = arith.constant dense<0.000000e+00> : vector<8x512xf32>
    %189 = tpu.matmul %188, %185, %cst_102 {dimension_numbers = #tpu.dot_dimension_numbers<[1], [0], [0], [1], [0, 0, 1, 1], [], []>} : vector<8x8xf32>, vector<8x512xf32>, vector<8x512xf32> -> vector<8x512xf32>
    %190 = arith.addf %184, %189 : vector<8x512xf32>
    %c493_i32_103 = arith.constant 493 : i32
    %191 = tpu.dynamic_rotate %156 by %c493_i32_103 dim 1 : vector<8x512xf32>, i32 -> vector<8x512xf32>
    %c24 = arith.constant 24 : index
    %c0_104 = arith.constant 0 : index
    %c0_105 = arith.constant 0 : index
    %192 = vector.load %arg2[%c24, %c0_104, %c0_105] : memref<54x8x16xf32, #tpu.memory_space<vmem>>, vector<1x8x16xf32>
    %193 = vector.shape_cast %192 : vector<1x8x16xf32> to vector<8x16xf32>
    %194 = vector.extract_strided_slice %193 {offsets = [0, 0], sizes = [8, 8], strides = [1, 1]} : vector<8x16xf32> to vector<8x8xf32>
    %cst_106 = arith.constant dense<0.000000e+00> : vector<8x512xf32>
    %195 = tpu.matmul %194, %191, %cst_106 {dimension_numbers = #tpu.dot_dimension_numbers<[1], [0], [0], [1], [0, 0, 1, 1], [], []>} : vector<8x8xf32>, vector<8x512xf32>, vector<8x512xf32> -> vector<8x512xf32>
    %196 = arith.addf %190, %195 : vector<8x512xf32>
    %c492_i32_107 = arith.constant 492 : i32
    %197 = tpu.dynamic_rotate %156 by %c492_i32_107 dim 1 : vector<8x512xf32>, i32 -> vector<8x512xf32>
    %c25 = arith.constant 25 : index
    %c0_108 = arith.constant 0 : index
    %c0_109 = arith.constant 0 : index
    %198 = vector.load %arg2[%c25, %c0_108, %c0_109] : memref<54x8x16xf32, #tpu.memory_space<vmem>>, vector<1x8x16xf32>
    %199 = vector.shape_cast %198 : vector<1x8x16xf32> to vector<8x16xf32>
    %200 = vector.extract_strided_slice %199 {offsets = [0, 0], sizes = [8, 8], strides = [1, 1]} : vector<8x16xf32> to vector<8x8xf32>
    %cst_110 = arith.constant dense<0.000000e+00> : vector<8x512xf32>
    %201 = tpu.matmul %200, %197, %cst_110 {dimension_numbers = #tpu.dot_dimension_numbers<[1], [0], [0], [1], [0, 0, 1, 1], [], []>} : vector<8x8xf32>, vector<8x512xf32>, vector<8x512xf32> -> vector<8x512xf32>
    %202 = arith.addf %196, %201 : vector<8x512xf32>
    %c491_i32_111 = arith.constant 491 : i32
    %203 = tpu.dynamic_rotate %156 by %c491_i32_111 dim 1 : vector<8x512xf32>, i32 -> vector<8x512xf32>
    %c26 = arith.constant 26 : index
    %c0_112 = arith.constant 0 : index
    %c0_113 = arith.constant 0 : index
    %204 = vector.load %arg2[%c26, %c0_112, %c0_113] : memref<54x8x16xf32, #tpu.memory_space<vmem>>, vector<1x8x16xf32>
    %205 = vector.shape_cast %204 : vector<1x8x16xf32> to vector<8x16xf32>
    %206 = vector.extract_strided_slice %205 {offsets = [0, 0], sizes = [8, 8], strides = [1, 1]} : vector<8x16xf32> to vector<8x8xf32>
    %cst_114 = arith.constant dense<0.000000e+00> : vector<8x512xf32>
    %207 = tpu.matmul %206, %203, %cst_114 {dimension_numbers = #tpu.dot_dimension_numbers<[1], [0], [0], [1], [0, 0, 1, 1], [], []>} : vector<8x8xf32>, vector<8x512xf32>, vector<8x512xf32> -> vector<8x512xf32>
    %208 = arith.addf %202, %207 : vector<8x512xf32>
    %209 = arith.mulf %208, %0 : vector<8x512xf32>
    %cst_115 = arith.constant dense<0.000000e+00> : vector<8xf32>
    %210 = vector.multi_reduction <add>, %209, %cst_115 [1] : vector<8x512xf32> to vector<8xf32>
    %211 = vector.shape_cast %210 : vector<8xf32> to vector<8x1xf32>
    %212 = arith.mulf %209, %209 : vector<8x512xf32>
    %cst_116 = arith.constant dense<0.000000e+00> : vector<8xf32>
    %213 = vector.multi_reduction <add>, %212, %cst_116 [1] : vector<8x512xf32> to vector<8xf32>
    %214 = vector.shape_cast %213 : vector<8xf32> to vector<8x1xf32>
    %cst_117 = arith.constant 3.906250e-03 : f32
    %215 = vector.broadcast %cst_117 : f32 to vector<8x1xf32>
    %216 = arith.mulf %211, %215 : vector<8x1xf32>
    %cst_118 = arith.constant 3.906250e-03 : f32
    %217 = vector.broadcast %cst_118 : f32 to vector<8x1xf32>
    %218 = arith.mulf %214, %217 : vector<8x1xf32>
    %219 = arith.mulf %216, %216 : vector<8x1xf32>
    %220 = arith.subf %218, %219 : vector<8x1xf32>
    %cst_119 = arith.constant 0.000000e+00 : f32
    %221 = vector.broadcast %cst_119 : f32 to vector<8x1xf32>
    %222 = arith.maximumf %220, %221 : vector<8x1xf32>
    %223 = vector.broadcast %216 : vector<8x1xf32> to vector<8x512xf32>
    %224 = arith.subf %209, %223 : vector<8x512xf32>
    %cst_120 = arith.constant 9.99999974E-6 : f32
    %225 = vector.broadcast %cst_120 : f32 to vector<8x1xf32>
    %226 = arith.addf %222, %225 : vector<8x1xf32>
    %227 = math.rsqrt %226 : vector<8x1xf32>
    %228 = vector.broadcast %227 : vector<8x1xf32> to vector<8x512xf32>
    %229 = arith.mulf %224, %228 : vector<8x512xf32>
    %cst_121 = arith.constant 2.000000e-01 : f32
    %230 = vector.broadcast %cst_121 : f32 to vector<8x512xf32>
    %231 = arith.mulf %230, %229 : vector<8x512xf32>
    %232 = arith.maximumf %229, %231 : vector<8x512xf32>
    %233 = arith.mulf %232, %0 : vector<8x512xf32>
    %c42_i32 = arith.constant 42 : i32
    %234 = tpu.dynamic_rotate %233 by %c42_i32 dim 1 : vector<8x512xf32>, i32 -> vector<8x512xf32>
    %c27 = arith.constant 27 : index
    %c0_122 = arith.constant 0 : index
    %c0_123 = arith.constant 0 : index
    %235 = vector.load %arg2[%c27, %c0_122, %c0_123] : memref<54x8x16xf32, #tpu.memory_space<vmem>>, vector<1x8x16xf32>
    %236 = vector.shape_cast %235 : vector<1x8x16xf32> to vector<8x16xf32>
    %237 = vector.extract_strided_slice %236 {offsets = [0, 0], sizes = [8, 8], strides = [1, 1]} : vector<8x16xf32> to vector<8x8xf32>
    %cst_124 = arith.constant dense<0.000000e+00> : vector<8x512xf32>
    %238 = tpu.matmul %237, %234, %cst_124 {dimension_numbers = #tpu.dot_dimension_numbers<[1], [0], [0], [1], [0, 0, 1, 1], [], []>} : vector<8x8xf32>, vector<8x512xf32>, vector<8x512xf32> -> vector<8x512xf32>
    %c40_i32 = arith.constant 40 : i32
    %239 = tpu.dynamic_rotate %233 by %c40_i32 dim 1 : vector<8x512xf32>, i32 -> vector<8x512xf32>
    %c28 = arith.constant 28 : index
    %c0_125 = arith.constant 0 : index
    %c0_126 = arith.constant 0 : index
    %240 = vector.load %arg2[%c28, %c0_125, %c0_126] : memref<54x8x16xf32, #tpu.memory_space<vmem>>, vector<1x8x16xf32>
    %241 = vector.shape_cast %240 : vector<1x8x16xf32> to vector<8x16xf32>
    %242 = vector.extract_strided_slice %241 {offsets = [0, 0], sizes = [8, 8], strides = [1, 1]} : vector<8x16xf32> to vector<8x8xf32>
    %cst_127 = arith.constant dense<0.000000e+00> : vector<8x512xf32>
    %243 = tpu.matmul %242, %239, %cst_127 {dimension_numbers = #tpu.dot_dimension_numbers<[1], [0], [0], [1], [0, 0, 1, 1], [], []>} : vector<8x8xf32>, vector<8x512xf32>, vector<8x512xf32> -> vector<8x512xf32>
    %244 = arith.addf %238, %243 : vector<8x512xf32>
    %c38_i32 = arith.constant 38 : i32
    %245 = tpu.dynamic_rotate %233 by %c38_i32 dim 1 : vector<8x512xf32>, i32 -> vector<8x512xf32>
    %c29 = arith.constant 29 : index
    %c0_128 = arith.constant 0 : index
    %c0_129 = arith.constant 0 : index
    %246 = vector.load %arg2[%c29, %c0_128, %c0_129] : memref<54x8x16xf32, #tpu.memory_space<vmem>>, vector<1x8x16xf32>
    %247 = vector.shape_cast %246 : vector<1x8x16xf32> to vector<8x16xf32>
    %248 = vector.extract_strided_slice %247 {offsets = [0, 0], sizes = [8, 8], strides = [1, 1]} : vector<8x16xf32> to vector<8x8xf32>
    %cst_130 = arith.constant dense<0.000000e+00> : vector<8x512xf32>
    %249 = tpu.matmul %248, %245, %cst_130 {dimension_numbers = #tpu.dot_dimension_numbers<[1], [0], [0], [1], [0, 0, 1, 1], [], []>} : vector<8x8xf32>, vector<8x512xf32>, vector<8x512xf32> -> vector<8x512xf32>
    %250 = arith.addf %244, %249 : vector<8x512xf32>
    %c2_i32 = arith.constant 2 : i32
    %251 = tpu.dynamic_rotate %233 by %c2_i32 dim 1 : vector<8x512xf32>, i32 -> vector<8x512xf32>
    %c30 = arith.constant 30 : index
    %c0_131 = arith.constant 0 : index
    %c0_132 = arith.constant 0 : index
    %252 = vector.load %arg2[%c30, %c0_131, %c0_132] : memref<54x8x16xf32, #tpu.memory_space<vmem>>, vector<1x8x16xf32>
    %253 = vector.shape_cast %252 : vector<1x8x16xf32> to vector<8x16xf32>
    %254 = vector.extract_strided_slice %253 {offsets = [0, 0], sizes = [8, 8], strides = [1, 1]} : vector<8x16xf32> to vector<8x8xf32>
    %cst_133 = arith.constant dense<0.000000e+00> : vector<8x512xf32>
    %255 = tpu.matmul %254, %251, %cst_133 {dimension_numbers = #tpu.dot_dimension_numbers<[1], [0], [0], [1], [0, 0, 1, 1], [], []>} : vector<8x8xf32>, vector<8x512xf32>, vector<8x512xf32> -> vector<8x512xf32>
    %256 = arith.addf %250, %255 : vector<8x512xf32>
    %c31 = arith.constant 31 : index
    %c0_134 = arith.constant 0 : index
    %c0_135 = arith.constant 0 : index
    %257 = vector.load %arg2[%c31, %c0_134, %c0_135] : memref<54x8x16xf32, #tpu.memory_space<vmem>>, vector<1x8x16xf32>
    %258 = vector.shape_cast %257 : vector<1x8x16xf32> to vector<8x16xf32>
    %259 = vector.extract_strided_slice %258 {offsets = [0, 0], sizes = [8, 8], strides = [1, 1]} : vector<8x16xf32> to vector<8x8xf32>
    %cst_136 = arith.constant dense<0.000000e+00> : vector<8x512xf32>
    %260 = tpu.matmul %259, %233, %cst_136 {dimension_numbers = #tpu.dot_dimension_numbers<[1], [0], [0], [1], [0, 0, 1, 1], [], []>} : vector<8x8xf32>, vector<8x512xf32>, vector<8x512xf32> -> vector<8x512xf32>
    %261 = arith.addf %256, %260 : vector<8x512xf32>
    %c510_i32 = arith.constant 510 : i32
    %262 = tpu.dynamic_rotate %233 by %c510_i32 dim 1 : vector<8x512xf32>, i32 -> vector<8x512xf32>
    %c32 = arith.constant 32 : index
    %c0_137 = arith.constant 0 : index
    %c0_138 = arith.constant 0 : index
    %263 = vector.load %arg2[%c32, %c0_137, %c0_138] : memref<54x8x16xf32, #tpu.memory_space<vmem>>, vector<1x8x16xf32>
    %264 = vector.shape_cast %263 : vector<1x8x16xf32> to vector<8x16xf32>
    %265 = vector.extract_strided_slice %264 {offsets = [0, 0], sizes = [8, 8], strides = [1, 1]} : vector<8x16xf32> to vector<8x8xf32>
    %cst_139 = arith.constant dense<0.000000e+00> : vector<8x512xf32>
    %266 = tpu.matmul %265, %262, %cst_139 {dimension_numbers = #tpu.dot_dimension_numbers<[1], [0], [0], [1], [0, 0, 1, 1], [], []>} : vector<8x8xf32>, vector<8x512xf32>, vector<8x512xf32> -> vector<8x512xf32>
    %267 = arith.addf %261, %266 : vector<8x512xf32>
    %c474_i32 = arith.constant 474 : i32
    %268 = tpu.dynamic_rotate %233 by %c474_i32 dim 1 : vector<8x512xf32>, i32 -> vector<8x512xf32>
    %c33 = arith.constant 33 : index
    %c0_140 = arith.constant 0 : index
    %c0_141 = arith.constant 0 : index
    %269 = vector.load %arg2[%c33, %c0_140, %c0_141] : memref<54x8x16xf32, #tpu.memory_space<vmem>>, vector<1x8x16xf32>
    %270 = vector.shape_cast %269 : vector<1x8x16xf32> to vector<8x16xf32>
    %271 = vector.extract_strided_slice %270 {offsets = [0, 0], sizes = [8, 8], strides = [1, 1]} : vector<8x16xf32> to vector<8x8xf32>
    %cst_142 = arith.constant dense<0.000000e+00> : vector<8x512xf32>
    %272 = tpu.matmul %271, %268, %cst_142 {dimension_numbers = #tpu.dot_dimension_numbers<[1], [0], [0], [1], [0, 0, 1, 1], [], []>} : vector<8x8xf32>, vector<8x512xf32>, vector<8x512xf32> -> vector<8x512xf32>
    %273 = arith.addf %267, %272 : vector<8x512xf32>
    %c472_i32 = arith.constant 472 : i32
    %274 = tpu.dynamic_rotate %233 by %c472_i32 dim 1 : vector<8x512xf32>, i32 -> vector<8x512xf32>
    %c34 = arith.constant 34 : index
    %c0_143 = arith.constant 0 : index
    %c0_144 = arith.constant 0 : index
    %275 = vector.load %arg2[%c34, %c0_143, %c0_144] : memref<54x8x16xf32, #tpu.memory_space<vmem>>, vector<1x8x16xf32>
    %276 = vector.shape_cast %275 : vector<1x8x16xf32> to vector<8x16xf32>
    %277 = vector.extract_strided_slice %276 {offsets = [0, 0], sizes = [8, 8], strides = [1, 1]} : vector<8x16xf32> to vector<8x8xf32>
    %cst_145 = arith.constant dense<0.000000e+00> : vector<8x512xf32>
    %278 = tpu.matmul %277, %274, %cst_145 {dimension_numbers = #tpu.dot_dimension_numbers<[1], [0], [0], [1], [0, 0, 1, 1], [], []>} : vector<8x8xf32>, vector<8x512xf32>, vector<8x512xf32> -> vector<8x512xf32>
    %279 = arith.addf %273, %278 : vector<8x512xf32>
    %c470_i32 = arith.constant 470 : i32
    %280 = tpu.dynamic_rotate %233 by %c470_i32 dim 1 : vector<8x512xf32>, i32 -> vector<8x512xf32>
    %c35 = arith.constant 35 : index
    %c0_146 = arith.constant 0 : index
    %c0_147 = arith.constant 0 : index
    %281 = vector.load %arg2[%c35, %c0_146, %c0_147] : memref<54x8x16xf32, #tpu.memory_space<vmem>>, vector<1x8x16xf32>
    %282 = vector.shape_cast %281 : vector<1x8x16xf32> to vector<8x16xf32>
    %283 = vector.extract_strided_slice %282 {offsets = [0, 0], sizes = [8, 8], strides = [1, 1]} : vector<8x16xf32> to vector<8x8xf32>
    %cst_148 = arith.constant dense<0.000000e+00> : vector<8x512xf32>
    %284 = tpu.matmul %283, %280, %cst_148 {dimension_numbers = #tpu.dot_dimension_numbers<[1], [0], [0], [1], [0, 0, 1, 1], [], []>} : vector<8x8xf32>, vector<8x512xf32>, vector<8x512xf32> -> vector<8x512xf32>
    %285 = arith.addf %279, %284 : vector<8x512xf32>
    %286 = arith.mulf %285, %0 : vector<8x512xf32>
    %cst_149 = arith.constant dense<0.000000e+00> : vector<8xf32>
    %287 = vector.multi_reduction <add>, %286, %cst_149 [1] : vector<8x512xf32> to vector<8xf32>
    %288 = vector.shape_cast %287 : vector<8xf32> to vector<8x1xf32>
    %289 = arith.mulf %286, %286 : vector<8x512xf32>
    %cst_150 = arith.constant dense<0.000000e+00> : vector<8xf32>
    %290 = vector.multi_reduction <add>, %289, %cst_150 [1] : vector<8x512xf32> to vector<8xf32>
    %291 = vector.shape_cast %290 : vector<8xf32> to vector<8x1xf32>
    %cst_151 = arith.constant 3.906250e-03 : f32
    %292 = vector.broadcast %cst_151 : f32 to vector<8x1xf32>
    %293 = arith.mulf %288, %292 : vector<8x1xf32>
    %cst_152 = arith.constant 3.906250e-03 : f32
    %294 = vector.broadcast %cst_152 : f32 to vector<8x1xf32>
    %295 = arith.mulf %291, %294 : vector<8x1xf32>
    %296 = arith.mulf %293, %293 : vector<8x1xf32>
    %297 = arith.subf %295, %296 : vector<8x1xf32>
    %cst_153 = arith.constant 0.000000e+00 : f32
    %298 = vector.broadcast %cst_153 : f32 to vector<8x1xf32>
    %299 = arith.maximumf %297, %298 : vector<8x1xf32>
    %300 = vector.broadcast %293 : vector<8x1xf32> to vector<8x512xf32>
    %301 = arith.subf %286, %300 : vector<8x512xf32>
    %cst_154 = arith.constant 9.99999974E-6 : f32
    %302 = vector.broadcast %cst_154 : f32 to vector<8x1xf32>
    %303 = arith.addf %299, %302 : vector<8x1xf32>
    %304 = math.rsqrt %303 : vector<8x1xf32>
    %305 = vector.broadcast %304 : vector<8x1xf32> to vector<8x512xf32>
    %306 = arith.mulf %301, %305 : vector<8x512xf32>
    %cst_155 = arith.constant 2.000000e-01 : f32
    %307 = vector.broadcast %cst_155 : f32 to vector<8x512xf32>
    %308 = arith.mulf %307, %306 : vector<8x512xf32>
    %309 = arith.maximumf %306, %308 : vector<8x512xf32>
    %310 = arith.mulf %309, %0 : vector<8x512xf32>
    %311 = tpu.concatenate %310, %233 in 0 : vector<8x512xf32>, vector<8x512xf32> -> vector<16x512xf32>
    %c21_i32_156 = arith.constant 21 : i32
    %312 = tpu.dynamic_rotate %311 by %c21_i32_156 dim 1 : vector<16x512xf32>, i32 -> vector<16x512xf32>
    %c36 = arith.constant 36 : index
    %c0_157 = arith.constant 0 : index
    %c0_158 = arith.constant 0 : index
    %313 = vector.load %arg2[%c36, %c0_157, %c0_158] : memref<54x8x16xf32, #tpu.memory_space<vmem>>, vector<1x8x16xf32>
    %314 = vector.shape_cast %313 : vector<1x8x16xf32> to vector<8x16xf32>
    %cst_159 = arith.constant dense<0.000000e+00> : vector<8x512xf32>
    %315 = tpu.matmul %314, %312, %cst_159 {dimension_numbers = #tpu.dot_dimension_numbers<[1], [0], [0], [1], [0, 0, 1, 1], [], []>} : vector<8x16xf32>, vector<16x512xf32>, vector<8x512xf32> -> vector<8x512xf32>
    %c20_i32_160 = arith.constant 20 : i32
    %316 = tpu.dynamic_rotate %311 by %c20_i32_160 dim 1 : vector<16x512xf32>, i32 -> vector<16x512xf32>
    %c37 = arith.constant 37 : index
    %c0_161 = arith.constant 0 : index
    %c0_162 = arith.constant 0 : index
    %317 = vector.load %arg2[%c37, %c0_161, %c0_162] : memref<54x8x16xf32, #tpu.memory_space<vmem>>, vector<1x8x16xf32>
    %318 = vector.shape_cast %317 : vector<1x8x16xf32> to vector<8x16xf32>
    %cst_163 = arith.constant dense<0.000000e+00> : vector<8x512xf32>
    %319 = tpu.matmul %318, %316, %cst_163 {dimension_numbers = #tpu.dot_dimension_numbers<[1], [0], [0], [1], [0, 0, 1, 1], [], []>} : vector<8x16xf32>, vector<16x512xf32>, vector<8x512xf32> -> vector<8x512xf32>
    %320 = arith.addf %315, %319 : vector<8x512xf32>
    %c19_i32_164 = arith.constant 19 : i32
    %321 = tpu.dynamic_rotate %311 by %c19_i32_164 dim 1 : vector<16x512xf32>, i32 -> vector<16x512xf32>
    %c38 = arith.constant 38 : index
    %c0_165 = arith.constant 0 : index
    %c0_166 = arith.constant 0 : index
    %322 = vector.load %arg2[%c38, %c0_165, %c0_166] : memref<54x8x16xf32, #tpu.memory_space<vmem>>, vector<1x8x16xf32>
    %323 = vector.shape_cast %322 : vector<1x8x16xf32> to vector<8x16xf32>
    %cst_167 = arith.constant dense<0.000000e+00> : vector<8x512xf32>
    %324 = tpu.matmul %323, %321, %cst_167 {dimension_numbers = #tpu.dot_dimension_numbers<[1], [0], [0], [1], [0, 0, 1, 1], [], []>} : vector<8x16xf32>, vector<16x512xf32>, vector<8x512xf32> -> vector<8x512xf32>
    %325 = arith.addf %320, %324 : vector<8x512xf32>
    %c1_i32_168 = arith.constant 1 : i32
    %326 = tpu.dynamic_rotate %311 by %c1_i32_168 dim 1 : vector<16x512xf32>, i32 -> vector<16x512xf32>
    %c39 = arith.constant 39 : index
    %c0_169 = arith.constant 0 : index
    %c0_170 = arith.constant 0 : index
    %327 = vector.load %arg2[%c39, %c0_169, %c0_170] : memref<54x8x16xf32, #tpu.memory_space<vmem>>, vector<1x8x16xf32>
    %328 = vector.shape_cast %327 : vector<1x8x16xf32> to vector<8x16xf32>
    %cst_171 = arith.constant dense<0.000000e+00> : vector<8x512xf32>
    %329 = tpu.matmul %328, %326, %cst_171 {dimension_numbers = #tpu.dot_dimension_numbers<[1], [0], [0], [1], [0, 0, 1, 1], [], []>} : vector<8x16xf32>, vector<16x512xf32>, vector<8x512xf32> -> vector<8x512xf32>
    %330 = arith.addf %325, %329 : vector<8x512xf32>
    %c40 = arith.constant 40 : index
    %c0_172 = arith.constant 0 : index
    %c0_173 = arith.constant 0 : index
    %331 = vector.load %arg2[%c40, %c0_172, %c0_173] : memref<54x8x16xf32, #tpu.memory_space<vmem>>, vector<1x8x16xf32>
    %332 = vector.shape_cast %331 : vector<1x8x16xf32> to vector<8x16xf32>
    %cst_174 = arith.constant dense<0.000000e+00> : vector<8x512xf32>
    %333 = tpu.matmul %332, %311, %cst_174 {dimension_numbers = #tpu.dot_dimension_numbers<[1], [0], [0], [1], [0, 0, 1, 1], [], []>} : vector<8x16xf32>, vector<16x512xf32>, vector<8x512xf32> -> vector<8x512xf32>
    %334 = arith.addf %330, %333 : vector<8x512xf32>
    %c511_i32_175 = arith.constant 511 : i32
    %335 = tpu.dynamic_rotate %311 by %c511_i32_175 dim 1 : vector<16x512xf32>, i32 -> vector<16x512xf32>
    %c41 = arith.constant 41 : index
    %c0_176 = arith.constant 0 : index
    %c0_177 = arith.constant 0 : index
    %336 = vector.load %arg2[%c41, %c0_176, %c0_177] : memref<54x8x16xf32, #tpu.memory_space<vmem>>, vector<1x8x16xf32>
    %337 = vector.shape_cast %336 : vector<1x8x16xf32> to vector<8x16xf32>
    %cst_178 = arith.constant dense<0.000000e+00> : vector<8x512xf32>
    %338 = tpu.matmul %337, %335, %cst_178 {dimension_numbers = #tpu.dot_dimension_numbers<[1], [0], [0], [1], [0, 0, 1, 1], [], []>} : vector<8x16xf32>, vector<16x512xf32>, vector<8x512xf32> -> vector<8x512xf32>
    %339 = arith.addf %334, %338 : vector<8x512xf32>
    %c493_i32_179 = arith.constant 493 : i32
    %340 = tpu.dynamic_rotate %311 by %c493_i32_179 dim 1 : vector<16x512xf32>, i32 -> vector<16x512xf32>
    %c42 = arith.constant 42 : index
    %c0_180 = arith.constant 0 : index
    %c0_181 = arith.constant 0 : index
    %341 = vector.load %arg2[%c42, %c0_180, %c0_181] : memref<54x8x16xf32, #tpu.memory_space<vmem>>, vector<1x8x16xf32>
    %342 = vector.shape_cast %341 : vector<1x8x16xf32> to vector<8x16xf32>
    %cst_182 = arith.constant dense<0.000000e+00> : vector<8x512xf32>
    %343 = tpu.matmul %342, %340, %cst_182 {dimension_numbers = #tpu.dot_dimension_numbers<[1], [0], [0], [1], [0, 0, 1, 1], [], []>} : vector<8x16xf32>, vector<16x512xf32>, vector<8x512xf32> -> vector<8x512xf32>
    %344 = arith.addf %339, %343 : vector<8x512xf32>
    %c492_i32_183 = arith.constant 492 : i32
    %345 = tpu.dynamic_rotate %311 by %c492_i32_183 dim 1 : vector<16x512xf32>, i32 -> vector<16x512xf32>
    %c43 = arith.constant 43 : index
    %c0_184 = arith.constant 0 : index
    %c0_185 = arith.constant 0 : index
    %346 = vector.load %arg2[%c43, %c0_184, %c0_185] : memref<54x8x16xf32, #tpu.memory_space<vmem>>, vector<1x8x16xf32>
    %347 = vector.shape_cast %346 : vector<1x8x16xf32> to vector<8x16xf32>
    %cst_186 = arith.constant dense<0.000000e+00> : vector<8x512xf32>
    %348 = tpu.matmul %347, %345, %cst_186 {dimension_numbers = #tpu.dot_dimension_numbers<[1], [0], [0], [1], [0, 0, 1, 1], [], []>} : vector<8x16xf32>, vector<16x512xf32>, vector<8x512xf32> -> vector<8x512xf32>
    %349 = arith.addf %344, %348 : vector<8x512xf32>
    %c491_i32_187 = arith.constant 491 : i32
    %350 = tpu.dynamic_rotate %311 by %c491_i32_187 dim 1 : vector<16x512xf32>, i32 -> vector<16x512xf32>
    %c44 = arith.constant 44 : index
    %c0_188 = arith.constant 0 : index
    %c0_189 = arith.constant 0 : index
    %351 = vector.load %arg2[%c44, %c0_188, %c0_189] : memref<54x8x16xf32, #tpu.memory_space<vmem>>, vector<1x8x16xf32>
    %352 = vector.shape_cast %351 : vector<1x8x16xf32> to vector<8x16xf32>
    %cst_190 = arith.constant dense<0.000000e+00> : vector<8x512xf32>
    %353 = tpu.matmul %352, %350, %cst_190 {dimension_numbers = #tpu.dot_dimension_numbers<[1], [0], [0], [1], [0, 0, 1, 1], [], []>} : vector<8x16xf32>, vector<16x512xf32>, vector<8x512xf32> -> vector<8x512xf32>
    %354 = arith.addf %349, %353 : vector<8x512xf32>
    %355 = arith.mulf %354, %0 : vector<8x512xf32>
    %cst_191 = arith.constant dense<0.000000e+00> : vector<8xf32>
    %356 = vector.multi_reduction <add>, %355, %cst_191 [1] : vector<8x512xf32> to vector<8xf32>
    %357 = vector.shape_cast %356 : vector<8xf32> to vector<8x1xf32>
    %358 = arith.mulf %355, %355 : vector<8x512xf32>
    %cst_192 = arith.constant dense<0.000000e+00> : vector<8xf32>
    %359 = vector.multi_reduction <add>, %358, %cst_192 [1] : vector<8x512xf32> to vector<8xf32>
    %360 = vector.shape_cast %359 : vector<8xf32> to vector<8x1xf32>
    %cst_193 = arith.constant 3.906250e-03 : f32
    %361 = vector.broadcast %cst_193 : f32 to vector<8x1xf32>
    %362 = arith.mulf %357, %361 : vector<8x1xf32>
    %cst_194 = arith.constant 3.906250e-03 : f32
    %363 = vector.broadcast %cst_194 : f32 to vector<8x1xf32>
    %364 = arith.mulf %360, %363 : vector<8x1xf32>
    %365 = arith.mulf %362, %362 : vector<8x1xf32>
    %366 = arith.subf %364, %365 : vector<8x1xf32>
    %cst_195 = arith.constant 0.000000e+00 : f32
    %367 = vector.broadcast %cst_195 : f32 to vector<8x1xf32>
    %368 = arith.maximumf %366, %367 : vector<8x1xf32>
    %369 = vector.broadcast %362 : vector<8x1xf32> to vector<8x512xf32>
    %370 = arith.subf %355, %369 : vector<8x512xf32>
    %cst_196 = arith.constant 9.99999974E-6 : f32
    %371 = vector.broadcast %cst_196 : f32 to vector<8x1xf32>
    %372 = arith.addf %368, %371 : vector<8x1xf32>
    %373 = math.rsqrt %372 : vector<8x1xf32>
    %374 = vector.broadcast %373 : vector<8x1xf32> to vector<8x512xf32>
    %375 = arith.mulf %370, %374 : vector<8x512xf32>
    %cst_197 = arith.constant 2.000000e-01 : f32
    %376 = vector.broadcast %cst_197 : f32 to vector<8x512xf32>
    %377 = arith.mulf %376, %375 : vector<8x512xf32>
    %378 = arith.maximumf %375, %377 : vector<8x512xf32>
    %379 = arith.mulf %378, %0 : vector<8x512xf32>
    %380 = tpu.concatenate %379, %156 in 0 : vector<8x512xf32>, vector<8x512xf32> -> vector<16x512xf32>
    %c21_i32_198 = arith.constant 21 : i32
    %381 = tpu.dynamic_rotate %380 by %c21_i32_198 dim 1 : vector<16x512xf32>, i32 -> vector<16x512xf32>
    %c45 = arith.constant 45 : index
    %c0_199 = arith.constant 0 : index
    %c0_200 = arith.constant 0 : index
    %382 = vector.load %arg2[%c45, %c0_199, %c0_200] : memref<54x8x16xf32, #tpu.memory_space<vmem>>, vector<1x8x16xf32>
    %383 = vector.shape_cast %382 : vector<1x8x16xf32> to vector<8x16xf32>
    %cst_201 = arith.constant dense<0.000000e+00> : vector<8x512xf32>
    %384 = tpu.matmul %383, %381, %cst_201 {dimension_numbers = #tpu.dot_dimension_numbers<[1], [0], [0], [1], [0, 0, 1, 1], [], []>} : vector<8x16xf32>, vector<16x512xf32>, vector<8x512xf32> -> vector<8x512xf32>
    %c20_i32_202 = arith.constant 20 : i32
    %385 = tpu.dynamic_rotate %380 by %c20_i32_202 dim 1 : vector<16x512xf32>, i32 -> vector<16x512xf32>
    %c46 = arith.constant 46 : index
    %c0_203 = arith.constant 0 : index
    %c0_204 = arith.constant 0 : index
    %386 = vector.load %arg2[%c46, %c0_203, %c0_204] : memref<54x8x16xf32, #tpu.memory_space<vmem>>, vector<1x8x16xf32>
    %387 = vector.shape_cast %386 : vector<1x8x16xf32> to vector<8x16xf32>
    %cst_205 = arith.constant dense<0.000000e+00> : vector<8x512xf32>
    %388 = tpu.matmul %387, %385, %cst_205 {dimension_numbers = #tpu.dot_dimension_numbers<[1], [0], [0], [1], [0, 0, 1, 1], [], []>} : vector<8x16xf32>, vector<16x512xf32>, vector<8x512xf32> -> vector<8x512xf32>
    %389 = arith.addf %384, %388 : vector<8x512xf32>
    %c19_i32_206 = arith.constant 19 : i32
    %390 = tpu.dynamic_rotate %380 by %c19_i32_206 dim 1 : vector<16x512xf32>, i32 -> vector<16x512xf32>
    %c47 = arith.constant 47 : index
    %c0_207 = arith.constant 0 : index
    %c0_208 = arith.constant 0 : index
    %391 = vector.load %arg2[%c47, %c0_207, %c0_208] : memref<54x8x16xf32, #tpu.memory_space<vmem>>, vector<1x8x16xf32>
    %392 = vector.shape_cast %391 : vector<1x8x16xf32> to vector<8x16xf32>
    %cst_209 = arith.constant dense<0.000000e+00> : vector<8x512xf32>
    %393 = tpu.matmul %392, %390, %cst_209 {dimension_numbers = #tpu.dot_dimension_numbers<[1], [0], [0], [1], [0, 0, 1, 1], [], []>} : vector<8x16xf32>, vector<16x512xf32>, vector<8x512xf32> -> vector<8x512xf32>
    %394 = arith.addf %389, %393 : vector<8x512xf32>
    %c1_i32_210 = arith.constant 1 : i32
    %395 = tpu.dynamic_rotate %380 by %c1_i32_210 dim 1 : vector<16x512xf32>, i32 -> vector<16x512xf32>
    %c48 = arith.constant 48 : index
    %c0_211 = arith.constant 0 : index
    %c0_212 = arith.constant 0 : index
    %396 = vector.load %arg2[%c48, %c0_211, %c0_212] : memref<54x8x16xf32, #tpu.memory_space<vmem>>, vector<1x8x16xf32>
    %397 = vector.shape_cast %396 : vector<1x8x16xf32> to vector<8x16xf32>
    %cst_213 = arith.constant dense<0.000000e+00> : vector<8x512xf32>
    %398 = tpu.matmul %397, %395, %cst_213 {dimension_numbers = #tpu.dot_dimension_numbers<[1], [0], [0], [1], [0, 0, 1, 1], [], []>} : vector<8x16xf32>, vector<16x512xf32>, vector<8x512xf32> -> vector<8x512xf32>
    %399 = arith.addf %394, %398 : vector<8x512xf32>
    %c49 = arith.constant 49 : index
    %c0_214 = arith.constant 0 : index
    %c0_215 = arith.constant 0 : index
    %400 = vector.load %arg2[%c49, %c0_214, %c0_215] : memref<54x8x16xf32, #tpu.memory_space<vmem>>, vector<1x8x16xf32>
    %401 = vector.shape_cast %400 : vector<1x8x16xf32> to vector<8x16xf32>
    %cst_216 = arith.constant dense<0.000000e+00> : vector<8x512xf32>
    %402 = tpu.matmul %401, %380, %cst_216 {dimension_numbers = #tpu.dot_dimension_numbers<[1], [0], [0], [1], [0, 0, 1, 1], [], []>} : vector<8x16xf32>, vector<16x512xf32>, vector<8x512xf32> -> vector<8x512xf32>
    %403 = arith.addf %399, %402 : vector<8x512xf32>
    %c511_i32_217 = arith.constant 511 : i32
    %404 = tpu.dynamic_rotate %380 by %c511_i32_217 dim 1 : vector<16x512xf32>, i32 -> vector<16x512xf32>
    %c50 = arith.constant 50 : index
    %c0_218 = arith.constant 0 : index
    %c0_219 = arith.constant 0 : index
    %405 = vector.load %arg2[%c50, %c0_218, %c0_219] : memref<54x8x16xf32, #tpu.memory_space<vmem>>, vector<1x8x16xf32>
    %406 = vector.shape_cast %405 : vector<1x8x16xf32> to vector<8x16xf32>
    %cst_220 = arith.constant dense<0.000000e+00> : vector<8x512xf32>
    %407 = tpu.matmul %406, %404, %cst_220 {dimension_numbers = #tpu.dot_dimension_numbers<[1], [0], [0], [1], [0, 0, 1, 1], [], []>} : vector<8x16xf32>, vector<16x512xf32>, vector<8x512xf32> -> vector<8x512xf32>
    %408 = arith.addf %403, %407 : vector<8x512xf32>
    %c493_i32_221 = arith.constant 493 : i32
    %409 = tpu.dynamic_rotate %380 by %c493_i32_221 dim 1 : vector<16x512xf32>, i32 -> vector<16x512xf32>
    %c51 = arith.constant 51 : index
    %c0_222 = arith.constant 0 : index
    %c0_223 = arith.constant 0 : index
    %410 = vector.load %arg2[%c51, %c0_222, %c0_223] : memref<54x8x16xf32, #tpu.memory_space<vmem>>, vector<1x8x16xf32>
    %411 = vector.shape_cast %410 : vector<1x8x16xf32> to vector<8x16xf32>
    %cst_224 = arith.constant dense<0.000000e+00> : vector<8x512xf32>
    %412 = tpu.matmul %411, %409, %cst_224 {dimension_numbers = #tpu.dot_dimension_numbers<[1], [0], [0], [1], [0, 0, 1, 1], [], []>} : vector<8x16xf32>, vector<16x512xf32>, vector<8x512xf32> -> vector<8x512xf32>
    %413 = arith.addf %408, %412 : vector<8x512xf32>
    %c492_i32_225 = arith.constant 492 : i32
    %414 = tpu.dynamic_rotate %380 by %c492_i32_225 dim 1 : vector<16x512xf32>, i32 -> vector<16x512xf32>
    %c52 = arith.constant 52 : index
    %c0_226 = arith.constant 0 : index
    %c0_227 = arith.constant 0 : index
    %415 = vector.load %arg2[%c52, %c0_226, %c0_227] : memref<54x8x16xf32, #tpu.memory_space<vmem>>, vector<1x8x16xf32>
    %416 = vector.shape_cast %415 : vector<1x8x16xf32> to vector<8x16xf32>
    %cst_228 = arith.constant dense<0.000000e+00> : vector<8x512xf32>
    %417 = tpu.matmul %416, %414, %cst_228 {dimension_numbers = #tpu.dot_dimension_numbers<[1], [0], [0], [1], [0, 0, 1, 1], [], []>} : vector<8x16xf32>, vector<16x512xf32>, vector<8x512xf32> -> vector<8x512xf32>
    %418 = arith.addf %413, %417 : vector<8x512xf32>
    %c491_i32_229 = arith.constant 491 : i32
    %419 = tpu.dynamic_rotate %380 by %c491_i32_229 dim 1 : vector<16x512xf32>, i32 -> vector<16x512xf32>
    %c53 = arith.constant 53 : index
    %c0_230 = arith.constant 0 : index
    %c0_231 = arith.constant 0 : index
    %420 = vector.load %arg2[%c53, %c0_230, %c0_231] : memref<54x8x16xf32, #tpu.memory_space<vmem>>, vector<1x8x16xf32>
    %421 = vector.shape_cast %420 : vector<1x8x16xf32> to vector<8x16xf32>
    %cst_232 = arith.constant dense<0.000000e+00> : vector<8x512xf32>
    %422 = tpu.matmul %421, %419, %cst_232 {dimension_numbers = #tpu.dot_dimension_numbers<[1], [0], [0], [1], [0, 0, 1, 1], [], []>} : vector<8x16xf32>, vector<16x512xf32>, vector<8x512xf32> -> vector<8x512xf32>
    %423 = arith.addf %418, %422 : vector<8x512xf32>
    %424 = arith.mulf %423, %0 : vector<8x512xf32>
    %cst_233 = arith.constant dense<0.000000e+00> : vector<8xf32>
    %425 = vector.multi_reduction <add>, %424, %cst_233 [1] : vector<8x512xf32> to vector<8xf32>
    %426 = vector.shape_cast %425 : vector<8xf32> to vector<8x1xf32>
    %427 = arith.mulf %424, %424 : vector<8x512xf32>
    %cst_234 = arith.constant dense<0.000000e+00> : vector<8xf32>
    %428 = vector.multi_reduction <add>, %427, %cst_234 [1] : vector<8x512xf32> to vector<8xf32>
    %429 = vector.shape_cast %428 : vector<8xf32> to vector<8x1xf32>
    %cst_235 = arith.constant 3.906250e-03 : f32
    %430 = vector.broadcast %cst_235 : f32 to vector<8x1xf32>
    %431 = arith.mulf %426, %430 : vector<8x1xf32>
    %cst_236 = arith.constant 3.906250e-03 : f32
    %432 = vector.broadcast %cst_236 : f32 to vector<8x1xf32>
    %433 = arith.mulf %429, %432 : vector<8x1xf32>
    %434 = arith.mulf %431, %431 : vector<8x1xf32>
    %435 = arith.subf %433, %434 : vector<8x1xf32>
    %cst_237 = arith.constant 0.000000e+00 : f32
    %436 = vector.broadcast %cst_237 : f32 to vector<8x1xf32>
    %437 = arith.maximumf %435, %436 : vector<8x1xf32>
    %438 = vector.broadcast %431 : vector<8x1xf32> to vector<8x512xf32>
    %439 = arith.subf %424, %438 : vector<8x512xf32>
    %cst_238 = arith.constant 9.99999974E-6 : f32
    %440 = vector.broadcast %cst_238 : f32 to vector<8x1xf32>
    %441 = arith.addf %437, %440 : vector<8x1xf32>
    %442 = math.rsqrt %441 : vector<8x1xf32>
    %443 = vector.broadcast %442 : vector<8x1xf32> to vector<8x512xf32>
    %444 = arith.mulf %439, %443 : vector<8x512xf32>
    %cst_239 = arith.constant 2.000000e-01 : f32
    %445 = vector.broadcast %cst_239 : f32 to vector<8x512xf32>
    %446 = arith.mulf %445, %444 : vector<8x512xf32>
    %447 = arith.maximumf %444, %446 : vector<8x512xf32>
    %448 = arith.mulf %447, %0 : vector<8x512xf32>
    %449 = arith.addf %448, %79 : vector<8x512xf32>
    %c0_240 = arith.constant 0 : index
    %c0_241 = arith.constant 0 : index
    %c0_242 = arith.constant 0 : index
    %450 = vector.load %arg4[%c0_240, %c0_241, %c0_242] : memref<1x8x512xf32, #tpu.memory_space<vmem>>, vector<1x8x512xf32>
    %451 = vector.shape_cast %450 : vector<1x8x512xf32> to vector<8x512xf32>
    %452 = vector.shape_cast %449 : vector<8x512xf32> to vector<1x8x512xf32>
    tpu.vector_store %arg4[%c0_240, %c0_241, %c0_242], %452 {strides = array<i32>} : memref<1x8x512xf32, #tpu.memory_space<vmem>>, vector<1x8x512xf32>,
    return
  }
  func.func @transform_0(%arg0: i32) -> (i32, i32, i32) {
    %c0_i32 = arith.constant 0 : i32
    %c0_i32_0 = arith.constant 0 : i32
    %c0_i32_1 = arith.constant 0 : i32
    return %arg0, %c0_i32, %c0_i32_0 : i32, i32, i32
  }
  func.func @transform_1(%arg0: i32) -> (i32, i32, i32) {
    %c0_i32 = arith.constant 0 : i32
    %c0_i32_0 = arith.constant 0 : i32
    %c0_i32_1 = arith.constant 0 : i32
    %c0_i32_2 = arith.constant 0 : i32
    return %c0_i32, %c0_i32_0, %c0_i32_1 : i32, i32, i32
  }
  func.func @transform_2(%arg0: i32) -> (i32, i32) {
    %c0_i32 = arith.constant 0 : i32
    %c0_i32_0 = arith.constant 0 : i32
    %c0_i32_1 = arith.constant 0 : i32
    return %c0_i32, %c0_i32_0 : i32, i32
  }
  func.func @transform_3(%arg0: i32) -> (i32, i32, i32) {
    %c0_i32 = arith.constant 0 : i32
    %c0_i32_0 = arith.constant 0 : i32
    %c0_i32_1 = arith.constant 0 : i32
    return %arg0, %c0_i32, %c0_i32_0 : i32, i32, i32
  }
}

</mosaic_0001>

<bundles_post_ra>
// kernel: unet_flat_forward.1
= control target key start
LH: loop header
LB: loop body
LE: loop exit
PB: predicated region body
PF: predicated region fallthrough
CT: control target
= control target key end

     0   :  { %s10109_s12 = smov 0   ;;  %s11557_s0 = inlined_call_operand.vmem [shape: f32[2,8,512], index: 0, kind: input, shape index: {}]   ;;  %s11558_s1 = inlined_call_operand.vmem [shape: f32[54,8,16], index: 1, kind: input, shape index: {}]   ;;  %s11559_s2 = inlined_call_operand.vmem [shape: f32[8,512], index: 2, kind: input, shape index: {}]   ;;  %s11560_s3 = inlined_call_operand.vmem [shape: f32[2,8,512], index: 3, kind: output, shape index: {}]  }
   0x1 LB: > { %s9309_s13 = sadd.s32 4294967295, %s10070_s12   ;;  %p9313_p0 = scmp.ge.s32.totalorder %s10070_s12, 1  ;;  %s10070_s12 = sphi %s10109_s12, %s13_s12  }
   0x2   : > { %p137_p1 = scmp.lt.s32.totalorder %s10070_s12, 3 }
   0x4   : > { %p138_p2 = pnand %p9313_p0, %p137_p1 }
   0x6   : > { %141 = sbr.rel (%p138_p2) target bundleno = 3499 (0xdab), region = 32 }
   0xd   : > { %p161_p3 = scmp.lt.s32.totalorder %s9309_s13, 1  ;;  %v11561_v0 = vmov 0.0   ;;  %s10073_s18 = smov 20   ;;  %v187_v5 = vlaneseq  ;;  %v9318_v14 = vld [vmem:[%s11558_s1 + $0x8] sm:$0xff]  ;;  %vm210_vm1 = vcmask 64512   ;;  %v194_v24 = vld [vmem:[%s11558_s1] sm:$0xff] }
   0xe   : > { %278 = vmatprep.mubr.f32.mxu0 %v11561_v0  ;;  %349 = vmatprep.mubr.f32.mxu1 %v11561_v0  ;;  %s10074_s19 = smov 21   ;;  %s10075_s20 = smov 19   ;;  %v9323_v33 = vld [vmem:[%s11558_s1 + $0x10] sm:$0xff]  ;;  %v9326_v42 = vld [vmem:[%s11558_s1 + $0x18] sm:$0xff]  ;;  %v9329_v48 = vld [vmem:[%s11558_s1 + $0x20] sm:$0xff] }
   0xf   : > { %s11601_s13 = smov (!%p161_p3, %s9309_s13), 1  ;;  %s10076_s21 = smov 1   ;;  %v10199_v6 = vand.u32 127, %v187_v5  ;;  %v9332_v57 = vld [vmem:[%s11558_s1 + $0x28] sm:$0xff] }
  0x10   : > { %s9481_s14 = sshll.u32 %s11601_s13, 5  ;;  %s10077_s22 = smov 127  }
  0x11   : > { %s165_s17 = scalar_lea.vmem %s11557_s0, %s9481_s14  ;;  %s10078_s23 = smov 109   ;;  %vm203_vm0 = vcmp.lt.s32.totalorder %v10199_v6, 20  ;;  %vm189_vm2 = vcmp.lt.s32.totalorder %v10199_v6, 21  ;;  %vm509_vm3 = vcmp.lt.s32.totalorder %v10199_v6, 19  ;;  %vm673_vm4 = vcmp.lt.s32.totalorder %v10199_v6, 1 }
  0x12   : > { %v10127_v1 = vld [vmem:[%s165_s17 + $0x18] sm:$0xff]  ;;  %v10129_v2 = vld [vmem:[%s165_s17] sm:$0xff]  ;;  %v10135_v3 = vld [vmem:[%s165_s17 + $0x10] sm:$0xff]  ;;  %s10079_s24 = smov 108   ;;  %s10080_s25 = smov 107   ;;  %vm988_vm5 = vcmp.lt.s32.totalorder %v10199_v6, 127 }
  0x13   : > { %201 = vrot.lane.b32.xlu1 %v10127_v1, %s10073_s18  ;;  %195 = vrot.lane.b32.xlu0 %v10129_v2, %s10073_s18  ;;  %v10137_v4 = vld [vmem:[%s165_s17 + $0x8] sm:$0xff]  ;;  %vm1152_vm6 = vcmp.lt.s32.totalorder %v10199_v6, 109  ;;  %vm1316_vm7 = vcmp.lt.s32.totalorder %v10199_v6, 108  ;;  %vm1480_vm8 = vcmp.lt.s32.totalorder %v10199_v6, 107  ;;  %s10081_s16 = smov 40   ;;  %s10082_s17 = smov 42  }
  0x14   : > { %s10083_s26 = smov 38   ;;  %s10084_s27 = smov 2   ;;  %vm4688_vm9 = vcmp.lt.s32.totalorder %v10199_v6, 40  ;;  %vm4673_vm10 = vcmp.lt.s32.totalorder %v10199_v6, 42  ;;  %vm4993_vm11 = vcmp.lt.s32.totalorder %v10199_v6, 38  ;;  %vm5157_vm12 = vcmp.lt.s32.totalorder %v10199_v6, 2 }
  0x15   : > { %s10085_s28 = smov 126   ;;  %s10086_s29 = smov 90   ;;  %vm5472_vm13 = vcmp.lt.s32.totalorder %v10199_v6, 126  ;;  %vm5636_vm14 = vcmp.lt.s32.totalorder %v10199_v6, 90  ;;  %vm5800_vm15 = vcmp.lt.s32.totalorder %v10199_v6, 88 }
  0x16   : > { %s10087_s30 = smov 88   ;;  %s10088_s4 = smov 86  }
  0x17   : > { %199 = vrot.lane.b32.xlu1 %v10135_v3, %s10073_s18  ;;  %197 = vrot.lane.b32.xlu0 %v10137_v4, %s10073_s18 }
  0x1b   : > { %181 = vrot.lane.b32.xlu1 %v10137_v4, %s10074_s19  ;;  %179 = vrot.lane.b32.xlu0 %v10129_v2, %s10074_s19 }
  0x1f   : > { %183 = vrot.lane.b32.xlu1 %v10135_v3, %s10074_s19  ;;  %185 = vrot.lane.b32.xlu0 %v10127_v1, %s10074_s19 }
  0x23   : > { %503 = vrot.lane.b32.xlu1 %v10137_v4, %s10075_s20  ;;  %501 = vrot.lane.b32.xlu0 %v10129_v2, %s10075_s20 }
  0x27   : > { %505 = vrot.lane.b32.xlu1 %v10135_v3, %s10075_s20  ;;  %507 = vrot.lane.b32.xlu0 %v10127_v1, %s10075_s20 }
  0x2b   : > { %667 = vrot.lane.b32.xlu1 %v10137_v4, %s10076_s21  ;;  %665 = vrot.lane.b32.xlu0 %v10129_v2, %s10076_s21 }
  0x2f   : > { %669 = vrot.lane.b32.xlu1 %v10135_v3, %s10076_s21  ;;  %671 = vrot.lane.b32.xlu0 %v10127_v1, %s10076_s21 }
  0x33   : > { %982 = vrot.lane.b32.xlu0 %v10137_v4, %s10077_s22  ;;  %984 = vrot.lane.b32.xlu1 %v10135_v3, %s10077_s22 }
  0x37   : > { %980 = vrot.lane.b32.xlu0 %v10129_v2, %s10077_s22  ;;  %986 = vrot.lane.b32.xlu1 %v10127_v1, %s10077_s22 }
  0x3b   : > { %1146 = vrot.lane.b32.xlu0 %v10137_v4, %s10078_s23  ;;  %1148 = vrot.lane.b32.xlu1 %v10135_v3, %s10078_s23 }
  0x3f   : > { %1144 = vrot.lane.b32.xlu0 %v10129_v2, %s10078_s23  ;;  %1150 = vrot.lane.b32.xlu1 %v10127_v1, %s10078_s23 }
  0x43   : > { %1310 = vrot.lane.b32.xlu0 %v10137_v4, %s10079_s24  ;;  %1312 = vrot.lane.b32.xlu1 %v10135_v3, %s10079_s24 }
  0x47   : > { %1308 = vrot.lane.b32.xlu0 %v10129_v2, %s10079_s24  ;;  %1314 = vrot.lane.b32.xlu1 %v10127_v1, %s10079_s24 }
  0x4b   : > { %1474 = vrot.lane.b32.xlu0 %v10137_v4, %s10080_s25  ;;  %1476 = vrot.lane.b32.xlu1 %v10135_v3, %s10080_s25 }
  0x4f   : > { %1472 = vrot.lane.b32.xlu0 %v10129_v2, %s10080_s25  ;;  %1478 = vrot.lane.b32.xlu1 %v10127_v1, %s10080_s25 }
  0x85   : > { %v202_v7 = vpop.permute.xlu1 %201  ;;  %v196_v8 = vpop.permute.xlu0 %195 }
  0x86   : > { %v207_v15 = vsel %vm203_vm0, %v202_v7, %v196_v8 }
  0x89   : > { %v200_v9 = vpop.permute.xlu1 %199  ;;  %v198_v10 = vpop.permute.xlu0 %197 }
  0x8a   : > { %v206_v11 = vsel %vm203_vm0, %v196_v8, %v198_v10  ;;  %v204_v12 = vsel %vm203_vm0, %v200_v9, %v202_v7  ;;  %v205_v13 = vsel %vm203_vm0, %v198_v10, %v200_v9 }
  0x8b   : > { %214 = vmatprep.subr.mxu0 %v206_v11  ;;  %285 = vmatprep.subr.mxu1 %v204_v12 }
  0x8c   : > { %215 = vmatpush1.msra.mxu0 %v207_v15  ;;  %286 = vmatpush1.msra.mxu1 %v205_v13  ;;  %v9338_v13 = vld [vmem:[%s11558_s1 + $0x38] sm:$0xff] }
  0x8d   : > { %v182_v16 = vpop.permute.xlu1 %181  ;;  %9319 = vmatmul.mubr.msk.f32.vlgmr.msra.gmra.mrb[0].mxu0 %vm210_vm1, %v9318_v14  ;;  %9320 = vmatmul.mubr.msk.f32.vlgmr.msra.gmra.mrb[0].mxu1 %vm210_vm1, %v9318_v14  ;;  %v180_v17 = vpop.permute.xlu0 %179 }
  0x8e   : > { %v192_v18 = vsel %vm189_vm2, %v180_v17, %v182_v16  ;;  %423 = vmatprep.mubr.f32.mxu0 %v11561_v0  ;;  %494 = vmatprep.mubr.f32.mxu1 %v11561_v0 }
  0x8f   : > { %359 = vmatprep.subr.mxu0 %v192_v18  ;;  %v10343_v18 = vld [vmem:[%s11559_s2] sm:$0xff] }
  0x91   : > { %v184_v19 = vpop.permute.xlu1 %183  ;;  %v186_v20 = vpop.permute.xlu0 %185 }
  0x92   : > { %v193_v21 = vsel %vm189_vm2, %v186_v20, %v180_v17  ;;  %v190_v22 = vsel %vm189_vm2, %v184_v19, %v186_v20  ;;  %v191_v23 = vsel %vm189_vm2, %v182_v16, %v184_v19  ;;  %v9341_v17 = vld [vmem:[%s11558_s1 + $0x40] sm:$0xff]  ;;  %v10348_v19 = vld [vmem:[%s11559_s2 + $0x10] sm:$0xff]  ;;  %v10353_v20 = vld [vmem:[%s11559_s2 + $0x8] sm:$0xff] }
  0x93   : > { %360 = vmatpush1.msra.mxu0 %v193_v21  ;;  %430 = vmatprep.subr.mxu1 %v190_v22 }
  0x94   : > { %431 = vmatpush1.msra.mxu1 %v191_v23 }
  0x95   : > { %v504_v25 = vpop.permute.xlu1 %503  ;;  %9321 = vmatmul.mubr.msk.f32.vlgmr.msra.gmra.mrb[0].mxu0 %vm210_vm1, %v194_v24  ;;  %9322 = vmatmul.mubr.msk.f32.vlgmr.msra.gmra.mrb[0].mxu1 %vm210_vm1, %v194_v24  ;;  %v502_v26 = vpop.permute.xlu0 %501 }
  0x96   : > { %v512_v27 = vsel %vm509_vm3, %v502_v26, %v504_v25  ;;  %583 = vmatprep.mubr.f32.mxu0 %v11561_v0  ;;  %654 = vmatprep.mubr.f32.mxu1 %v11561_v0 }
  0x97   : > { %519 = vmatprep.subr.mxu0 %v512_v27 }
  0x99   : > { %v506_v28 = vpop.permute.xlu1 %505  ;;  %v508_v29 = vpop.permute.xlu0 %507 }
  0x9a   : > { %v513_v30 = vsel %vm509_vm3, %v508_v29, %v502_v26  ;;  %v510_v31 = vsel %vm509_vm3, %v506_v28, %v508_v29  ;;  %v511_v32 = vsel %vm509_vm3, %v504_v25, %v506_v28  ;;  %v10359_v25 = vld [vmem:[%s11559_s2 + $0x18] sm:$0xff] }
  0x9b   : > { %520 = vmatpush1.msra.mxu0 %v513_v30  ;;  %590 = vmatprep.subr.mxu1 %v510_v31 }
  0x9c   : > { %591 = vmatpush1.msra.mxu1 %v511_v32 }
  0x9d   : > { %v668_v34 = vpop.permute.xlu1 %667  ;;  %9324 = vmatmul.mubr.msk.f32.vlgmr.msra.gmra.mrb[0].mxu0 %vm210_vm1, %v9323_v33  ;;  %9325 = vmatmul.mubr.msk.f32.vlgmr.msra.gmra.mrb[0].mxu1 %vm210_vm1, %v9323_v33  ;;  %v666_v35 = vpop.permute.xlu0 %665 }
  0x9e   : > { %v676_v36 = vsel %vm673_vm4, %v666_v35, %v668_v34  ;;  %747 = vmatprep.mubr.f32.mxu0 %v11561_v0  ;;  %818 = vmatprep.mubr.f32.mxu1 %v11561_v0 }
  0x9f   : > { %683 = vmatprep.subr.mxu0 %v676_v36 }
  0xa1   : > { %v670_v37 = vpop.permute.xlu1 %669  ;;  %v672_v38 = vpop.permute.xlu0 %671 }
  0xa2   : > { %v677_v39 = vsel %vm673_vm4, %v672_v38, %v666_v35  ;;  %v674_v40 = vsel %vm673_vm4, %v670_v37, %v672_v38  ;;  %v675_v41 = vsel %vm673_vm4, %v668_v34, %v670_v37 }
  0xa3   : > { %684 = vmatpush1.msra.mxu0 %v677_v39  ;;  %754 = vmatprep.subr.mxu1 %v674_v40 }
  0xa4   : > { %755 = vmatpush1.msra.mxu1 %v675_v41  ;;  %834 = vmatprep.subr.mxu0 %v10137_v4 }
  0xa5   : > { %9327 = vmatmul.mubr.msk.f32.vlgmr.msra.gmra.mrb[0].mxu0 %vm210_vm1, %v9326_v42  ;;  %9328 = vmatmul.mubr.msk.f32.vlgmr.msra.gmra.mrb[0].mxu1 %vm210_vm1, %v9326_v42  ;;  %v983_v43 = vpop.permute.xlu0 %982  ;;  %v985_v44 = vpop.permute.xlu1 %984 }
  0xa6   : > { %905 = vmatprep.subr.mxu1 %v10127_v1  ;;  %835 = vmatpush1.msra.mxu0 %v10129_v2  ;;  %v990_v45 = vsel %vm988_vm5, %v983_v43, %v985_v44 }
  0xa7   : > { %898 = vmatprep.mubr.f32.mxu0 %v11561_v0  ;;  %906 = vmatpush1.msra.mxu1 %v10135_v3  ;;  %v9335_v3 = vld [vmem:[%s11558_s1 + $0x30] sm:$0xff] }
  0xa8   : > { %969 = vmatprep.mubr.f32.mxu1 %v11561_v0  ;;  %998 = vmatprep.subr.mxu0 %v990_v45 }
  0xa9   : > { %v981_v46 = vpop.permute.xlu0 %980  ;;  %v987_v47 = vpop.permute.xlu1 %986 }
  0xaa   : > { %v992_v49 = vsel %vm988_vm5, %v987_v47, %v981_v46  ;;  %v991_v50 = vsel %vm988_vm5, %v981_v46, %v983_v43  ;;  %v989_v51 = vsel %vm988_vm5, %v985_v44, %v987_v47 }
  0xab   : > { %1069 = vmatprep.subr.mxu1 %v992_v49 }
  0xad   : > { %9330 = vmatmul.mubr.msk.f32.vlgmr.msra.gmra.mrb[0].mxu0 %vm210_vm1, %v9329_v48  ;;  %9331 = vmatmul.mubr.msk.f32.vlgmr.msra.gmra.mrb[0].mxu1 %vm210_vm1, %v9329_v48  ;;  %v1147_v52 = vpop.permute.xlu0 %1146  ;;  %v1149_v53 = vpop.permute.xlu1 %1148 }
  0xae   : > { %999 = vmatpush1.msra.mxu0 %v991_v50  ;;  %1070 = vmatpush1.msra.mxu1 %v989_v51  ;;  %v1154_v54 = vsel %vm1152_vm6, %v1147_v52, %v1149_v53 }
  0xaf   : > { %1062 = vmatprep.mubr.f32.mxu0 %v11561_v0  ;;  %1133 = vmatprep.mubr.f32.mxu1 %v11561_v0 }
  0xb0   : > { %1162 = vmatprep.subr.mxu0 %v1154_v54 }
  0xb1   : > { %v1145_v55 = vpop.permute.xlu0 %1144  ;;  %v1151_v56 = vpop.permute.xlu1 %1150 }
  0xb2   : > { %v1156_v58 = vsel %vm1152_vm6, %v1151_v56, %v1145_v55  ;;  %v1155_v59 = vsel %vm1152_vm6, %v1145_v55, %v1147_v52  ;;  %v1153_v60 = vsel %vm1152_vm6, %v1149_v53, %v1151_v56 }
  0xb3   : > { %1233 = vmatprep.subr.mxu1 %v1156_v58 }
  0xb5   : > { %9333 = vmatmul.mubr.msk.f32.vlgmr.msra.gmra.mrb[0].mxu0 %vm210_vm1, %v9332_v57  ;;  %9334 = vmatmul.mubr.msk.f32.vlgmr.msra.gmra.mrb[0].mxu1 %vm210_vm1, %v9332_v57  ;;  %v1311_v61 = vpop.permute.xlu0 %1310  ;;  %v1313_v62 = vpop.permute.xlu1 %1312 }
  0xb6   : > { %1163 = vmatpush1.msra.mxu0 %v1155_v59  ;;  %1234 = vmatpush1.msra.mxu1 %v1153_v60  ;;  %v1318_v63 = vsel %vm1316_vm7, %v1311_v61, %v1313_v62 }
  0xb7   : > { %1226 = vmatprep.mubr.f32.mxu0 %v11561_v0  ;;  %1297 = vmatprep.mubr.f32.mxu1 %v11561_v0 }
  0xb8   : > { %1326 = vmatprep.subr.mxu0 %v1318_v63 }
  0xb9   : > { %v1309_v1 = vpop.permute.xlu0 %1308  ;;  %v1315_v2 = vpop.permute.xlu1 %1314 }
  0xba   : > { %v1320_v4 = vsel %vm1316_vm7, %v1315_v2, %v1309_v1  ;;  %v1319_v5 = vsel %vm1316_vm7, %v1309_v1, %v1311_v61  ;;  %v1317_v7 = vsel %vm1316_vm7, %v1313_v62, %v1315_v2 }
  0xbb   : > { %1397 = vmatprep.subr.mxu1 %v1320_v4 }
  0xbd   : > { %9336 = vmatmul.mubr.msk.f32.vlgmr.msra.gmra.mrb[0].mxu0 %vm210_vm1, %v9335_v3  ;;  %9337 = vmatmul.mubr.msk.f32.vlgmr.msra.gmra.mrb[0].mxu1 %vm210_vm1, %v9335_v3  ;;  %v1475_v8 = vpop.permute.xlu0 %1474  ;;  %v1477_v9 = vpop.permute.xlu1 %1476 }
  0xbe   : > { %1327 = vmatpush1.msra.mxu0 %v1319_v5  ;;  %1398 = vmatpush1.msra.mxu1 %v1317_v7  ;;  %v1482_v10 = vsel %vm1480_vm8, %v1475_v8, %v1477_v9 }
  0xbf   : > { %1390 = vmatprep.mubr.f32.mxu0 %v11561_v0  ;;  %1461 = vmatprep.mubr.f32.mxu1 %v11561_v0 }
  0xc0   : > { %1490 = vmatprep.subr.mxu0 %v1482_v10 }
  0xc1   : > { %v1473_v11 = vpop.permute.xlu0 %1472  ;;  %v1479_v12 = vpop.permute.xlu1 %1478 }
  0xc2   : > { %v1484_v14 = vsel %vm1480_vm8, %v1479_v12, %v1473_v11  ;;  %v1483_v15 = vsel %vm1480_vm8, %v1473_v11, %v1475_v8  ;;  %v1481_v16 = vsel %vm1480_vm8, %v1477_v9, %v1479_v12  ;;  %v9345_v12 = vld [vmem:[%s11558_s1 + $0x50] sm:$0xff] }
  0xc3   : > { %1561 = vmatprep.subr.mxu1 %v1484_v14 }
  0xc5   : > { %9339 = vmatmul.mubr.msk.f32.vlgmr.msra.gmra.mrb[0].mxu0 %vm210_vm1, %v9338_v13  ;;  %9340 = vmatmul.mubr.msk.f32.vlgmr.msra.gmra.mrb[0].mxu1 %vm210_vm1, %v9338_v13 }
  0xc6   : > { %1491 = vmatpush1.msra.mxu0 %v1483_v15  ;;  %1562 = vmatpush1.msra.mxu1 %v1481_v16 }
  0xc7   : > { %1554 = vmatprep.mubr.f32.mxu0 %v11561_v0  ;;  %1625 = vmatprep.mubr.f32.mxu1 %v11561_v0 }
  0xcd   : > { %9342 = vmatmul.mubr.msk.f32.vlgmr.msra.gmra.mrb[0].mxu0 %vm210_vm1, %v9341_v17  ;;  %9343 = vmatmul.mubr.msk.f32.vlgmr.msra.gmra.mrb[0].mxu1 %vm210_vm1, %v9341_v17 }
  0xce   : > { %1776 = vmatprep.mubr.f32.mxu0 %v11561_v0  ;;  %1847 = vmatprep.mubr.f32.mxu1 %v11561_v0 }
 0x1a0   : > { %v1556_v21 = vpop.f32.mrb[0].mxu0  ;;  %v1627_v22 = vpop.f32.mrb[0].mxu1 }
 0x1a1   : > { %v1636_v23 = vmul.f32 %v1556_v21, %v10343_v18  ;;  %v1558_v24 = vpop.f32.mrb[1].mxu0  ;;  %v1629_v26 = vpop.f32.mrb[1].mxu1  ;;  %v1638_v27 = vmul.f32 %v1627_v22, %v10348_v19 }
 0x1a2   : > { %v1637_v28 = vmul.f32 %v1558_v24, %v10353_v20  ;;  %v1639_v32 = vmul.f32 %v1629_v26, %v10359_v25  ;;  %v9344_v24 = vld [vmem:[%s11558_s1 + $0x48] sm:$0xff] }
 0x1a3   : > { %v1645_v29 = vmul.f32 %v1636_v23, %v1636_v23  ;;  %v1647_v33 = vmul.f32 %v1638_v27, %v1638_v27 }
 0x1a4   : > { %v1640_v30 = vadd.f32 %v1637_v28, %v1636_v23  ;;  %v1646_v31 = vmul.f32 %v1637_v28, %v1637_v28  ;;  %v1648_v37 = vmul.f32 %v1639_v32, %v1639_v32 }
 0x1a6   : > { %v1641_v34 = vadd.f32 %v1640_v30, %v1638_v27  ;;  %v1649_v35 = vadd.f32 %v1646_v31, %v1645_v29 }
 0x1a8   : > { %v1642_v36 = vadd.f32 %v1641_v34, %v1639_v32  ;;  %v1650_v38 = vadd.f32 %v1649_v35, %v1647_v33  ;;  %v9350_v34 = vld [vmem:[%s11558_s1 + $0x58] sm:$0xff] }
 0x1aa   : > { %1643 = vadd.xlane.f32.xlu0 %v1642_v36  ;;  %v1651_v39 = vadd.f32 %v1650_v38, %v1648_v37 }
 0x1ac   : > { %1652 = vadd.xlane.f32.xlu1 %v1651_v39 }
 0x237   : > { %v1644_v40 = vpop.xlane.xlu0 %1643 }
 0x238   : > { %v1654_v41 = vmul.f32 0.00390625, %v1644_v40 }
 0x239   : > { %v1653_v42 = vpop.xlane.xlu1 %1652 }
 0x23a   : > { %v1655_v43 = vmul.f32 0.00390625, %v1653_v42  ;;  %v1656_v44 = vmul.f32 %v1654_v41, %v1654_v41  ;;  %v1659_v48 = vsub.f32 %v1636_v23, %v1654_v41  ;;  %v1660_v49 = vsub.f32 %v1637_v28, %v1654_v41 }
 0x23b   : > { %v1661_v50 = vsub.f32 %v1638_v27, %v1654_v41  ;;  %v1662_v51 = vsub.f32 %v1639_v32, %v1654_v41 }
 0x23c   : > { %v1657_v45 = vsub.f32 %v1655_v43, %v1656_v44  ;;  %v9353_v43 = vld [vmem:[%s11558_s1 + $0x60] sm:$0xff] }
 0x23e   : > { %v1658_v46 = vmax.f32 %v1657_v45, 0.0 }
 0x240   : > { %v1663_v47 = vadd.f32 1e-05, %v1658_v46 }
 0x242   : > { %10044 = vrsqrt.f32 %v1663_v47 }
 0x24c   : > { %v10045_v52 = vpop.eup %10044 }
 0x24d   : > { %v1665_v53 = vmul.f32 %v10045_v52, %v1659_v48  ;;  %v1666_v54 = vmul.f32 %v10045_v52, %v1660_v49  ;;  %v1667_v55 = vmul.f32 %v10045_v52, %v1661_v50  ;;  %v1668_v56 = vmul.f32 %v10045_v52, %v1662_v51  ;;  %v9356_v52 = vld [vmem:[%s11558_s1 + $0x68] sm:$0xff] }
 0x24f   : > { %v1669_v57 = vmul.f32 0.2, %v1665_v53  ;;  %v1670_v58 = vmul.f32 0.2, %v1666_v54  ;;  %v1671_v59 = vmul.f32 0.2, %v1667_v55 }
 0x250   : > { %v1672_v60 = vmul.f32 0.2, %v1668_v56 }
 0x251   : > { %v1673_v61 = vmax.f32 %v1665_v53, %v1669_v57  ;;  %v1674_v62 = vmax.f32 %v1666_v54, %v1670_v58  ;;  %v1675_v63 = vmax.f32 %v1667_v55, %v1671_v59 }
 0x252   : > { %v1676_v1 = vmax.f32 %v1668_v56, %v1672_v60 }
 0x253   : > { %v10365_v2 = vmul.f32 %v1674_v62, %v10353_v20  ;;  %v10368_v3 = vmul.f32 %v1673_v61, %v10343_v18  ;;  %v10375_v4 = vmul.f32 %v1675_v63, %v10348_v19  ;;  %v9359_v61 = vld [vmem:[%s11558_s1 + $0x70] sm:$0xff] }
 0x254   : > { %v10378_v5 = vmul.f32 %v1676_v1, %v10359_v25 }
 0x255   : > { %11575 = vst [vmem:[#allocation2_spill] sm:$0xff] %v10365_v2  ;;  %11576 = vst [vmem:[#allocation3_spill] sm:$0xff] %v10368_v3  ;;  %1697 = vrot.lane.b32.xlu1 %v10365_v2, %s10073_s18  ;;  %1695 = vrot.lane.b32.xlu0 %v10368_v3, %s10073_s18 }
 0x256   : > { %11577 = vst [vmem:[#allocation4_spill] sm:$0xff] %v10375_v4  ;;  %11578 = vst [vmem:[#allocation5_spill] sm:$0xff] %v10378_v5 }
 0x259   : > { %1699 = vrot.lane.b32.xlu1 %v10375_v4, %s10073_s18  ;;  %1701 = vrot.lane.b32.xlu0 %v10378_v5, %s10073_s18 }
 0x25d   : > { %1683 = vrot.lane.b32.xlu1 %v10365_v2, %s10074_s19  ;;  %1681 = vrot.lane.b32.xlu0 %v10368_v3, %s10074_s19 }
 0x261   : > { %1685 = vrot.lane.b32.xlu1 %v10375_v4, %s10074_s19  ;;  %1687 = vrot.lane.b32.xlu0 %v10378_v5, %s10074_s19 }
 0x265   : > { %2001 = vrot.lane.b32.xlu1 %v10365_v2, %s10075_s20  ;;  %1999 = vrot.lane.b32.xlu0 %v10368_v3, %s10075_s20 }
 0x269   : > { %2003 = vrot.lane.b32.xlu1 %v10375_v4, %s10075_s20  ;;  %2005 = vrot.lane.b32.xlu0 %v10378_v5, %s10075_s20 }
 0x26d   : > { %2164 = vrot.lane.b32.xlu1 %v10365_v2, %s10076_s21  ;;  %2162 = vrot.lane.b32.xlu0 %v10368_v3, %s10076_s21 }
 0x271   : > { %2166 = vrot.lane.b32.xlu1 %v10375_v4, %s10076_s21  ;;  %2168 = vrot.lane.b32.xlu0 %v10378_v5, %s10076_s21 }
 0x275   : > { %2480 = vrot.lane.b32.xlu1 %v10375_v4, %s10077_s22  ;;  %2478 = vrot.lane.b32.xlu0 %v10365_v2, %s10077_s22 }
 0x279   : > { %2482 = vrot.lane.b32.xlu1 %v10378_v5, %s10077_s22  ;;  %2476 = vrot.lane.b32.xlu0 %v10368_v3, %s10077_s22 }
 0x27d   : > { %2643 = vrot.lane.b32.xlu1 %v10375_v4, %s10078_s23  ;;  %2641 = vrot.lane.b32.xlu0 %v10365_v2, %s10078_s23 }
 0x281   : > { %2645 = vrot.lane.b32.xlu1 %v10378_v5, %s10078_s23  ;;  %2639 = vrot.lane.b32.xlu0 %v10368_v3, %s10078_s23 }
 0x285   : > { %2806 = vrot.lane.b32.xlu1 %v10375_v4, %s10079_s24  ;;  %2804 = vrot.lane.b32.xlu0 %v10365_v2, %s10079_s24 }
 0x289   : > { %2808 = vrot.lane.b32.xlu1 %v10378_v5, %s10079_s24  ;;  %2802 = vrot.lane.b32.xlu0 %v10368_v3, %s10079_s24 }
 0x28d   : > { %2969 = vrot.lane.b32.xlu1 %v10375_v4, %s10080_s25  ;;  %2967 = vrot.lane.b32.xlu0 %v10365_v2, %s10080_s25 }
 0x291   : > { %2971 = vrot.lane.b32.xlu1 %v10378_v5, %s10080_s25  ;;  %2965 = vrot.lane.b32.xlu0 %v10368_v3, %s10080_s25 }
 0x2c7   : > { %v1698_v7 = vpop.permute.xlu1 %1697  ;;  %v1696_v8 = vpop.permute.xlu0 %1695 }
 0x2c8   : > { %v1705_v9 = vsel %vm203_vm0, %v1696_v8, %v1698_v7 }
 0x2c9   : > { %1712 = vmatprep.subr.mxu0 %v1705_v9 }
 0x2cb   : > { %v1700_v10 = vpop.permute.xlu1 %1699  ;;  %v1702_v11 = vpop.permute.xlu0 %1701 }
 0x2cc   : > { %v1706_v13 = vsel %vm203_vm0, %v1702_v11, %v1696_v8  ;;  %v1703_v14 = vsel %vm203_vm0, %v1700_v10, %v1702_v11  ;;  %v1704_v15 = vsel %vm203_vm0, %v1698_v7, %v1700_v10 }
 0x2cd   : > { %1713 = vmatpush1.msra.mxu0 %v1706_v13  ;;  %1783 = vmatprep.subr.mxu1 %v1703_v14 }
 0x2ce   : > { %9346 = vmatmul.mubr.msk.f32.vlgmr.msra.gmra.mrb[2].mxu0 %vm210_vm1, %v9345_v12  ;;  %1784 = vmatpush1.msra.mxu1 %v1704_v15 }
 0x2cf   : > { %v1684_v16 = vpop.permute.xlu1 %1683  ;;  %9347 = vmatmul.mubr.msk.f32.vlgmr.msra.gmra.mrb[2].mxu1 %vm210_vm1, %v9345_v12  ;;  %v1682_v17 = vpop.permute.xlu0 %1681  ;;  %1921 = vmatprep.mubr.f32.mxu0 %v11561_v0  ;;  %v9362_v12 = vld [vmem:[%s11558_s1 + $0x78] sm:$0xff] }
 0x2d0   : > { %v1691_v21 = vsel %vm189_vm2, %v1682_v17, %v1684_v16  ;;  %1992 = vmatprep.mubr.f32.mxu1 %v11561_v0 }
 0x2d1   : > { %1857 = vmatprep.subr.mxu0 %v1691_v21 }
 0x2d3   : > { %v1686_v22 = vpop.permute.xlu1 %1685  ;;  %v1688_v23 = vpop.permute.xlu0 %1687 }
 0x2d4   : > { %v1692_v26 = vsel %vm189_vm2, %v1688_v23, %v1682_v17  ;;  %v1689_v27 = vsel %vm189_vm2, %v1686_v22, %v1688_v23  ;;  %v1690_v28 = vsel %vm189_vm2, %v1684_v16, %v1686_v22 }
 0x2d5   : > { %1858 = vmatpush1.msra.mxu0 %v1692_v26  ;;  %1928 = vmatprep.subr.mxu1 %v1689_v27 }
 0x2d6   : > { %9348 = vmatmul.mubr.msk.f32.vlgmr.msra.gmra.mrb[2].mxu0 %vm210_vm1, %v9344_v24  ;;  %1929 = vmatpush1.msra.mxu1 %v1690_v28 }
 0x2d7   : > { %v2002_v29 = vpop.permute.xlu1 %2001  ;;  %9349 = vmatmul.mubr.msk.f32.vlgmr.msra.gmra.mrb[2].mxu1 %vm210_vm1, %v9344_v24  ;;  %v2000_v30 = vpop.permute.xlu0 %1999  ;;  %2080 = vmatprep.mubr.f32.mxu0 %v11561_v0  ;;  %v9365_v24 = vld [vmem:[%s11558_s1 + $0x80] sm:$0xff] }
 0x2d8   : > { %v2009_v31 = vsel %vm509_vm3, %v2000_v30, %v2002_v29  ;;  %2151 = vmatprep.mubr.f32.mxu1 %v11561_v0 }
 0x2d9   : > { %2016 = vmatprep.subr.mxu0 %v2009_v31 }
 0x2db   : > { %v2004_v32 = vpop.permute.xlu1 %2003  ;;  %v2006_v33 = vpop.permute.xlu0 %2005 }
 0x2dc   : > { %v2010_v35 = vsel %vm509_vm3, %v2006_v33, %v2000_v30  ;;  %v2007_v36 = vsel %vm509_vm3, %v2004_v32, %v2006_v33  ;;  %v2008_v37 = vsel %vm509_vm3, %v2002_v29, %v2004_v32  ;;  %v9368_v29 = vld [vmem:[%s11558_s1 + $0x88] sm:$0xff] }
 0x2dd   : > { %2017 = vmatpush1.msra.mxu0 %v2010_v35  ;;  %2087 = vmatprep.subr.mxu1 %v2007_v36 }
 0x2de   : > { %9351 = vmatmul.mubr.msk.f32.vlgmr.msra.gmra.mrb[2].mxu0 %vm210_vm1, %v9350_v34  ;;  %2088 = vmatpush1.msra.mxu1 %v2008_v37 }
 0x2df   : > { %v2165_v38 = vpop.permute.xlu1 %2164  ;;  %9352 = vmatmul.mubr.msk.f32.vlgmr.msra.gmra.mrb[2].mxu1 %vm210_vm1, %v9350_v34  ;;  %v2163_v39 = vpop.permute.xlu0 %2162  ;;  %2243 = vmatprep.mubr.f32.mxu0 %v11561_v0 }
 0x2e0   : > { %v2172_v40 = vsel %vm673_vm4, %v2163_v39, %v2165_v38  ;;  %2314 = vmatprep.mubr.f32.mxu1 %v11561_v0 }
 0x2e1   : > { %2179 = vmatprep.subr.mxu0 %v2172_v40 }
 0x2e3   : > { %v2167_v41 = vpop.permute.xlu1 %2166  ;;  %v2169_v42 = vpop.permute.xlu0 %2168 }
 0x2e4   : > { %v2173_v44 = vsel %vm673_vm4, %v2169_v42, %v2163_v39  ;;  %v2170_v45 = vsel %vm673_vm4, %v2167_v41, %v2169_v42  ;;  %v2171_v46 = vsel %vm673_vm4, %v2165_v38, %v2167_v41 }
 0x2e5   : > { %2180 = vmatpush1.msra.mxu0 %v2173_v44  ;;  %2250 = vmatprep.subr.mxu1 %v2170_v45 }
 0x2e6   : > { %9354 = vmatmul.mubr.msk.f32.vlgmr.msra.gmra.mrb[2].mxu0 %vm210_vm1, %v9353_v43  ;;  %2251 = vmatpush1.msra.mxu1 %v2171_v46 }
 0x2e7   : > { %2330 = vmatprep.subr.mxu0 %v10365_v2  ;;  %v2481_v47 = vpop.permute.xlu1 %2480  ;;  %9355 = vmatmul.mubr.msk.f32.vlgmr.msra.gmra.mrb[2].mxu1 %vm210_vm1, %v9353_v43  ;;  %v2479_v48 = vpop.permute.xlu0 %2478 }
 0x2e8   : > { %2331 = vmatpush1.msra.mxu0 %v10368_v3  ;;  %2401 = vmatprep.subr.mxu1 %v10378_v5  ;;  %v2485_v49 = vsel %vm988_vm5, %v2479_v48, %v2481_v47 }
 0x2e9   : > { %2402 = vmatpush1.msra.mxu1 %v10375_v4  ;;  %2493 = vmatprep.subr.mxu0 %v2485_v49 }
 0x2ea   : > { %2394 = vmatprep.mubr.f32.mxu0 %v11561_v0  ;;  %2465 = vmatprep.mubr.f32.mxu1 %v11561_v0 }
 0x2eb   : > { %v2483_v50 = vpop.permute.xlu1 %2482  ;;  %v2477_v51 = vpop.permute.xlu0 %2476 }
 0x2ec   : > { %v2487_v53 = vsel %vm988_vm5, %v2483_v50, %v2477_v51  ;;  %v2486_v54 = vsel %vm988_vm5, %v2477_v51, %v2479_v48  ;;  %v2484_v56 = vsel %vm988_vm5, %v2481_v47, %v2483_v50 }
 0x2ed   : > { %2564 = vmatprep.subr.mxu1 %v2487_v53 }
 0x2ee   : > { %9357 = vmatmul.mubr.msk.f32.vlgmr.msra.gmra.mrb[2].mxu0 %vm210_vm1, %v9356_v52 }
 0x2ef   : > { %2494 = vmatpush1.msra.mxu0 %v2486_v54  ;;  %v2644_v55 = vpop.permute.xlu1 %2643  ;;  %9358 = vmatmul.mubr.msk.f32.vlgmr.msra.gmra.mrb[2].mxu1 %vm210_vm1, %v9356_v52  ;;  %v2642_v57 = vpop.permute.xlu0 %2641 }
 0x2f0   : > { %2565 = vmatpush1.msra.mxu1 %v2484_v56  ;;  %v2648_v58 = vsel %vm1152_vm6, %v2642_v57, %v2644_v55  ;;  %2557 = vmatprep.mubr.f32.mxu0 %v11561_v0 }
 0x2f1   : > { %2656 = vmatprep.subr.mxu0 %v2648_v58  ;;  %2628 = vmatprep.mubr.f32.mxu1 %v11561_v0 }
 0x2f3   : > { %v2646_v59 = vpop.permute.xlu1 %2645  ;;  %v2640_v60 = vpop.permute.xlu0 %2639 }
 0x2f4   : > { %v2650_v62 = vsel %vm1152_vm6, %v2646_v59, %v2640_v60  ;;  %v2649_v63 = vsel %vm1152_vm6, %v2640_v60, %v2642_v57  ;;  %v2647_v7 = vsel %vm1152_vm6, %v2644_v55, %v2646_v59 }
 0x2f5   : > { %2727 = vmatprep.subr.mxu1 %v2650_v62 }
 0x2f6   : > { %9360 = vmatmul.mubr.msk.f32.vlgmr.msra.gmra.mrb[2].mxu0 %vm210_vm1, %v9359_v61 }
 0x2f7   : > { %2657 = vmatpush1.msra.mxu0 %v2649_v63  ;;  %v2807_v1 = vpop.permute.xlu1 %2806  ;;  %9361 = vmatmul.mubr.msk.f32.vlgmr.msra.gmra.mrb[2].mxu1 %vm210_vm1, %v9359_v61  ;;  %v2805_v8 = vpop.permute.xlu0 %2804 }
 0x2f8   : > { %2728 = vmatpush1.msra.mxu1 %v2647_v7  ;;  %v2811_v9 = vsel %vm1316_vm7, %v2805_v8, %v2807_v1  ;;  %2720 = vmatprep.mubr.f32.mxu0 %v11561_v0 }
 0x2f9   : > { %2819 = vmatprep.subr.mxu0 %v2811_v9  ;;  %2791 = vmatprep.mubr.f32.mxu1 %v11561_v0 }
 0x2fb   : > { %v2809_v10 = vpop.permute.xlu1 %2808  ;;  %v2803_v11 = vpop.permute.xlu0 %2802 }
 0x2fc   : > { %v2813_v13 = vsel %vm1316_vm7, %v2809_v10, %v2803_v11  ;;  %v2812_v14 = vsel %vm1316_vm7, %v2803_v11, %v2805_v8  ;;  %v2810_v16 = vsel %vm1316_vm7, %v2807_v1, %v2809_v10 }
 0x2fd   : > { %2890 = vmatprep.subr.mxu1 %v2813_v13 }
 0x2fe   : > { %9363 = vmatmul.mubr.msk.f32.vlgmr.msra.gmra.mrb[2].mxu0 %vm210_vm1, %v9362_v12 }
 0x2ff   : > { %2820 = vmatpush1.msra.mxu0 %v2812_v14  ;;  %v2970_v15 = vpop.permute.xlu1 %2969  ;;  %9364 = vmatmul.mubr.msk.f32.vlgmr.msra.gmra.mrb[2].mxu1 %vm210_vm1, %v9362_v12  ;;  %v2968_v17 = vpop.permute.xlu0 %2967 }
 0x300   : > { %2891 = vmatpush1.msra.mxu1 %v2810_v16  ;;  %v2974_v21 = vsel %vm1480_vm8, %v2968_v17, %v2970_v15  ;;  %2883 = vmatprep.mubr.f32.mxu0 %v11561_v0 }
 0x301   : > { %2982 = vmatprep.subr.mxu0 %v2974_v21  ;;  %2954 = vmatprep.mubr.f32.mxu1 %v11561_v0 }
 0x303   : > { %v2972_v22 = vpop.permute.xlu1 %2971  ;;  %v2966_v23 = vpop.permute.xlu0 %2965 }
 0x304   : > { %v2976_v26 = vsel %vm1480_vm8, %v2972_v22, %v2966_v23  ;;  %v2975_v27 = vsel %vm1480_vm8, %v2966_v23, %v2968_v17  ;;  %v2973_v28 = vsel %vm1480_vm8, %v2970_v15, %v2972_v22 }
 0x305   : > { %3053 = vmatprep.subr.mxu1 %v2976_v26 }
 0x306   : > { %9366 = vmatmul.mubr.msk.f32.vlgmr.msra.gmra.mrb[2].mxu0 %vm210_vm1, %v9365_v24 }
 0x307   : > { %2983 = vmatpush1.msra.mxu0 %v2975_v27  ;;  %9367 = vmatmul.mubr.msk.f32.vlgmr.msra.gmra.mrb[2].mxu1 %vm210_vm1, %v9365_v24 }
 0x308   : > { %3054 = vmatpush1.msra.mxu1 %v2973_v28  ;;  %3046 = vmatprep.mubr.f32.mxu0 %v11561_v0  ;;  %v9372_v28 = vld [vmem:[%s11558_s1 + $0x98] sm:$0xff] }
 0x309   : > { %3117 = vmatprep.mubr.f32.mxu1 %v11561_v0 }
 0x30e   : > { %9369 = vmatmul.mubr.msk.f32.vlgmr.msra.gmra.mrb[2].mxu0 %vm210_vm1, %v9368_v29 }
 0x30f   : > { %9370 = vmatmul.mubr.msk.f32.vlgmr.msra.gmra.mrb[2].mxu1 %vm210_vm1, %v9368_v29  ;;  %3268 = vmatprep.mubr.f32.mxu0 %v11561_v0 }
 0x310   : > { %3339 = vmatprep.mubr.f32.mxu1 %v11561_v0 }
 0x3e1   : > { %v3048_v30 = vpop.f32.mrb[2].mxu0 }
 0x3e2   : > { %v3128_v31 = vmul.f32 %v3048_v30, %v10343_v18  ;;  %v3050_v32 = vpop.f32.mrb[3].mxu0  ;;  %v3119_v33 = vpop.f32.mrb[2].mxu1 }
 0x3e3   : > { %v3129_v34 = vmul.f32 %v3050_v32, %v10353_v20  ;;  %v3130_v35 = vmul.f32 %v3119_v33, %v10348_v19  ;;  %v3121_v36 = vpop.f32.mrb[3].mxu1 }
 0x3e4   : > { %v3137_v37 = vmul.f32 %v3128_v31, %v3128_v31  ;;  %v3131_v40 = vmul.f32 %v3121_v36, %v10359_v25 }
 0x3e5   : > { %v3132_v38 = vadd.f32 %v3129_v34, %v3128_v31  ;;  %v3138_v39 = vmul.f32 %v3129_v34, %v3129_v34  ;;  %v3139_v41 = vmul.f32 %v3130_v35, %v3130_v35 }
 0x3e6   : > { %v3140_v45 = vmul.f32 %v3131_v40, %v3131_v40 }
 0x3e7   : > { %v3133_v42 = vadd.f32 %v3132_v38, %v3130_v35  ;;  %v3141_v43 = vadd.f32 %v3138_v39, %v3137_v37  ;;  %v9371_v37 = vld [vmem:[%s11558_s1 + $0x90] sm:$0xff] }
 0x3e9   : > { %v3134_v44 = vadd.f32 %v3133_v42, %v3131_v40  ;;  %v3142_v46 = vadd.f32 %v3141_v43, %v3139_v41 }
 0x3eb   : > { %3135 = vadd.xlane.f32.xlu0 %v3134_v44  ;;  %v3143_v47 = vadd.f32 %v3142_v46, %v3140_v45  ;;  %v9377_v46 = vld [vmem:[%s11558_s1 + $0xa0] sm:$0xff] }
 0x3ed   : > { %3144 = vadd.xlane.f32.xlu1 %v3143_v47 }
 0x478   : > { %v3136_v48 = vpop.xlane.xlu0 %3135 }
 0x479   : > { %v3146_v49 = vmul.f32 0.00390625, %v3136_v48 }
 0x47a   : > { %v3145_v50 = vpop.xlane.xlu1 %3144 }
 0x47b   : > { %v3147_v51 = vmul.f32 0.00390625, %v3145_v50  ;;  %v3148_v52 = vmul.f32 %v3146_v49, %v3146_v49  ;;  %v3151_v56 = vsub.f32 %v3128_v31, %v3146_v49  ;;  %v3152_v57 = vsub.f32 %v3129_v34, %v3146_v49 }
 0x47c   : > { %v3153_v58 = vsub.f32 %v3130_v35, %v3146_v49  ;;  %v3154_v59 = vsub.f32 %v3131_v40, %v3146_v49 }
 0x47d   : > { %v3149_v53 = vsub.f32 %v3147_v51, %v3148_v52 }
 0x47f   : > { %v3150_v54 = vmax.f32 %v3149_v53, 0.0 }
 0x481   : > { %v3155_v55 = vadd.f32 1e-05, %v3150_v54 }
 0x483   : > { %10046 = vrsqrt.f32 %v3155_v55  ;;  %v9380_v55 = vld [vmem:[%s11558_s1 + $0xa8] sm:$0xff] }
 0x48d   : > { %v10047_v60 = vpop.eup %10046 }
 0x48e   : > { %v3157_v61 = vmul.f32 %v10047_v60, %v3151_v56  ;;  %v3158_v62 = vmul.f32 %v10047_v60, %v3152_v57  ;;  %v3159_v63 = vmul.f32 %v10047_v60, %v3153_v58  ;;  %v3160_v1 = vmul.f32 %v10047_v60, %v3154_v59 }
 0x490   : > { %v3161_v7 = vmul.f32 0.2, %v3157_v61  ;;  %v3162_v8 = vmul.f32 0.2, %v3158_v62  ;;  %v3163_v9 = vmul.f32 0.2, %v3159_v63 }
 0x491   : > { %v3164_v10 = vmul.f32 0.2, %v3160_v1 }
 0x492   : > { %v3165_v11 = vmax.f32 %v3157_v61, %v3161_v7  ;;  %v3166_v12 = vmax.f32 %v3158_v62, %v3162_v8  ;;  %v3167_v13 = vmax.f32 %v3159_v63, %v3163_v9 }
 0x493   : > { %v3168_v14 = vmax.f32 %v3160_v1, %v3164_v10  ;;  %v9383_v1 = vld [vmem:[%s11558_s1 + $0xb0] sm:$0xff] }
 0x494   : > { %v10576_v15 = vmul.f32 %v3166_v12, %v10353_v20  ;;  %v10579_v16 = vmul.f32 %v3165_v11, %v10343_v18  ;;  %v10586_v17 = vmul.f32 %v3167_v13, %v10348_v19 }
 0x495   : > { %v10589_v21 = vmul.f32 %v3168_v14, %v10359_v25 }
 0x496   : > { %3189 = vrot.lane.b32.xlu1 %v10576_v15, %s10073_s18  ;;  %3187 = vrot.lane.b32.xlu0 %v10579_v16, %s10073_s18 }
 0x49a   : > { %3191 = vrot.lane.b32.xlu1 %v10586_v17, %s10073_s18  ;;  %3193 = vrot.lane.b32.xlu0 %v10589_v21, %s10073_s18 }
 0x49e   : > { %3175 = vrot.lane.b32.xlu1 %v10576_v15, %s10074_s19  ;;  %3173 = vrot.lane.b32.xlu0 %v10579_v16, %s10074_s19 }
 0x4a2   : > { %3177 = vrot.lane.b32.xlu1 %v10586_v17, %s10074_s19  ;;  %3179 = vrot.lane.b32.xlu0 %v10589_v21, %s10074_s19 }
 0x4a6   : > { %3493 = vrot.lane.b32.xlu1 %v10576_v15, %s10075_s20  ;;  %3491 = vrot.lane.b32.xlu0 %v10579_v16, %s10075_s20 }
 0x4aa   : > { %3495 = vrot.lane.b32.xlu1 %v10586_v17, %s10075_s20  ;;  %3497 = vrot.lane.b32.xlu0 %v10589_v21, %s10075_s20 }
 0x4ae   : > { %3656 = vrot.lane.b32.xlu1 %v10576_v15, %s10076_s21  ;;  %3654 = vrot.lane.b32.xlu0 %v10579_v16, %s10076_s21 }
 0x4b2   : > { %3658 = vrot.lane.b32.xlu1 %v10586_v17, %s10076_s21  ;;  %3660 = vrot.lane.b32.xlu0 %v10589_v21, %s10076_s21 }
 0x4b6   : > { %3972 = vrot.lane.b32.xlu1 %v10586_v17, %s10077_s22  ;;  %3970 = vrot.lane.b32.xlu0 %v10576_v15, %s10077_s22 }
 0x4ba   : > { %3974 = vrot.lane.b32.xlu1 %v10589_v21, %s10077_s22  ;;  %3968 = vrot.lane.b32.xlu0 %v10579_v16, %s10077_s22 }
 0x4be   : > { %4135 = vrot.lane.b32.xlu1 %v10586_v17, %s10078_s23  ;;  %4133 = vrot.lane.b32.xlu0 %v10576_v15, %s10078_s23 }
 0x4c2   : > { %4137 = vrot.lane.b32.xlu1 %v10589_v21, %s10078_s23  ;;  %4131 = vrot.lane.b32.xlu0 %v10579_v16, %s10078_s23 }
 0x4c6   : > { %4298 = vrot.lane.b32.xlu1 %v10586_v17, %s10079_s24  ;;  %4296 = vrot.lane.b32.xlu0 %v10576_v15, %s10079_s24 }
 0x4ca   : > { %4300 = vrot.lane.b32.xlu1 %v10589_v21, %s10079_s24  ;;  %4294 = vrot.lane.b32.xlu0 %v10579_v16, %s10079_s24 }
 0x4ce   : > { %4461 = vrot.lane.b32.xlu1 %v10586_v17, %s10080_s25  ;;  %4459 = vrot.lane.b32.xlu0 %v10576_v15, %s10080_s25 }
 0x4d2   : > { %4463 = vrot.lane.b32.xlu1 %v10589_v21, %s10080_s25  ;;  %4457 = vrot.lane.b32.xlu0 %v10579_v16, %s10080_s25 }
 0x508   : > { %v3190_v22 = vpop.permute.xlu1 %3189  ;;  %v3188_v23 = vpop.permute.xlu0 %3187 }
 0x509   : > { %v10653_v24 = vsel %vm203_vm0, %v3188_v23, %v3190_v22 }
 0x50a   : > { %3204 = vmatprep.subr.mxu0 %v10653_v24 }
 0x50c   : > { %v3192_v26 = vpop.permute.xlu1 %3191  ;;  %v3194_v27 = vpop.permute.xlu0 %3193 }
 0x50d   : > { %v10661_v29 = vsel %vm203_vm0, %v3194_v27, %v3188_v23  ;;  %v10665_v30 = vsel %vm203_vm0, %v3192_v26, %v3194_v27  ;;  %v10669_v31 = vsel %vm203_vm0, %v3190_v22, %v3192_v26  ;;  %v9386_v22 = vld [vmem:[%s11558_s1 + $0xb8] sm:$0xff] }
 0x50e   : > { %3205 = vmatpush1.msra.mxu0 %v10661_v29  ;;  %3275 = vmatprep.subr.mxu1 %v10665_v30 }
 0x50f   : > { %9373 = vmatmul.mubr.msk.f32.vlgmr.msra.gmra.mrb[4].mxu0 %vm210_vm1, %v9372_v28  ;;  %3276 = vmatpush1.msra.mxu1 %v10669_v31 }
 0x510   : > { %v3176_v32 = vpop.permute.xlu1 %3175  ;;  %9374 = vmatmul.mubr.msk.f32.vlgmr.msra.gmra.mrb[4].mxu1 %vm210_vm1, %v9372_v28  ;;  %v3174_v33 = vpop.permute.xlu0 %3173  ;;  %3413 = vmatprep.mubr.f32.mxu0 %v11561_v0 }
 0x511   : > { %v10679_v34 = vsel %vm189_vm2, %v3174_v33, %v3176_v32  ;;  %3484 = vmatprep.mubr.f32.mxu1 %v11561_v0 }
 0x512   : > { %3349 = vmatprep.subr.mxu0 %v10679_v34 }
 0x514   : > { %v3178_v35 = vpop.permute.xlu1 %3177  ;;  %v3180_v36 = vpop.permute.xlu0 %3179 }
 0x515   : > { %v10688_v38 = vsel %vm189_vm2, %v3180_v36, %v3174_v33  ;;  %v10692_v39 = vsel %vm189_vm2, %v3178_v35, %v3180_v36  ;;  %v10696_v40 = vsel %vm189_vm2, %v3176_v32, %v3178_v35 }
 0x516   : > { %3350 = vmatpush1.msra.mxu0 %v10688_v38  ;;  %3420 = vmatprep.subr.mxu1 %v10692_v39 }
 0x517   : > { %9375 = vmatmul.mubr.msk.f32.vlgmr.msra.gmra.mrb[4].mxu0 %vm210_vm1, %v9371_v37  ;;  %3421 = vmatpush1.msra.mxu1 %v10696_v40 }
 0x518   : > { %v3494_v41 = vpop.permute.xlu1 %3493  ;;  %9376 = vmatmul.mubr.msk.f32.vlgmr.msra.gmra.mrb[4].mxu1 %vm210_vm1, %v9371_v37  ;;  %v3492_v42 = vpop.permute.xlu0 %3491  ;;  %3572 = vmatprep.mubr.f32.mxu0 %v11561_v0  ;;  %v9389_v37 = vld [vmem:[%s11558_s1 + $0xc0] sm:$0xff] }
 0x519   : > { %v10706_v43 = vsel %vm509_vm3, %v3492_v42, %v3494_v41  ;;  %3643 = vmatprep.mubr.f32.mxu1 %v11561_v0 }
 0x51a   : > { %3508 = vmatprep.subr.mxu0 %v10706_v43 }
 0x51c   : > { %v3496_v44 = vpop.permute.xlu1 %3495  ;;  %v3498_v45 = vpop.permute.xlu0 %3497 }
 0x51d   : > { %v10715_v47 = vsel %vm509_vm3, %v3498_v45, %v3492_v42  ;;  %v10719_v48 = vsel %vm509_vm3, %v3496_v44, %v3498_v45  ;;  %v10723_v49 = vsel %vm509_vm3, %v3494_v41, %v3496_v44 }
 0x51e   : > { %3509 = vmatpush1.msra.mxu0 %v10715_v47  ;;  %3579 = vmatprep.subr.mxu1 %v10719_v48 }
 0x51f   : > { %9378 = vmatmul.mubr.msk.f32.vlgmr.msra.gmra.mrb[4].mxu0 %vm210_vm1, %v9377_v46  ;;  %3580 = vmatpush1.msra.mxu1 %v10723_v49 }
 0x520   : > { %v3657_v50 = vpop.permute.xlu1 %3656  ;;  %9379 = vmatmul.mubr.msk.f32.vlgmr.msra.gmra.mrb[4].mxu1 %vm210_vm1, %v9377_v46  ;;  %v3655_v51 = vpop.permute.xlu0 %3654  ;;  %3735 = vmatprep.mubr.f32.mxu0 %v11561_v0 }
 0x521   : > { %v10733_v52 = vsel %vm673_vm4, %v3655_v51, %v3657_v50  ;;  %3806 = vmatprep.mubr.f32.mxu1 %v11561_v0 }
 0x522   : > { %3671 = vmatprep.subr.mxu0 %v10733_v52 }
 0x524   : > { %v3659_v53 = vpop.permute.xlu1 %3658  ;;  %v3661_v54 = vpop.permute.xlu0 %3660 }
 0x525   : > { %v10742_v56 = vsel %vm673_vm4, %v3661_v54, %v3655_v51  ;;  %v10746_v57 = vsel %vm673_vm4, %v3659_v53, %v3661_v54  ;;  %v10750_v58 = vsel %vm673_vm4, %v3657_v50, %v3659_v53  ;;  %v9392_v54 = vld [vmem:[%s11558_s1 + $0xc8] sm:$0xff] }
 0x526   : > { %3672 = vmatpush1.msra.mxu0 %v10742_v56  ;;  %3742 = vmatprep.subr.mxu1 %v10746_v57 }
 0x527   : > { %9381 = vmatmul.mubr.msk.f32.vlgmr.msra.gmra.mrb[4].mxu0 %vm210_vm1, %v9380_v55  ;;  %3743 = vmatpush1.msra.mxu1 %v10750_v58 }
 0x528   : > { %3822 = vmatprep.subr.mxu0 %v10576_v15  ;;  %v3973_v59 = vpop.permute.xlu1 %3972  ;;  %9382 = vmatmul.mubr.msk.f32.vlgmr.msra.gmra.mrb[4].mxu1 %vm210_vm1, %v9380_v55  ;;  %v3971_v60 = vpop.permute.xlu0 %3970 }
 0x529   : > { %3823 = vmatpush1.msra.mxu0 %v10579_v16  ;;  %3893 = vmatprep.subr.mxu1 %v10589_v21  ;;  %v10762_v61 = vsel %vm988_vm5, %v3971_v60, %v3973_v59 }
 0x52a   : > { %3894 = vmatpush1.msra.mxu1 %v10586_v17  ;;  %3985 = vmatprep.subr.mxu0 %v10762_v61 }
 0x52b   : > { %3886 = vmatprep.mubr.f32.mxu0 %v11561_v0  ;;  %3957 = vmatprep.mubr.f32.mxu1 %v11561_v0 }
 0x52c   : > { %v3975_v62 = vpop.permute.xlu1 %3974  ;;  %v3969_v63 = vpop.permute.xlu0 %3968 }
 0x52d   : > { %v10773_v7 = vsel %vm988_vm5, %v3975_v62, %v3969_v63  ;;  %v10777_v8 = vsel %vm988_vm5, %v3969_v63, %v3971_v60  ;;  %v10785_v10 = vsel %vm988_vm5, %v3973_v59, %v3975_v62  ;;  %v9395_v62 = vld [vmem:[%s11558_s1 + $0xd0] sm:$0xff] }
 0x52e   : > { %4056 = vmatprep.subr.mxu1 %v10773_v7 }
 0x52f   : > { %9384 = vmatmul.mubr.msk.f32.vlgmr.msra.gmra.mrb[4].mxu0 %vm210_vm1, %v9383_v1 }
 0x530   : > { %3986 = vmatpush1.msra.mxu0 %v10777_v8  ;;  %v4136_v9 = vpop.permute.xlu1 %4135  ;;  %9385 = vmatmul.mubr.msk.f32.vlgmr.msra.gmra.mrb[4].mxu1 %vm210_vm1, %v9383_v1  ;;  %v4134_v11 = vpop.permute.xlu0 %4133 }
 0x531   : > { %4057 = vmatpush1.msra.mxu1 %v10785_v10  ;;  %v10790_v12 = vsel %vm1152_vm6, %v4134_v11, %v4136_v9  ;;  %4049 = vmatprep.mubr.f32.mxu0 %v11561_v0 }
 0x532   : > { %4148 = vmatprep.subr.mxu0 %v10790_v12  ;;  %4120 = vmatprep.mubr.f32.mxu1 %v11561_v0 }
 0x534   : > { %v4138_v13 = vpop.permute.xlu1 %4137  ;;  %v4132_v14 = vpop.permute.xlu0 %4131 }
 0x535   : > { %v10800_v23 = vsel %vm1152_vm6, %v4138_v13, %v4132_v14  ;;  %v10804_v26 = vsel %vm1152_vm6, %v4132_v14, %v4134_v11  ;;  %v10812_v28 = vsel %vm1152_vm6, %v4136_v9, %v4138_v13 }
 0x536   : > { %4219 = vmatprep.subr.mxu1 %v10800_v23  ;;  %11579 = vst [vmem:[#allocation6_spill] sm:$0xff] %v10812_v28 }
 0x537   : > { %9387 = vmatmul.mubr.msk.f32.vlgmr.msra.gmra.mrb[4].mxu0 %vm210_vm1, %v9386_v22 }
 0x538   : > { %4149 = vmatpush1.msra.mxu0 %v10804_v26  ;;  %v4299_v27 = vpop.permute.xlu1 %4298  ;;  %9388 = vmatmul.mubr.msk.f32.vlgmr.msra.gmra.mrb[4].mxu1 %vm210_vm1, %v9386_v22  ;;  %v4297_v32 = vpop.permute.xlu0 %4296 }
 0x539   : > { %4220 = vmatpush1.msra.mxu1 %v10812_v28  ;;  %v10817_v33 = vsel %vm1316_vm7, %v4297_v32, %v4299_v27  ;;  %4212 = vmatprep.mubr.f32.mxu0 %v11561_v0 }
 0x53a   : > { %4311 = vmatprep.subr.mxu0 %v10817_v33  ;;  %4283 = vmatprep.mubr.f32.mxu1 %v11561_v0 }
 0x53c   : > { %v4301_v35 = vpop.permute.xlu1 %4300  ;;  %v4295_v36 = vpop.permute.xlu0 %4294 }
 0x53d   : > { %v10827_v41 = vsel %vm1316_vm7, %v4301_v35, %v4295_v36  ;;  %v10831_v42 = vsel %vm1316_vm7, %v4295_v36, %v4297_v32  ;;  %v10839_v45 = vsel %vm1316_vm7, %v4299_v27, %v4301_v35 }
 0x53e   : > { %11580 = vst [vmem:[#allocation7_spill] sm:$0xff] %v10827_v41  ;;  %11581 = vst [vmem:[#allocation8_spill] sm:$0xff] %v10831_v42  ;;  %4382 = vmatprep.subr.mxu1 %v10827_v41 }
 0x53f   : > { %9390 = vmatmul.mubr.msk.f32.vlgmr.msra.gmra.mrb[4].mxu0 %vm210_vm1, %v9389_v37  ;;  %11582 = vst [vmem:[#allocation9_spill] sm:$0xff] %v10839_v45 }
 0x540   : > { %4312 = vmatpush1.msra.mxu0 %v10831_v42  ;;  %v4462_v44 = vpop.permute.xlu1 %4461  ;;  %9391 = vmatmul.mubr.msk.f32.vlgmr.msra.gmra.mrb[4].mxu1 %vm210_vm1, %v9389_v37  ;;  %v4460_v46 = vpop.permute.xlu0 %4459 }
 0x541   : > { %4383 = vmatpush1.msra.mxu1 %v10839_v45  ;;  %v10844_v50 = vsel %vm1480_vm8, %v4460_v46, %v4462_v44  ;;  %4375 = vmatprep.mubr.f32.mxu0 %v11561_v0 }
 0x542   : > { %11583 = vst [vmem:[#allocation10_spill] sm:$0xff] %v10844_v50  ;;  %4474 = vmatprep.subr.mxu0 %v10844_v50  ;;  %4446 = vmatprep.mubr.f32.mxu1 %v11561_v0 }
 0x544   : > { %v4464_v51 = vpop.permute.xlu1 %4463  ;;  %v4458_v53 = vpop.permute.xlu0 %4457 }
 0x545   : > { %v10854_v55 = vsel %vm1480_vm8, %v4458_v53, %v4460_v46  ;;  %v10858_v59 = vsel %vm1480_vm8, %v4464_v51, %v4458_v53  ;;  %v10864_v60 = vsel %vm1480_vm8, %v4462_v44, %v4464_v51 }
 0x546   : > { %11584 = vst [vmem:[#allocation11_spill] sm:$0xff] %v10854_v55  ;;  %11585 = vst [vmem:[#allocation12_spill] sm:$0xff] %v10858_v59  ;;  %4545 = vmatprep.subr.mxu1 %v10858_v59 }
 0x547   : > { %9393 = vmatmul.mubr.msk.f32.vlgmr.msra.gmra.mrb[4].mxu0 %vm210_vm1, %v9392_v54  ;;  %11586 = vst [vmem:[#allocation13_spill] sm:$0xff] %v10864_v60 }
 0x548   : > { %4475 = vmatpush1.msra.mxu0 %v10854_v55  ;;  %9394 = vmatmul.mubr.msk.f32.vlgmr.msra.gmra.mrb[4].mxu1 %vm210_vm1, %v9392_v54 }
 0x549   : > { %4546 = vmatpush1.msra.mxu1 %v10864_v60  ;;  %4538 = vmatprep.mubr.f32.mxu0 %v11561_v0 }
 0x54a   : > { %4609 = vmatprep.mubr.f32.mxu1 %v11561_v0 }
 0x54f   : > { %9396 = vmatmul.mubr.msk.f32.vlgmr.msra.gmra.mrb[4].mxu0 %vm210_vm1, %v9395_v62 }
 0x550   : > { %9397 = vmatmul.mubr.msk.f32.vlgmr.msra.gmra.mrb[4].mxu1 %vm210_vm1, %v9395_v62  ;;  %4762 = vmatprep.mubr.f32.mxu0 %v11561_v0 }
 0x551   : > { %4833 = vmatprep.mubr.f32.mxu1 %v11561_v0 }
 0x622   : > { %v4540_v63 = vpop.f32.mrb[4].mxu0 }
 0x623   : > { %v4620_v1 = vmul.f32 %v4540_v63, %v10343_v18  ;;  %v4542_v9 = vpop.f32.mrb[5].mxu0  ;;  %v4611_v11 = vpop.f32.mrb[4].mxu1 }
 0x624   : > { %v4621_v13 = vmul.f32 %v4542_v9, %v10353_v20  ;;  %v4622_v14 = vmul.f32 %v4611_v11, %v10348_v19  ;;  %v4613_v22 = vpop.f32.mrb[5].mxu1 }
 0x625   : > { %v4629_v27 = vmul.f32 %v4620_v1, %v4620_v1  ;;  %v4623_v36 = vmul.f32 %v4613_v22, %v10359_v25 }
 0x626   : > { %v4624_v32 = vadd.f32 %v4621_v13, %v4620_v1  ;;  %v4630_v35 = vmul.f32 %v4621_v13, %v4621_v13  ;;  %v4631_v46 = vmul.f32 %v4622_v14, %v4622_v14 }
 0x627   : > { %v4632_v51 = vmul.f32 %v4623_v36, %v4623_v36 }
 0x628   : > { %v4633_v37 = vadd.f32 %v4630_v35, %v4629_v27  ;;  %v4625_v44 = vadd.f32 %v4624_v32, %v4622_v14 }
 0x62a   : > { %v4626_v53 = vadd.f32 %v4625_v44, %v4623_v36  ;;  %v4634_v54 = vadd.f32 %v4633_v37, %v4631_v46 }
 0x62c   : > { %4627 = vadd.xlane.f32.xlu0 %v4626_v53  ;;  %v4635_v62 = vadd.f32 %v4634_v54, %v4632_v51 }
 0x62e   : > { %4636 = vadd.xlane.f32.xlu1 %v4635_v62 }
 0x6b9   : > { %v4628_v63 = vpop.xlane.xlu0 %4627 }
 0x6ba   : > { %v4638_v0 = vmul.f32 0.00390625, %v4628_v63 }
 0x6bb   : > { %v4637_v9 = vpop.xlane.xlu1 %4636 }
 0x6bc   : > { %v4639_v5 = vmul.f32 0.00390625, %v4637_v9  ;;  %v4640_v11 = vmul.f32 %v4638_v0, %v4638_v0  ;;  %v4643_v60 = vsub.f32 %v4620_v1, %v4638_v0  ;;  %v4644_v22 = vsub.f32 %v4621_v13, %v4638_v0 }
 0x6bd   : > { %v4645_v27 = vsub.f32 %v4622_v14, %v4638_v0  ;;  %v4646_v32 = vsub.f32 %v4623_v36, %v4638_v0 }
 0x6be   : > { %v4641_v4 = vsub.f32 %v4639_v5, %v4640_v11  ;;  %v11587_v11 = vmov 0.0  }
 0x6c0   : > { %v4642_v2 = vmax.f32 %v4641_v4, 0.0 }
 0x6c2   : > { %v4647_v3 = vadd.f32 1e-05, %v4642_v2 }
 0x6c4   : > { %10048 = vrsqrt.f32 %v4647_v3 }
 0x6ce   : > { %v10049_v35 = vpop.eup %10048 }
 0x6cf   : > { %v4649_v55 = vmul.f32 %v10049_v35, %v4643_v60  ;;  %v4650_v44 = vmul.f32 %v10049_v35, %v4644_v22  ;;  %v4651_v37 = vmul.f32 %v10049_v35, %v4645_v27  ;;  %v4652_v46 = vmul.f32 %v10049_v35, %v4646_v32  ;;  %v9398_v35 = vld [vmem:[%s11558_s1 + $0xd8] sm:$0xff] }
 0x6d1   : > { %v4653_v51 = vmul.f32 0.2, %v4649_v55  ;;  %v4654_v53 = vmul.f32 0.2, %v4650_v44  ;;  %v4655_v54 = vmul.f32 0.2, %v4651_v37 }
 0x6d2   : > { %v4656_v62 = vmul.f32 0.2, %v4652_v46 }
 0x6d3   : > { %v4657_v63 = vmax.f32 %v4649_v55, %v4653_v51  ;;  %v4658_v9 = vmax.f32 %v4650_v44, %v4654_v53  ;;  %v4659_v59 = vmax.f32 %v4651_v37, %v4655_v54 }
 0x6d4   : > { %v4660_v5 = vmax.f32 %v4652_v46, %v4656_v62 }
 0x6d5   : > { %v10883_v2 = vmul.f32 %v4657_v63, %v10343_v18  ;;  %v10886_v3 = vmul.f32 %v4658_v9, %v10353_v20  ;;  %v10891_v0 = vmul.f32 %v4659_v59, %v10348_v19  ;;  %v9399_v59 = vld [vmem:[%s11558_s1 + $0xe0] sm:$0xff]  ;;  %v9404_v9 = vld [vmem:[%s11558_s1 + $0xe8] sm:$0xff] }
 0x6d6   : > { %v10894_v4 = vmul.f32 %v4660_v5, %v10359_v25 }
 0x6d7   : > { %4682 = vrot.lane.b32.xlu1 %v10886_v3, %s10081_s16  ;;  %4680 = vrot.lane.b32.xlu0 %v10883_v2, %s10081_s16 }
 0x6db   : > { %4684 = vrot.lane.b32.xlu1 %v10891_v0, %s10081_s16  ;;  %4686 = vrot.lane.b32.xlu0 %v10894_v4, %s10081_s16 }
 0x6df   : > { %4667 = vrot.lane.b32.xlu1 %v10886_v3, %s10082_s17  ;;  %4665 = vrot.lane.b32.xlu0 %v10883_v2, %s10082_s17 }
 0x6e3   : > { %4669 = vrot.lane.b32.xlu1 %v10891_v0, %s10082_s17  ;;  %4671 = vrot.lane.b32.xlu0 %v10894_v4, %s10082_s17 }
 0x6e7   : > { %4987 = vrot.lane.b32.xlu1 %v10886_v3, %s10083_s26  ;;  %4985 = vrot.lane.b32.xlu0 %v10883_v2, %s10083_s26 }
 0x6eb   : > { %4989 = vrot.lane.b32.xlu1 %v10891_v0, %s10083_s26  ;;  %4991 = vrot.lane.b32.xlu0 %v10894_v4, %s10083_s26 }
 0x6ef   : > { %5151 = vrot.lane.b32.xlu1 %v10886_v3, %s10084_s27  ;;  %5149 = vrot.lane.b32.xlu0 %v10883_v2, %s10084_s27 }
 0x6f3   : > { %5153 = vrot.lane.b32.xlu1 %v10891_v0, %s10084_s27  ;;  %5155 = vrot.lane.b32.xlu0 %v10894_v4, %s10084_s27 }
 0x6f7   : > { %5468 = vrot.lane.b32.xlu1 %v10891_v0, %s10085_s28  ;;  %5466 = vrot.lane.b32.xlu0 %v10886_v3, %s10085_s28 }
 0x6fb   : > { %5470 = vrot.lane.b32.xlu1 %v10894_v4, %s10085_s28  ;;  %5464 = vrot.lane.b32.xlu0 %v10883_v2, %s10085_s28 }
 0x6ff   : > { %5632 = vrot.lane.b32.xlu1 %v10891_v0, %s10086_s29  ;;  %5630 = vrot.lane.b32.xlu0 %v10886_v3, %s10086_s29 }
 0x703   : > { %5634 = vrot.lane.b32.xlu1 %v10894_v4, %s10086_s29  ;;  %5628 = vrot.lane.b32.xlu0 %v10883_v2, %s10086_s29 }
 0x707   : > { %5796 = vrot.lane.b32.xlu1 %v10891_v0, %s10087_s30  ;;  %5794 = vrot.lane.b32.xlu0 %v10886_v3, %s10087_s30 }
 0x70b   : > { %5798 = vrot.lane.b32.xlu1 %v10894_v4, %s10087_s30  ;;  %5792 = vrot.lane.b32.xlu0 %v10883_v2, %s10087_s30 }
 0x70f   : > { %5960 = vrot.lane.b32.xlu1 %v10891_v0, %s10088_s4  ;;  %5958 = vrot.lane.b32.xlu0 %v10886_v3, %s10088_s4 }
 0x713   : > { %5962 = vrot.lane.b32.xlu1 %v10894_v4, %s10088_s4  ;;  %5956 = vrot.lane.b32.xlu0 %v10883_v2, %s10088_s4 }
 0x749   : > { %v4683_v18 = vpop.permute.xlu1 %4682  ;;  %v4681_v19 = vpop.permute.xlu0 %4680 }
 0x74a   : > { %v4691_v20 = vsel %vm4688_vm9, %v4681_v19, %v4683_v18 }
 0x74b   : > { %4698 = vmatprep.subr.mxu0 %v4691_v20 }
 0x74d   : > { %v4685_v25 = vpop.permute.xlu1 %4684  ;;  %v4687_v55 = vpop.permute.xlu0 %4686 }
 0x74e   : > { %v4690_v60 = vsel %vm4688_vm9, %v4683_v18, %v4685_v25  ;;  %v4692_v1 = vsel %vm4688_vm9, %v4687_v55, %v4681_v19  ;;  %v4689_v13 = vsel %vm4688_vm9, %v4685_v25, %v4687_v55  ;;  %vm5964_vm9 = vcmp.lt.s32.totalorder %v10199_v6, 86 }
 0x74f   : > { %4699 = vmatpush1.msra.mxu0 %v4692_v1  ;;  %4769 = vmatprep.subr.mxu1 %v4689_v13  ;;  %v9407_v1 = vld [vmem:[%s11558_s1 + $0xf0] sm:$0xff] }
 0x750   : > { %9400 = vmatmul.mubr.msk.f32.vlgmr.msra.gmra.mrb[6].mxu0 %vm210_vm1, %v9399_v59  ;;  %4770 = vmatpush1.msra.mxu1 %v4690_v60 }
 0x751   : > { %v4668_v14 = vpop.permute.xlu1 %4667  ;;  %9401 = vmatmul.mubr.msk.f32.vlgmr.msra.gmra.mrb[6].mxu1 %vm210_vm1, %v9399_v59  ;;  %v4666_v36 = vpop.permute.xlu0 %4665  ;;  %4907 = vmatprep.mubr.f32.mxu0 %v11587_v11 }
 0x752   : > { %v4676_v22 = vsel %vm4673_vm10, %v4666_v36, %v4668_v14  ;;  %4978 = vmatprep.mubr.f32.mxu1 %v11587_v11 }
 0x753   : > { %4843 = vmatprep.subr.mxu0 %v4676_v22 }
 0x755   : > { %v4670_v27 = vpop.permute.xlu1 %4669  ;;  %v4672_v32 = vpop.permute.xlu0 %4671 }
 0x756   : > { %v4675_v44 = vsel %vm4673_vm10, %v4668_v14, %v4670_v27  ;;  %v4677_v37 = vsel %vm4673_vm10, %v4672_v32, %v4666_v36  ;;  %v4674_v46 = vsel %vm4673_vm10, %v4670_v27, %v4672_v32 }
 0x757   : > { %4844 = vmatpush1.msra.mxu0 %v4677_v37  ;;  %4914 = vmatprep.subr.mxu1 %v4674_v46  ;;  %v9410_v37 = vld [vmem:[%s11558_s1 + $0xf8] sm:$0xff] }
 0x758   : > { %9402 = vmatmul.mubr.msk.f32.vlgmr.msra.gmra.mrb[6].mxu0 %vm210_vm1, %v9398_v35  ;;  %4915 = vmatpush1.msra.mxu1 %v4675_v44 }
 0x759   : > { %v4988_v51 = vpop.permute.xlu1 %4987  ;;  %9403 = vmatmul.mubr.msk.f32.vlgmr.msra.gmra.mrb[6].mxu1 %vm210_vm1, %v9398_v35  ;;  %v4986_v53 = vpop.permute.xlu0 %4985  ;;  %5067 = vmatprep.mubr.f32.mxu0 %v11587_v11 }
 0x75a   : > { %v4996_v54 = vsel %vm4993_vm11, %v4986_v53, %v4988_v51  ;;  %5138 = vmatprep.mubr.f32.mxu1 %v11587_v11 }
 0x75b   : > { %5003 = vmatprep.subr.mxu0 %v4996_v54 }
 0x75d   : > { %v4990_v62 = vpop.permute.xlu1 %4989  ;;  %v4992_v63 = vpop.permute.xlu0 %4991 }
 0x75e   : > { %v4995_v5 = vsel %vm4993_vm11, %v4988_v51, %v4990_v62  ;;  %v4997_v18 = vsel %vm4993_vm11, %v4992_v63, %v4986_v53  ;;  %v4994_v19 = vsel %vm4993_vm11, %v4990_v62, %v4992_v63 }
 0x75f   : > { %5004 = vmatpush1.msra.mxu0 %v4997_v18  ;;  %5074 = vmatprep.subr.mxu1 %v4994_v19  ;;  %v9413_v18 = vld [vmem:[%s11558_s1 + $0x100] sm:$0xff] }
 0x760   : > { %9405 = vmatmul.mubr.msk.f32.vlgmr.msra.gmra.mrb[6].mxu0 %vm210_vm1, %v9404_v9  ;;  %5075 = vmatpush1.msra.mxu1 %v4995_v5 }
 0x761   : > { %v5152_v20 = vpop.permute.xlu1 %5151  ;;  %9406 = vmatmul.mubr.msk.f32.vlgmr.msra.gmra.mrb[6].mxu1 %vm210_vm1, %v9404_v9  ;;  %v5150_v25 = vpop.permute.xlu0 %5149  ;;  %5231 = vmatprep.mubr.f32.mxu0 %v11587_v11 }
 0x762   : > { %v5160_v55 = vsel %vm5157_vm12, %v5150_v25, %v5152_v20  ;;  %5302 = vmatprep.mubr.f32.mxu1 %v11587_v11 }
 0x763   : > { %5167 = vmatprep.subr.mxu0 %v5160_v55 }
 0x765   : > { %v5154_v59 = vpop.permute.xlu1 %5153  ;;  %v5156_v60 = vpop.permute.xlu0 %5155 }
 0x766   : > { %v5159_v13 = vsel %vm5157_vm12, %v5152_v20, %v5154_v59  ;;  %v5161_v14 = vsel %vm5157_vm12, %v5156_v60, %v5150_v25  ;;  %v5158_v36 = vsel %vm5157_vm12, %v5154_v59, %v5156_v60 }
 0x767   : > { %5168 = vmatpush1.msra.mxu0 %v5161_v14  ;;  %5238 = vmatprep.subr.mxu1 %v5158_v36  ;;  %v9416_v14 = vld [vmem:[%s11558_s1 + $0x108] sm:$0xff] }
 0x768   : > { %9408 = vmatmul.mubr.msk.f32.vlgmr.msra.gmra.mrb[6].mxu0 %vm210_vm1, %v9407_v1  ;;  %5239 = vmatpush1.msra.mxu1 %v5159_v13 }
 0x769   : > { %5318 = vmatprep.subr.mxu0 %v10886_v3  ;;  %v5469_v22 = vpop.permute.xlu1 %5468  ;;  %9409 = vmatmul.mubr.msk.f32.vlgmr.msra.gmra.mrb[6].mxu1 %vm210_vm1, %v9407_v1  ;;  %v5467_v27 = vpop.permute.xlu0 %5466 }
 0x76a   : > { %5319 = vmatpush1.msra.mxu0 %v10883_v2  ;;  %5389 = vmatprep.subr.mxu1 %v10894_v4  ;;  %v5474_v32 = vsel %vm5472_vm13, %v5467_v27, %v5469_v22 }
 0x76b   : > { %5390 = vmatpush1.msra.mxu1 %v10891_v0  ;;  %5482 = vmatprep.subr.mxu0 %v5474_v32 }
 0x76c   : > { %5382 = vmatprep.mubr.f32.mxu0 %v11587_v11  ;;  %5453 = vmatprep.mubr.f32.mxu1 %v11587_v11 }
 0x76d   : > { %v5471_v35 = vpop.permute.xlu1 %5470  ;;  %v5465_v44 = vpop.permute.xlu0 %5464 }
 0x76e   : > { %v5475_v46 = vsel %vm5472_vm13, %v5465_v44, %v5467_v27  ;;  %v5476_v51 = vsel %vm5472_vm13, %v5471_v35, %v5465_v44  ;;  %v5473_v53 = vsel %vm5472_vm13, %v5469_v22, %v5471_v35 }
 0x76f   : > { %5553 = vmatprep.subr.mxu1 %v5476_v51  ;;  %v9419_v51 = vld [vmem:[%s11558_s1 + $0x110] sm:$0xff] }
 0x770   : > { %9411 = vmatmul.mubr.msk.f32.vlgmr.msra.gmra.mrb[6].mxu0 %vm210_vm1, %v9410_v37 }
 0x771   : > { %5483 = vmatpush1.msra.mxu0 %v5475_v46  ;;  %v5633_v54 = vpop.permute.xlu1 %5632  ;;  %9412 = vmatmul.mubr.msk.f32.vlgmr.msra.gmra.mrb[6].mxu1 %vm210_vm1, %v9410_v37  ;;  %v5631_v62 = vpop.permute.xlu0 %5630 }
 0x772   : > { %5554 = vmatpush1.msra.mxu1 %v5473_v53  ;;  %v5638_v63 = vsel %vm5636_vm14, %v5631_v62, %v5633_v54  ;;  %5546 = vmatprep.mubr.f32.mxu0 %v11587_v11 }
 0x773   : > { %5646 = vmatprep.subr.mxu0 %v5638_v63  ;;  %5617 = vmatprep.mubr.f32.mxu1 %v11587_v11  ;;  %v9422_v63 = vld [vmem:[%s11558_s1 + $0x118] sm:$0xff] }
 0x775   : > { %v5635_v9 = vpop.permute.xlu1 %5634  ;;  %v5629_v5 = vpop.permute.xlu0 %5628 }
 0x776   : > { %v5639_v19 = vsel %vm5636_vm14, %v5629_v5, %v5631_v62  ;;  %v5640_v20 = vsel %vm5636_vm14, %v5635_v9, %v5629_v5  ;;  %v5637_v25 = vsel %vm5636_vm14, %v5633_v54, %v5635_v9  ;;  %v11036_v5 = vld [vmem:[%s11559_s2] sm:$0xff] }
 0x777   : > { %5717 = vmatprep.subr.mxu1 %v5640_v20 }
 0x778   : > { %9414 = vmatmul.mubr.msk.f32.vlgmr.msra.gmra.mrb[6].mxu0 %vm210_vm1, %v9413_v18 }
 0x779   : > { %5647 = vmatpush1.msra.mxu0 %v5639_v19  ;;  %v5797_v55 = vpop.permute.xlu1 %5796  ;;  %9415 = vmatmul.mubr.msk.f32.vlgmr.msra.gmra.mrb[6].mxu1 %vm210_vm1, %v9413_v18  ;;  %v5795_v59 = vpop.permute.xlu0 %5794 }
 0x77a   : > { %5718 = vmatpush1.msra.mxu1 %v5637_v25  ;;  %v5802_v60 = vsel %vm5800_vm15, %v5795_v59, %v5797_v55  ;;  %5710 = vmatprep.mubr.f32.mxu0 %v11587_v11  ;;  %v11042_v25 = vld [vmem:[%s11559_s2 + $0x8] sm:$0xff] }
 0x77b   : > { %5810 = vmatprep.subr.mxu0 %v5802_v60  ;;  %5781 = vmatprep.mubr.f32.mxu1 %v11587_v11 }
 0x77d   : > { %v5799_v1 = vpop.permute.xlu1 %5798  ;;  %v5793_v13 = vpop.permute.xlu0 %5792 }
 0x77e   : > { %v5803_v36 = vsel %vm5800_vm15, %v5793_v13, %v5795_v59  ;;  %v5804_v22 = vsel %vm5800_vm15, %v5799_v1, %v5793_v13  ;;  %v5801_v27 = vsel %vm5800_vm15, %v5797_v55, %v5799_v1  ;;  %v11048_v59 = vld [vmem:[%s11559_s2 + $0x10] sm:$0xff] }
 0x77f   : > { %5881 = vmatprep.subr.mxu1 %v5804_v22  ;;  %v11054_v22 = vld [vmem:[%s11559_s2 + $0x18] sm:$0xff] }
 0x780   : > { %9417 = vmatmul.mubr.msk.f32.vlgmr.msra.gmra.mrb[6].mxu0 %vm210_vm1, %v9416_v14 }
 0x781   : > { %5811 = vmatpush1.msra.mxu0 %v5803_v36  ;;  %v5961_v32 = vpop.permute.xlu1 %5960  ;;  %9418 = vmatmul.mubr.msk.f32.vlgmr.msra.gmra.mrb[6].mxu1 %vm210_vm1, %v9416_v14  ;;  %v5959_v35 = vpop.permute.xlu0 %5958 }
 0x782   : > { %5882 = vmatpush1.msra.mxu1 %v5801_v27  ;;  %v5966_v44 = vsel %vm5964_vm9, %v5959_v35, %v5961_v32  ;;  %5874 = vmatprep.mubr.f32.mxu0 %v11587_v11 }
 0x783   : > { %5974 = vmatprep.subr.mxu0 %v5966_v44  ;;  %5945 = vmatprep.mubr.f32.mxu1 %v11587_v11 }
 0x785   : > { %v5963_v37 = vpop.permute.xlu1 %5962  ;;  %v5957_v46 = vpop.permute.xlu0 %5956 }
 0x786   : > { %v5967_v53 = vsel %vm5964_vm9, %v5957_v46, %v5959_v35  ;;  %v5968_v54 = vsel %vm5964_vm9, %v5963_v37, %v5957_v46  ;;  %v5965_v62 = vsel %vm5964_vm9, %v5961_v32, %v5963_v37 }
 0x787   : > { %6045 = vmatprep.subr.mxu1 %v5968_v54 }
 0x788   : > { %9420 = vmatmul.mubr.msk.f32.vlgmr.msra.gmra.mrb[6].mxu0 %vm210_vm1, %v9419_v51 }
 0x789   : > { %5975 = vmatpush1.msra.mxu0 %v5967_v53  ;;  %9421 = vmatmul.mubr.msk.f32.vlgmr.msra.gmra.mrb[6].mxu1 %vm210_vm1, %v9419_v51 }
 0x78a   : > { %6046 = vmatpush1.msra.mxu1 %v5965_v62  ;;  %6038 = vmatprep.mubr.f32.mxu0 %v11587_v11 }
 0x78b   : > { %6109 = vmatprep.mubr.f32.mxu1 %v11587_v11 }
 0x790   : > { %9423 = vmatmul.mubr.msk.f32.vlgmr.msra.gmra.mrb[6].mxu0 %vm210_vm1, %v9422_v63 }
 0x791   : > { %9424 = vmatmul.mubr.msk.f32.vlgmr.msra.gmra.mrb[6].mxu1 %vm210_vm1, %v9422_v63  ;;  %6285 = vmatprep.mubr.f32.mxu0 %v11587_v11  ;;  %vm6217_vm1 = vcmask 130048  }
 0x792   : > { %6356 = vmatprep.mubr.f32.mxu1 %v11587_v11 }
 0x863   : > { %v6040_v9 = vpop.f32.mrb[6].mxu0 }
 0x864   : > { %v6120_v18 = vmul.f32 %v11036_v5, %v6040_v9  ;;  %v6042_v19 = vpop.f32.mrb[7].mxu0  ;;  %v6111_v20 = vpop.f32.mrb[6].mxu1 }
 0x865   : > { %v6121_v55 = vmul.f32 %v11042_v25, %v6042_v19  ;;  %v6122_v60 = vmul.f32 %v11048_v59, %v6111_v20  ;;  %v6113_v1 = vpop.f32.mrb[7].mxu1 }
 0x866   : > { %v6129_v13 = vmul.f32 %v6120_v18, %v6120_v18  ;;  %v6123_v27 = vmul.f32 %v11054_v22, %v6113_v1 }
 0x867   : > { %v6124_v14 = vadd.f32 %v6121_v55, %v6120_v18  ;;  %v6130_v36 = vmul.f32 %v6121_v55, %v6121_v55  ;;  %v6131_v44 = vmul.f32 %v6122_v60, %v6122_v60 }
 0x868   : > { %v6132_v37 = vmul.f32 %v6123_v27, %v6123_v27 }
 0x869   : > { %v6133_v32 = vadd.f32 %v6130_v36, %v6129_v13  ;;  %v6125_v35 = vadd.f32 %v6124_v14, %v6122_v60 }
 0x86b   : > { %v6126_v46 = vadd.f32 %v6125_v35, %v6123_v27  ;;  %v6134_v51 = vadd.f32 %v6133_v32, %v6131_v44 }
 0x86d   : > { %6127 = vadd.xlane.f32.xlu0 %v6126_v46  ;;  %v6135_v53 = vadd.f32 %v6134_v51, %v6132_v37 }
 0x86f   : > { %6136 = vadd.xlane.f32.xlu1 %v6135_v53 }
 0x8fa   : > { %v6128_v54 = vpop.xlane.xlu0 %6127 }
 0x8fb   : > { %v6138_v62 = vmul.f32 0.00390625, %v6128_v54 }
 0x8fc   : > { %v6137_v63 = vpop.xlane.xlu1 %6136 }
 0x8fd   : > { %v6139_v9 = vmul.f32 0.00390625, %v6137_v63  ;;  %v6140_v19 = vmul.f32 %v6138_v62, %v6138_v62  ;;  %v6143_v42 = vsub.f32 %v6120_v18, %v6138_v62  ;;  %v6144_v1 = vsub.f32 %v6121_v55, %v6138_v62 }
 0x8fe   : > { %v6145_v13 = vsub.f32 %v6122_v60, %v6138_v62  ;;  %v6146_v14 = vsub.f32 %v6123_v27, %v6138_v62 }
 0x8ff   : > { %v6141_v20 = vsub.f32 %v6139_v9, %v6140_v19 }
 0x901   : > { %v6142_v45 = vmax.f32 %v6141_v20, 0.0 }
 0x903   : > { %v6147_v50 = vadd.f32 1e-05, %v6142_v45 }
 0x905   : > { %10050 = vrsqrt.f32 %v6147_v50 }
 0x90f   : > { %v10051_v36 = vpop.eup %10050 }
 0x910   : > { %v6149_v41 = vmul.f32 %v10051_v36, %v6143_v42  ;;  %v6150_v35 = vmul.f32 %v10051_v36, %v6144_v1  ;;  %v6151_v32 = vmul.f32 %v10051_v36, %v6145_v13  ;;  %v6152_v44 = vmul.f32 %v10051_v36, %v6146_v14 }
 0x912   : > { %v6153_v37 = vmul.f32 0.2, %v6149_v41  ;;  %v6154_v46 = vmul.f32 0.2, %v6150_v35  ;;  %v6155_v51 = vmul.f32 0.2, %v6151_v32 }
 0x913   : > { %v6156_v53 = vmul.f32 0.2, %v6152_v44 }
 0x914   : > { %v6158_v54 = vmax.f32 %v6150_v35, %v6154_v46  ;;  %v6157_v63 = vmax.f32 %v6149_v41, %v6153_v37  ;;  %v6159_v28 = vmax.f32 %v6151_v32, %v6155_v51 }
 0x915   : > { %v6160_v9 = vmax.f32 %v6152_v44, %v6156_v53 }
 0x916   : > { %v11058_v45 = vmul.f32 %v11042_v25, %v6158_v54  ;;  %v11061_v50 = vmul.f32 %v11036_v5, %v6157_v63  ;;  %v11068_v55 = vmul.f32 %v11048_v59, %v6159_v28 }
 0x917   : > { %v11071_v60 = vmul.f32 %v11054_v22, %v6160_v9 }
 0x918   : > { %v9849_v42 = vpack.i.bf16 %v10886_v3, %v11058_v45  ;;  %v9844_v18 = vpack.i.bf16 %v10883_v2, %v11061_v50  ;;  %v9859_v41 = vpack.i.bf16 %v10891_v0, %v11068_v55 }
 0x919   : > { %v9854_v27 = vpack.i.bf16 %v10894_v4, %v11071_v60 }
 0x91a   : > { %9850 = vrot.lane.b32.xlu1 %v9849_v42, %s10073_s18  ;;  %9845 = vrot.lane.b32.xlu0 %v9844_v18, %s10073_s18 }
 0x91e   : > { %9860 = vrot.lane.b32.xlu1 %v9859_v41, %s10073_s18  ;;  %9855 = vrot.lane.b32.xlu0 %v9854_v27, %s10073_s18 }
 0x922   : > { %9870 = vrot.lane.b32.xlu1 %v9849_v42, %s10074_s19  ;;  %9865 = vrot.lane.b32.xlu0 %v9844_v18, %s10074_s19 }
 0x926   : > { %9880 = vrot.lane.b32.xlu1 %v9859_v41, %s10074_s19  ;;  %9875 = vrot.lane.b32.xlu0 %v9854_v27, %s10074_s19 }
 0x92a   : > { %9890 = vrot.lane.b32.xlu1 %v9849_v42, %s10075_s20  ;;  %9885 = vrot.lane.b32.xlu0 %v9844_v18, %s10075_s20 }
 0x92e   : > { %9900 = vrot.lane.b32.xlu1 %v9859_v41, %s10075_s20  ;;  %9895 = vrot.lane.b32.xlu0 %v9854_v27, %s10075_s20 }
 0x932   : > { %9910 = vrot.lane.b32.xlu1 %v9849_v42, %s10076_s21  ;;  %9905 = vrot.lane.b32.xlu0 %v9844_v18, %s10076_s21 }
 0x936   : > { %9920 = vrot.lane.b32.xlu1 %v9859_v41, %s10076_s21  ;;  %9915 = vrot.lane.b32.xlu0 %v9854_v27, %s10076_s21 }
 0x93a   : > { %9930 = vrot.lane.b32.xlu1 %v9859_v41, %s10077_s22  ;;  %9925 = vrot.lane.b32.xlu0 %v9849_v42, %s10077_s22 }
 0x93e   : > { %9940 = vrot.lane.b32.xlu1 %v9854_v27, %s10077_s22  ;;  %9935 = vrot.lane.b32.xlu0 %v9844_v18, %s10077_s22 }
 0x942   : > { %9950 = vrot.lane.b32.xlu1 %v9859_v41, %s10078_s23  ;;  %9945 = vrot.lane.b32.xlu0 %v9849_v42, %s10078_s23 }
 0x946   : > { %9960 = vrot.lane.b32.xlu1 %v9854_v27, %s10078_s23  ;;  %9955 = vrot.lane.b32.xlu0 %v9844_v18, %s10078_s23 }
 0x94a   : > { %9970 = vrot.lane.b32.xlu1 %v9859_v41, %s10079_s24  ;;  %9965 = vrot.lane.b32.xlu0 %v9849_v42, %s10079_s24 }
 0x94e   : > { %9980 = vrot.lane.b32.xlu1 %v9854_v27, %s10079_s24  ;;  %9975 = vrot.lane.b32.xlu0 %v9844_v18, %s10079_s24 }
 0x952   : > { %9990 = vrot.lane.b32.xlu1 %v9859_v41, %s10080_s25  ;;  %9985 = vrot.lane.b32.xlu0 %v9849_v42, %s10080_s25 }
 0x956   : > { %10000 = vrot.lane.b32.xlu1 %v9854_v27, %s10080_s25  ;;  %9995 = vrot.lane.b32.xlu0 %v9844_v18, %s10080_s25 }
 0x98c   : > { %v9851_v28 = vpop.permute.xlu1 %9850  ;;  %v9846_v62 = vpop.permute.xlu0 %9845 }
 0x98d   : > { %v9853_v19 = vunpack.i.h.bf16 %v9851_v28  ;;  %v9852_v20 = vunpack.i.l.bf16 %v9851_v28  ;;  %v9848_v1 = vunpack.i.h.bf16 %v9846_v62  ;;  %v9847_v13 = vunpack.i.l.bf16 %v9846_v62 }
 0x98f   : > { %v6211_v14 = vsel %vm203_vm0, %v9847_v13, %v9852_v20  ;;  %v6212_v36 = vsel %vm203_vm0, %v9848_v1, %v9853_v19 }
 0x990   : > { %v9861_v35 = vpop.permute.xlu1 %9860  ;;  %v9856_v32 = vpop.permute.xlu0 %9855  ;;  %v9483_v44 = vpack.c.bf16 %v6212_v36, %v6211_v14 }
 0x991   : > { %v9863_v37 = vunpack.i.h.bf16 %v9861_v35  ;;  %v9862_v46 = vunpack.i.l.bf16 %v9861_v35  ;;  %v9858_v51 = vunpack.i.h.bf16 %v9856_v32  ;;  %v9857_v53 = vunpack.i.l.bf16 %v9856_v32 }
 0x992   : > { %9484 = vmatprep.subr.bf16.mxu0 %v9483_v44 }
 0x993   : > { %v6209_v54 = vsel %vm203_vm0, %v9852_v20, %v9862_v46  ;;  %v6210_v63 = vsel %vm203_vm0, %v9853_v19, %v9863_v37  ;;  %v6213_v9 = vsel %vm203_vm0, %v9857_v53, %v9847_v13  ;;  %v6214_v42 = vsel %vm203_vm0, %v9858_v51, %v9848_v1  ;;  %v9426_v1 = vld [vmem:[%s11558_s1 + $0x128] sm:$0xff] }
 0x994   : > { %v9489_v18 = vpack.c.bf16 %v6210_v63, %v6209_v54  ;;  %v9485_v41 = vpack.c.bf16 %v6214_v42, %v6213_v9  ;;  %v9871_v27 = vpop.permute.xlu1 %9870  ;;  %v9866_v28 = vpop.permute.xlu0 %9865  ;;  %v6207_v62 = vsel %vm203_vm0, %v9862_v46, %v9857_v53  ;;  %v6208_v14 = vsel %vm203_vm0, %v9863_v37, %v9858_v51 }
 0x995   : > { %v9873_v20 = vunpack.i.h.bf16 %v9871_v27  ;;  %v9872_v36 = vunpack.i.l.bf16 %v9871_v27  ;;  %v9868_v35 = vunpack.i.h.bf16 %v9866_v28  ;;  %v9867_v19 = vunpack.i.l.bf16 %v9866_v28 }
 0x996   : > { %9486 = vmatpush1.bf16.msra.mxu0 %v9485_v41  ;;  %v9487_v32 = vpack.c.bf16 %v6208_v14, %v6207_v62 }
 0x997   : > { %v6185_v13 = vsel %vm189_vm2, %v9867_v19, %v9872_v36  ;;  %v6186_v44 = vsel %vm189_vm2, %v9868_v35, %v9873_v20 }
 0x998   : > { %9488 = vmatprep.subr.bf16.mxu1 %v9487_v32  ;;  %v9881_v46 = vpop.permute.xlu1 %9880  ;;  %v9876_v37 = vpop.permute.xlu0 %9875  ;;  %v9491_v51 = vpack.c.bf16 %v6186_v44, %v6185_v13 }
 0x999   : > { %9490 = vmatpush1.bf16.msra.mxu1 %v9489_v18  ;;  %v9883_v53 = vunpack.i.h.bf16 %v9881_v46  ;;  %v9882_v54 = vunpack.i.l.bf16 %v9881_v46  ;;  %v9878_v63 = vunpack.i.h.bf16 %v9876_v37  ;;  %v9877_v9 = vunpack.i.l.bf16 %v9876_v37  ;;  %9427 = vmatmul.mubr.msk.f32.vlgmr.msra.gmra.mrb[8].mxu0 %vm6217_vm1, %v9426_v1 }
 0x99a   : > { %9492 = vmatprep.subr.bf16.mxu0 %v9491_v51  ;;  %6430 = vmatprep.mubr.f32.mxu0 %v11587_v11 }
 0x99b   : > { %v6183_v42 = vsel %vm189_vm2, %v9872_v36, %v9882_v54  ;;  %v6184_v41 = vsel %vm189_vm2, %v9873_v20, %v9883_v53  ;;  %v6187_v27 = vsel %vm189_vm2, %v9877_v9, %v9867_v19  ;;  %v6188_v18 = vsel %vm189_vm2, %v9878_v63, %v9868_v35  ;;  %v9425_v19 = vld [vmem:[%s11558_s1 + $0x120] sm:$0xff] }
 0x99c   : > { %v9497_v28 = vpack.c.bf16 %v6184_v41, %v6183_v42  ;;  %v9493_v62 = vpack.c.bf16 %v6188_v18, %v6187_v27  ;;  %9428 = vmatmul.mubr.msk.f32.vlgmr.msra.gmra.mrb[8].mxu1 %vm6217_vm1, %v9426_v1  ;;  %v9891_v14 = vpop.permute.xlu1 %9890  ;;  %v9886_v32 = vpop.permute.xlu0 %9885  ;;  %v6181_v13 = vsel %vm189_vm2, %v9882_v54, %v9877_v9  ;;  %v6182_v36 = vsel %vm189_vm2, %v9883_v53, %v9878_v63 }
 0x99d   : > { %v9893_v44 = vunpack.i.h.bf16 %v9891_v14  ;;  %v9892_v20 = vunpack.i.l.bf16 %v9891_v14  ;;  %v9888_v46 = vunpack.i.h.bf16 %v9886_v32  ;;  %v9887_v37 = vunpack.i.l.bf16 %v9886_v32  ;;  %6501 = vmatprep.mubr.f32.mxu1 %v11587_v11 }
 0x99e   : > { %9494 = vmatpush1.bf16.msra.mxu0 %v9493_v62  ;;  %v9495_v35 = vpack.c.bf16 %v6182_v36, %v6181_v13 }
 0x99f   : > { %v6528_v1 = vsel %vm509_vm3, %v9887_v37, %v9892_v20  ;;  %v6529_v51 = vsel %vm509_vm3, %v9888_v46, %v9893_v44 }
 0x9a0   : > { %9496 = vmatprep.subr.bf16.mxu1 %v9495_v35  ;;  %v9901_v53 = vpop.permute.xlu1 %9900  ;;  %v9896_v54 = vpop.permute.xlu0 %9895  ;;  %v9499_v63 = vpack.c.bf16 %v6529_v51, %v6528_v1 }
 0x9a1   : > { %9498 = vmatpush1.bf16.msra.mxu1 %v9497_v28  ;;  %v9903_v9 = vunpack.i.h.bf16 %v9901_v53  ;;  %v9902_v42 = vunpack.i.l.bf16 %v9901_v53  ;;  %v9898_v41 = vunpack.i.h.bf16 %v9896_v54  ;;  %v9897_v27 = vunpack.i.l.bf16 %v9896_v54  ;;  %9429 = vmatmul.mubr.msk.f32.vlgmr.msra.gmra.mrb[8].mxu0 %vm6217_vm1, %v9425_v19 }
 0x9a2   : > { %9500 = vmatprep.subr.bf16.mxu0 %v9499_v63  ;;  %6601 = vmatprep.mubr.f32.mxu0 %v11587_v11 }
 0x9a3   : > { %v6526_v18 = vsel %vm509_vm3, %v9892_v20, %v9902_v42  ;;  %v6527_v62 = vsel %vm509_vm3, %v9893_v44, %v9903_v9  ;;  %v6530_v14 = vsel %vm509_vm3, %v9897_v27, %v9887_v37  ;;  %v6531_v28 = vsel %vm509_vm3, %v9898_v41, %v9888_v46  ;;  %v9431_v37 = vld [vmem:[%s11558_s1 + $0x130] sm:$0xff] }
 0x9a4   : > { %v9505_v32 = vpack.c.bf16 %v6527_v62, %v6526_v18  ;;  %v9501_v13 = vpack.c.bf16 %v6531_v28, %v6530_v14  ;;  %9430 = vmatmul.mubr.msk.f32.vlgmr.msra.gmra.mrb[8].mxu1 %vm6217_vm1, %v9425_v19  ;;  %v9911_v36 = vpop.permute.xlu1 %9910  ;;  %v9906_v35 = vpop.permute.xlu0 %9905  ;;  %v6524_v1 = vsel %vm509_vm3, %v9902_v42, %v9897_v27  ;;  %v6525_v20 = vsel %vm509_vm3, %v9903_v9, %v9898_v41 }
 0x9a5   : > { %v9913_v51 = vunpack.i.h.bf16 %v9911_v36  ;;  %v9912_v44 = vunpack.i.l.bf16 %v9911_v36  ;;  %v9908_v53 = vunpack.i.h.bf16 %v9906_v35  ;;  %v9907_v54 = vunpack.i.l.bf16 %v9906_v35  ;;  %6672 = vmatprep.mubr.f32.mxu1 %v11587_v11 }
 0x9a6   : > { %9502 = vmatpush1.bf16.msra.mxu0 %v9501_v13  ;;  %v9503_v46 = vpack.c.bf16 %v6525_v20, %v6524_v1  ;;  %v9515_v28 = vpack.c.bf16 %v10886_v3, %v11058_v45 }
 0x9a7   : > { %v6703_v19 = vsel %vm673_vm4, %v9907_v54, %v9912_v44  ;;  %v6704_v63 = vsel %vm673_vm4, %v9908_v53, %v9913_v51 }
 0x9a8   : > { %9504 = vmatprep.subr.bf16.mxu1 %v9503_v46  ;;  %v9921_v9 = vpop.permute.xlu1 %9920  ;;  %v9916_v42 = vpop.permute.xlu0 %9915  ;;  %v9507_v41 = vpack.c.bf16 %v6704_v63, %v6703_v19 }
 0x9a9   : > { %9506 = vmatpush1.bf16.msra.mxu1 %v9505_v32  ;;  %v9923_v27 = vunpack.i.h.bf16 %v9921_v9  ;;  %v9922_v18 = vunpack.i.l.bf16 %v9921_v9  ;;  %v9918_v62 = vunpack.i.h.bf16 %v9916_v42  ;;  %v9917_v14 = vunpack.i.l.bf16 %v9916_v42  ;;  %9432 = vmatmul.mubr.msk.f32.vlgmr.msra.gmra.mrb[8].mxu0 %vm6217_vm1, %v9431_v37 }
 0x9aa   : > { %9508 = vmatprep.subr.bf16.mxu0 %v9507_v41  ;;  %6776 = vmatprep.mubr.f32.mxu0 %v11587_v11 }
 0x9ab   : > { %v6701_v13 = vsel %vm673_vm4, %v9912_v44, %v9922_v18  ;;  %v6702_v36 = vsel %vm673_vm4, %v9913_v51, %v9923_v27  ;;  %v6705_v32 = vsel %vm673_vm4, %v9917_v14, %v9907_v54  ;;  %v6706_v35 = vsel %vm673_vm4, %v9918_v62, %v9908_v53  ;;  %v9434_v54 = vld [vmem:[%s11558_s1 + $0x138] sm:$0xff] }
 0x9ac   : > { %v9513_v1 = vpack.c.bf16 %v6702_v36, %v6701_v13  ;;  %v9509_v20 = vpack.c.bf16 %v6706_v35, %v6705_v32  ;;  %9433 = vmatmul.mubr.msk.f32.vlgmr.msra.gmra.mrb[8].mxu1 %vm6217_vm1, %v9431_v37  ;;  %v9931_v46 = vpop.permute.xlu1 %9930  ;;  %v9926_v3 = vpop.permute.xlu0 %9925  ;;  %v6699_v45 = vsel %vm673_vm4, %v9922_v18, %v9917_v14  ;;  %v6700_v44 = vsel %vm673_vm4, %v9923_v27, %v9918_v62 }
 0x9ad   : > { %v9933_v19 = vunpack.i.h.bf16 %v9931_v46  ;;  %v9932_v51 = vunpack.i.l.bf16 %v9931_v46  ;;  %v9928_v63 = vunpack.i.h.bf16 %v9926_v3  ;;  %v9927_v9 = vunpack.i.l.bf16 %v9926_v3  ;;  %6847 = vmatprep.mubr.f32.mxu1 %v11587_v11 }
 0x9ae   : > { %9510 = vmatpush1.bf16.msra.mxu0 %v9509_v20  ;;  %v9511_v53 = vpack.c.bf16 %v6700_v44, %v6699_v45  ;;  %v9519_v18 = vpack.c.bf16 %v10894_v4, %v11071_v60  ;;  %v9517_v62 = vpack.c.bf16 %v10883_v2, %v11061_v50  ;;  %v9521_v35 = vpack.c.bf16 %v10891_v0, %v11068_v55  ;;  %v9437_v44 = vld [vmem:[%s11558_s1 + $0x140] sm:$0xff] }
 0x9af   : > { %9516 = vmatprep.subr.bf16.mxu0 %v9515_v28  ;;  %v7027_v37 = vsel %vm988_vm5, %v9927_v9, %v9932_v51  ;;  %v7028_v42 = vsel %vm988_vm5, %v9928_v63, %v9933_v19 }
 0x9b0   : > { %9512 = vmatprep.subr.bf16.mxu1 %v9511_v53  ;;  %v9941_v41 = vpop.permute.xlu1 %9940  ;;  %v9936_v27 = vpop.permute.xlu0 %9935  ;;  %v9523_v14 = vpack.c.bf16 %v7028_v42, %v7027_v37 }
 0x9b1   : > { %9514 = vmatpush1.bf16.msra.mxu1 %v9513_v1  ;;  %v9943_v13 = vunpack.i.h.bf16 %v9941_v41  ;;  %v9942_v36 = vunpack.i.l.bf16 %v9941_v41  ;;  %v9938_v28 = vunpack.i.h.bf16 %v9936_v27  ;;  %v9937_v32 = vunpack.i.l.bf16 %v9936_v27  ;;  %9435 = vmatmul.mubr.msk.f32.vlgmr.msra.gmra.mrb[8].mxu0 %vm6217_vm1, %v9434_v54 }
 0x9b2   : > { %9520 = vmatprep.subr.bf16.mxu1 %v9519_v18  ;;  %9518 = vmatpush1.bf16.msra.mxu0 %v9517_v62 }
 0x9b3   : > { %9524 = vmatprep.subr.bf16.mxu0 %v9523_v14  ;;  %v7029_v4 = vsel %vm988_vm5, %v9937_v32, %v9927_v9  ;;  %v7030_v2 = vsel %vm988_vm5, %v9938_v28, %v9928_v63  ;;  %v7031_v1 = vsel %vm988_vm5, %v9942_v36, %v9937_v32  ;;  %v7032_v20 = vsel %vm988_vm5, %v9943_v13, %v9938_v28 }
 0x9b4   : > { %9436 = vmatmul.mubr.msk.f32.vlgmr.msra.gmra.mrb[8].mxu1 %vm6217_vm1, %v9434_v54  ;;  %v9951_v50 = vpop.permute.xlu1 %9950  ;;  %v9946_v60 = vpop.permute.xlu0 %9945  ;;  %6927 = vmatprep.mubr.f32.mxu0 %v11587_v11  ;;  %v9527_v45 = vpack.c.bf16 %v7032_v20, %v7031_v1  ;;  %v7025_v53 = vsel %vm988_vm5, %v9932_v51, %v9942_v36  ;;  %v7026_v54 = vsel %vm988_vm5, %v9933_v19, %v9943_v13 }
 0x9b5   : > { %9522 = vmatpush1.bf16.msra.mxu1 %v9521_v35  ;;  %v9953_v46 = vunpack.i.h.bf16 %v9951_v50  ;;  %v9952_v0 = vunpack.i.l.bf16 %v9951_v50  ;;  %v9948_v55 = vunpack.i.h.bf16 %v9946_v60  ;;  %v9947_v3 = vunpack.i.l.bf16 %v9946_v60  ;;  %6998 = vmatprep.mubr.f32.mxu1 %v11587_v11 }
 0x9b6   : > { %v9525_v37 = vpack.c.bf16 %v7030_v2, %v7029_v4  ;;  %9528 = vmatprep.subr.bf16.mxu1 %v9527_v45  ;;  %v9529_v32 = vpack.c.bf16 %v7026_v54, %v7025_v53 }
 0x9b7   : > { %v7202_v63 = vsel %vm1152_vm6, %v9947_v3, %v9952_v0  ;;  %v7203_v9 = vsel %vm1152_vm6, %v9948_v55, %v9953_v46 }
 0x9b8   : > { %v9961_v42 = vpop.permute.xlu1 %9960  ;;  %v9956_v41 = vpop.permute.xlu0 %9955  ;;  %v9531_v27 = vpack.c.bf16 %v7203_v9, %v7202_v63 }
 0x9b9   : > { %v9963_v18 = vunpack.i.h.bf16 %v9961_v42  ;;  %v9962_v62 = vunpack.i.l.bf16 %v9961_v42  ;;  %v9958_v14 = vunpack.i.h.bf16 %v9956_v41  ;;  %v9957_v28 = vunpack.i.l.bf16 %v9956_v41  ;;  %9438 = vmatmul.mubr.msk.f32.vlgmr.msra.gmra.mrb[8].mxu0 %vm6217_vm1, %v9437_v44 }
 0x9ba   : > { %9526 = vmatpush1.bf16.msra.mxu0 %v9525_v37  ;;  %7102 = vmatprep.mubr.f32.mxu0 %v11587_v11 }
 0x9bb   : > { %9532 = vmatprep.subr.bf16.mxu0 %v9531_v27  ;;  %v7204_v51 = vsel %vm1152_vm6, %v9957_v28, %v9947_v3  ;;  %v7205_v19 = vsel %vm1152_vm6, %v9958_v14, %v9948_v55  ;;  %v7206_v35 = vsel %vm1152_vm6, %v9962_v62, %v9957_v28  ;;  %v7207_v4 = vsel %vm1152_vm6, %v9963_v18, %v9958_v14  ;;  %v9440_v55 = vld [vmem:[%s11558_s1 + $0x148] sm:$0xff] }
 0x9bc   : > { %9439 = vmatmul.mubr.msk.f32.vlgmr.msra.gmra.mrb[8].mxu1 %vm6217_vm1, %v9437_v44  ;;  %v9971_v13 = vpop.permute.xlu1 %9970  ;;  %v9966_v36 = vpop.permute.xlu0 %9965  ;;  %v9535_v20 = vpack.c.bf16 %v7207_v4, %v7206_v35  ;;  %v7200_v44 = vsel %vm1152_vm6, %v9952_v0, %v9962_v62  ;;  %v7201_v63 = vsel %vm1152_vm6, %v9953_v46, %v9963_v18  ;;  %v9533_v9 = vpack.c.bf16 %v7205_v19, %v7204_v51 }
 0x9bd   : > { %9530 = vmatpush1.bf16.msra.mxu1 %v9529_v32  ;;  %v9973_v2 = vunpack.i.h.bf16 %v9971_v13  ;;  %v9972_v50 = vunpack.i.l.bf16 %v9971_v13  ;;  %v9968_v60 = vunpack.i.h.bf16 %v9966_v36  ;;  %v9967_v1 = vunpack.i.l.bf16 %v9966_v36  ;;  %7173 = vmatprep.mubr.f32.mxu1 %v11587_v11 }
 0x9be   : > { %9536 = vmatprep.subr.bf16.mxu1 %v9535_v20  ;;  %v9537_v28 = vpack.c.bf16 %v7201_v63, %v7200_v44 }
 0x9bf   : > { %v7377_v3 = vsel %vm1316_vm7, %v9967_v1, %v9972_v50  ;;  %v7378_v45 = vsel %vm1316_vm7, %v9968_v60, %v9973_v2 }
 0x9c0   : > { %v9981_v53 = vpop.permute.xlu1 %9980  ;;  %v9976_v54 = vpop.permute.xlu0 %9975  ;;  %v9539_v37 = vpack.c.bf16 %v7378_v45, %v7377_v3 }
 0x9c1   : > { %v9983_v42 = vunpack.i.h.bf16 %v9981_v53  ;;  %v9982_v41 = vunpack.i.l.bf16 %v9981_v53  ;;  %v9978_v27 = vunpack.i.h.bf16 %v9976_v54  ;;  %v9977_v14 = vunpack.i.l.bf16 %v9976_v54  ;;  %9441 = vmatmul.mubr.msk.f32.vlgmr.msra.gmra.mrb[8].mxu0 %vm6217_vm1, %v9440_v55 }
 0x9c2   : > { %9534 = vmatpush1.bf16.msra.mxu0 %v9533_v9  ;;  %7277 = vmatprep.mubr.f32.mxu0 %v11587_v11 }
 0x9c3   : > { %9540 = vmatprep.subr.bf16.mxu0 %v9539_v37  ;;  %v7379_v0 = vsel %vm1316_vm7, %v9977_v14, %v9967_v1  ;;  %v7380_v46 = vsel %vm1316_vm7, %v9978_v27, %v9968_v60  ;;  %v7381_v32 = vsel %vm1316_vm7, %v9982_v41, %v9977_v14  ;;  %v7382_v51 = vsel %vm1316_vm7, %v9983_v42, %v9978_v27  ;;  %v9443_v60 = vld [vmem:[%s11558_s1 + $0x150] sm:$0xff] }
 0x9c4   : > { %9442 = vmatmul.mubr.msk.f32.vlgmr.msra.gmra.mrb[8].mxu1 %vm6217_vm1, %v9440_v55  ;;  %v9991_v18 = vpop.permute.xlu1 %9990  ;;  %v9986_v62 = vpop.permute.xlu0 %9985  ;;  %v9543_v4 = vpack.c.bf16 %v7382_v51, %v7381_v32  ;;  %v7375_v55 = vsel %vm1316_vm7, %v9972_v50, %v9982_v41  ;;  %v7376_v3 = vsel %vm1316_vm7, %v9973_v2, %v9983_v42  ;;  %v9541_v45 = vpack.c.bf16 %v7380_v46, %v7379_v0  ;;  %v9446_v0 = vld [vmem:[%s11558_s1 + $0x158] sm:$0xff]  ;;  %v9449_v51 = vld [vmem:[%s11558_s1 + $0x160] sm:$0xff] }
 0x9c5   : > { %9538 = vmatpush1.bf16.msra.mxu1 %v9537_v28  ;;  %v9993_v19 = vunpack.i.h.bf16 %v9991_v18  ;;  %v9992_v13 = vunpack.i.l.bf16 %v9991_v18  ;;  %v9988_v36 = vunpack.i.h.bf16 %v9986_v62  ;;  %v9987_v35 = vunpack.i.l.bf16 %v9986_v62  ;;  %7348 = vmatprep.mubr.f32.mxu1 %v11587_v11 }
 0x9c6   : > { %9544 = vmatprep.subr.bf16.mxu1 %v9543_v4  ;;  %v9545_v14 = vpack.c.bf16 %v7376_v3, %v7375_v55 }
 0x9c7   : > { %v7552_v1 = vsel %vm1480_vm8, %v9987_v35, %v9992_v13  ;;  %v7553_v20 = vsel %vm1480_vm8, %v9988_v36, %v9993_v19 }
 0x9c8   : > { %v10001_v44 = vpop.permute.xlu1 %10000  ;;  %v9996_v63 = vpop.permute.xlu0 %9995  ;;  %v9547_v9 = vpack.c.bf16 %v7553_v20, %v7552_v1 }
 0x9c9   : > { %v10003_v53 = vunpack.i.h.bf16 %v10001_v44  ;;  %v10002_v54 = vunpack.i.l.bf16 %v10001_v44  ;;  %v9998_v37 = vunpack.i.h.bf16 %v9996_v63  ;;  %v9997_v27 = vunpack.i.l.bf16 %v9996_v63  ;;  %9444 = vmatmul.mubr.msk.f32.vlgmr.msra.gmra.mrb[8].mxu0 %vm6217_vm1, %v9443_v60 }
 0x9ca   : > { %9542 = vmatpush1.bf16.msra.mxu0 %v9541_v45  ;;  %7452 = vmatprep.mubr.f32.mxu0 %v11587_v11 }
 0x9cb   : > { %9548 = vmatprep.subr.bf16.mxu0 %v9547_v9  ;;  %v7556_v2 = vsel %vm1480_vm8, %v10002_v54, %v9997_v27  ;;  %v7557_v50 = vsel %vm1480_vm8, %v10003_v53, %v9998_v37  ;;  %v7554_v42 = vsel %vm1480_vm8, %v9997_v27, %v9987_v35  ;;  %v7555_v41 = vsel %vm1480_vm8, %v9998_v37, %v9988_v36 }
 0x9cc   : > { %9445 = vmatmul.mubr.msk.f32.vlgmr.msra.gmra.mrb[8].mxu1 %vm6217_vm1, %v9443_v60  ;;  %v9551_v28 = vpack.c.bf16 %v7557_v50, %v7556_v2  ;;  %v7550_v46 = vsel %vm1480_vm8, %v9992_v13, %v10002_v54  ;;  %v7551_v18 = vsel %vm1480_vm8, %v9993_v19, %v10003_v53  ;;  %v9549_v62 = vpack.c.bf16 %v7555_v41, %v7554_v42 }
 0x9cd   : > { %9546 = vmatpush1.bf16.msra.mxu1 %v9545_v14  ;;  %7523 = vmatprep.mubr.f32.mxu1 %v11587_v11  ;;  %v9553_v32 = vpack.c.bf16 %v7551_v18, %v7550_v46 }
 0x9ce   : > { %9552 = vmatprep.subr.bf16.mxu1 %v9551_v28 }
 0x9d1   : > { %9447 = vmatmul.mubr.msk.f32.vlgmr.msra.gmra.mrb[8].mxu0 %vm6217_vm1, %v9446_v0 }
 0x9d2   : > { %9550 = vmatpush1.bf16.msra.mxu0 %v9549_v62  ;;  %7627 = vmatprep.mubr.f32.mxu0 %v11587_v11 }
 0x9d4   : > { %9448 = vmatmul.mubr.msk.f32.vlgmr.msra.gmra.mrb[8].mxu1 %vm6217_vm1, %v9446_v0 }
 0x9d5   : > { %9554 = vmatpush1.bf16.msra.mxu1 %v9553_v32  ;;  %7698 = vmatprep.mubr.f32.mxu1 %v11587_v11 }
 0x9d9   : > { %9450 = vmatmul.mubr.msk.f32.vlgmr.msra.gmra.mrb[8].mxu0 %vm6217_vm1, %v9449_v51 }
 0x9da   : > { %7849 = vmatprep.mubr.f32.mxu0 %v11587_v11 }
 0x9dc   : > { %9451 = vmatmul.mubr.msk.f32.vlgmr.msra.gmra.mrb[8].mxu1 %vm6217_vm1, %v9449_v51 }
 0x9dd   : > { %7920 = vmatprep.mubr.f32.mxu1 %v11587_v11 }
 0xaac   : > { %v7629_v19 = vpop.f32.mrb[8].mxu0 }
 0xaad   : > { %v7709_v13 = vmul.f32 %v11036_v5, %v7629_v19  ;;  %v7631_v36 = vpop.f32.mrb[9].mxu0 }
 0xaae   : > { %v7710_v35 = vmul.f32 %v11042_v25, %v7631_v36 }
 0xaaf   : > { %v7718_v4 = vmul.f32 %v7709_v13, %v7709_v13  ;;  %v7700_v60 = vpop.f32.mrb[8].mxu1 }
 0xab0   : > { %v7713_v1 = vadd.f32 %v7710_v35, %v7709_v13  ;;  %v7719_v20 = vmul.f32 %v7710_v35, %v7710_v35  ;;  %v7711_v55 = vmul.f32 %v11048_v59, %v7700_v60  ;;  %v7702_v3 = vpop.f32.mrb[9].mxu1 }
 0xab1   : > { %v7712_v45 = vmul.f32 %v11054_v22, %v7702_v3 }
 0xab2   : > { %v7722_v44 = vadd.f32 %v7719_v20, %v7718_v4  ;;  %v7714_v63 = vadd.f32 %v7713_v1, %v7711_v55  ;;  %v7720_v9 = vmul.f32 %v7711_v55, %v7711_v55 }
 0xab3   : > { %v7721_v53 = vmul.f32 %v7712_v45, %v7712_v45 }
 0xab4   : > { %v7715_v54 = vadd.f32 %v7714_v63, %v7712_v45  ;;  %v7723_v37 = vadd.f32 %v7722_v44, %v7720_v9 }
 0xab6   : > { %7716 = vadd.xlane.f32.xlu0 %v7715_v54  ;;  %v7724_v27 = vadd.f32 %v7723_v37, %v7721_v53 }
 0xab8   : > { %7725 = vadd.xlane.f32.xlu1 %v7724_v27 }
 0xb43   : > { %v7717_v14 = vpop.xlane.xlu0 %7716 }
 0xb44   : > { %v7727_v2 = vmul.f32 0.00390625, %v7717_v14 }
 0xb45   : > { %v7726_v50 = vpop.xlane.xlu1 %7725 }
 0xb46   : > { %v7728_v42 = vmul.f32 0.00390625, %v7726_v50  ;;  %v7729_v41 = vmul.f32 %v7727_v2, %v7727_v2  ;;  %v7732_v18 = vsub.f32 %v7709_v13, %v7727_v2  ;;  %v7733_v62 = vsub.f32 %v7710_v35, %v7727_v2 }
 0xb47   : > { %v7734_v32 = vsub.f32 %v7711_v55, %v7727_v2  ;;  %v7735_v51 = vsub.f32 %v7712_v45, %v7727_v2 }
 0xb48   : > { %v7730_v28 = vsub.f32 %v7728_v42, %v7729_v41 }
 0xb4a   : > { %v7731_v0 = vmax.f32 %v7730_v28, 0.0 }
 0xb4c   : > { %v7736_v46 = vadd.f32 1e-05, %v7731_v0 }
 0xb4e   : > { %10052 = vrsqrt.f32 %v7736_v46 }
 0xb58   : > { %v10053_v19 = vpop.eup %10052 }
 0xb59   : > { %v7738_v36 = vmul.f32 %v10053_v19, %v7732_v18  ;;  %v7739_v4 = vmul.f32 %v10053_v19, %v7733_v62  ;;  %v7741_v60 = vmul.f32 %v10053_v19, %v7735_v51  ;;  %v7740_v1 = vmul.f32 %v10053_v19, %v7734_v32 }
 0xb5b   : > { %v7742_v20 = vmul.f32 0.2, %v7738_v36  ;;  %v7743_v3 = vmul.f32 0.2, %v7739_v4  ;;  %v7745_v44 = vmul.f32 0.2, %v7741_v60 }
 0xb5c   : > { %v7744_v54 = vmul.f32 0.2, %v7740_v1 }
 0xb5d   : > { %v7749_v63 = vmax.f32 %v7741_v60, %v7745_v44  ;;  %v7746_v9 = vmax.f32 %v7738_v36, %v7742_v20  ;;  %v7747_v53 = vmax.f32 %v7739_v4, %v7743_v3 }
 0xb5e   : > { %v7748_v45 = vmax.f32 %v7740_v1, %v7744_v54 }
 0xb5f   : > { %v11313_v37 = vmul.f32 %v11054_v22, %v7749_v63  ;;  %v11316_v13 = vmul.f32 %v11036_v5, %v7746_v9  ;;  %v11319_v35 = vmul.f32 %v11042_v25, %v7747_v53 }
 0xb60   : > { %v11328_v22 = vmul.f32 %v11048_v59, %v7748_v45 }
 0xb61   : > { %7774 = vrot.lane.b32.xlu1 %v11313_v37, %s10073_s18  ;;  %v10004_v55 = vpack.i.bf16 %v11319_v35, %v11316_v13 }
 0xb62   : > { %v10024_v5 = vpack.i.bf16 %v11328_v22, %v11319_v35 }
 0xb63   : > { %10005 = vrot.lane.b32.xlu0 %v10004_v55, %s10073_s18 }
 0xb65   : > { %10010 = vrot.lane.b32.xlu1 %v10004_v55, %s10074_s19 }
 0xb67   : > { %7772 = vrot.lane.b32.xlu0 %v11328_v22, %s10073_s18 }
 0xb69   : > { %7758 = vrot.lane.b32.xlu1 %v11328_v22, %s10074_s19 }
 0xb6b   : > { %7760 = vrot.lane.b32.xlu0 %v11313_v37, %s10074_s19 }
 0xb6d   : > { %8078 = vrot.lane.b32.xlu1 %v11313_v37, %s10075_s20 }
 0xb6f   : > { %10015 = vrot.lane.b32.xlu0 %v10004_v55, %s10075_s20 }
 0xb71   : > { %10020 = vrot.lane.b32.xlu1 %v10004_v55, %s10076_s21 }
 0xb73   : > { %8076 = vrot.lane.b32.xlu0 %v11328_v22, %s10075_s20 }
 0xb75   : > { %8239 = vrot.lane.b32.xlu1 %v11328_v22, %s10076_s21 }
 0xb77   : > { %8241 = vrot.lane.b32.xlu0 %v11313_v37, %s10076_s21 }
 0xb79   : > { %8549 = vrot.lane.b32.xlu1 %v11316_v13, %s10077_s22 }
 0xb7b   : > { %10025 = vrot.lane.b32.xlu0 %v10024_v5, %s10077_s22 }
 0xb7d   : > { %10030 = vrot.lane.b32.xlu1 %v10024_v5, %s10078_s23 }
 0xb7f   : > { %8555 = vrot.lane.b32.xlu0 %v11313_v37, %s10077_s22  ;;  %s170_s22 = scalar_lea.vmem %s11560_s3, %s9481_s14 }
 0xb81   : > { %8718 = vrot.lane.b32.xlu1 %v11313_v37, %s10078_s23 }
 0xb83   : > { %8712 = vrot.lane.b32.xlu0 %v11316_v13, %s10078_s23 }
 0xb85   : > { %8875 = vrot.lane.b32.xlu1 %v11316_v13, %s10079_s24 }
 0xb87   : > { %10035 = vrot.lane.b32.xlu0 %v10024_v5, %s10079_s24 }
 0xb89   : > { %10040 = vrot.lane.b32.xlu1 %v10024_v5, %s10080_s25 }
 0xb8b   : > { %8881 = vrot.lane.b32.xlu0 %v11313_v37, %s10079_s24 }
 0xb8d   : > { %9044 = vrot.lane.b32.xlu1 %v11313_v37, %s10080_s25 }
 0xb8f   : > { %9038 = vrot.lane.b32.xlu0 %v11316_v13, %s10080_s25 }
 0xbd3   : > { %v7775_v25 = vpop.permute.xlu1 %7774 }
 0xbd5   : > { %v10006_v59 = vpop.permute.xlu0 %10005 }
 0xbd6   : > { %v10008_v27 = vunpack.i.h.bf16 %v10006_v59  ;;  %v10007_v14 = vunpack.i.l.bf16 %v10006_v59 }
 0xbd7   : > { %v10011_v2 = vpop.permute.xlu1 %10010 }
 0xbd8   : > { %v7779_v50 = vsel %vm203_vm0, %v7775_v25, %v10007_v14  ;;  %v10013_v42 = vunpack.i.h.bf16 %v10011_v2  ;;  %v10012_v41 = vunpack.i.l.bf16 %v10011_v2  ;;  %v7778_v28 = vsel %vm203_vm0, %v10007_v14, %v10008_v27 }
 0xbd9   : > { %v9557_v0 = vpack.c.bf16 %v10661_v29, %v7779_v50  ;;  %v7773_v46 = vpop.permute.xlu0 %7772  ;;  %v9555_v18 = vpack.c.bf16 %v10653_v24, %v7778_v28  ;;  %v9453_v24 = vld [vmem:[%s11558_s1 + $0x170] sm:$0xff] }
 0xbda   : > { %v7776_v62 = vsel %vm203_vm0, %v7773_v46, %v7775_v25  ;;  %v7777_v32 = vsel %vm203_vm0, %v10008_v27, %v7773_v46  ;;  %v7764_v51 = vsel %vm189_vm2, %v10012_v41, %v10013_v42 }
 0xbdb   : > { %v9559_v19 = vpack.c.bf16 %v10665_v30, %v7776_v62  ;;  %v9561_v36 = vpack.c.bf16 %v10669_v31, %v7777_v32  ;;  %v7759_v4 = vpop.permute.xlu1 %7758  ;;  %9556 = vmatprep.subr.bf16.mxu0 %v9555_v18  ;;  %v9563_v29 = vpack.c.bf16 %v10679_v34, %v7764_v51  ;;  %v9587_v32 = vpack.c.bf16 %v10576_v15, %v11319_v35  ;;  %v9461_v15 = vld [vmem:[%s11558_s1 + $0x180] sm:$0xff] }
 0xbdc   : > { %9558 = vmatpush1.bf16.msra.mxu0 %v9557_v0  ;;  %v7763_v1 = vsel %vm189_vm2, %v10013_v42, %v7759_v4 }
 0xbdd   : > { %9560 = vmatprep.subr.bf16.mxu1 %v9559_v19  ;;  %v7761_v60 = vpop.permute.xlu0 %7760  ;;  %9564 = vmatprep.subr.bf16.mxu0 %v9563_v29  ;;  %v9569_v44 = vpack.c.bf16 %v10696_v40, %v7763_v1  ;;  %v9452_v40 = vld [vmem:[%s11558_s1 + $0x168] sm:$0xff]  ;;  %v9589_v29 = vpack.c.bf16 %v10579_v16, %v11316_v13  ;;  %v9593_v1 = vpack.c.bf16 %v10586_v17, %v11328_v22 }
 0xbde   : > { %v7762_v30 = vsel %vm189_vm2, %v7759_v4, %v7761_v60  ;;  %v7765_v31 = vsel %vm189_vm2, %v7761_v60, %v10012_v41  ;;  %9562 = vmatpush1.bf16.msra.mxu1 %v9561_v36  ;;  %v9591_v4 = vpack.c.bf16 %v10589_v21, %v11313_v37 }
 0xbdf   : > { %v9565_v34 = vpack.c.bf16 %v10688_v38, %v7765_v31  ;;  %v9567_v20 = vpack.c.bf16 %v10692_v39, %v7762_v30  ;;  %v8079_v3 = vpop.permute.xlu1 %8078  ;;  %9454 = vmatmul.mubr.msk.f32.vlgmr.msra.gmra.mrb[10].mxu0 %vm6217_vm1, %v9453_v24 }
 0xbe0   : > { %7994 = vmatprep.mubr.f32.mxu0 %v11587_v11 }
 0xbe1   : > { %v10016_v63 = vpop.permute.xlu0 %10015  ;;  %9455 = vmatmul.mubr.msk.f32.vlgmr.msra.gmra.mrb[10].mxu1 %vm6217_vm1, %v9453_v24  ;;  %9566 = vmatpush1.bf16.msra.mxu0 %v9565_v34 }
 0xbe2   : > { %v10018_v9 = vunpack.i.h.bf16 %v10016_v63  ;;  %v10017_v53 = vunpack.i.l.bf16 %v10016_v63  ;;  %9568 = vmatprep.subr.bf16.mxu1 %v9567_v20  ;;  %8065 = vmatprep.mubr.f32.mxu1 %v11587_v11 }
 0xbe3   : > { %9570 = vmatpush1.bf16.msra.mxu1 %v9569_v44  ;;  %v10021_v38 = vpop.permute.xlu1 %10020 }
 0xbe4   : > { %v8083_v39 = vsel %vm509_vm3, %v8079_v3, %v10017_v53  ;;  %v10023_v54 = vunpack.i.h.bf16 %v10021_v38  ;;  %v10022_v55 = vunpack.i.l.bf16 %v10021_v38  ;;  %v8082_v45 = vsel %vm509_vm3, %v10017_v53, %v10018_v9 }
 0xbe5   : > { %v9573_v5 = vpack.c.bf16 %v10715_v47, %v8083_v39  ;;  %v8077_v25 = vpop.permute.xlu0 %8076  ;;  %v9571_v59 = vpack.c.bf16 %v10706_v43, %v8082_v45  ;;  %v11588_v45 = vld [vmem:[#allocation6_spill] sm:$0xff] }
 0xbe6   : > { %v8080_v27 = vsel %vm509_vm3, %v8077_v25, %v8079_v3  ;;  %v8081_v14 = vsel %vm509_vm3, %v10018_v9, %v8077_v25  ;;  %v8245_v2 = vsel %vm673_vm4, %v10022_v55, %v10023_v54 }
 0xbe7   : > { %v9575_v50 = vpack.c.bf16 %v10719_v48, %v8080_v27  ;;  %v9577_v42 = vpack.c.bf16 %v10723_v49, %v8081_v14  ;;  %v8240_v41 = vpop.permute.xlu1 %8239  ;;  %9456 = vmatmul.mubr.msk.f32.vlgmr.msra.gmra.mrb[10].mxu0 %vm6217_vm1, %v9452_v40  ;;  %9572 = vmatprep.subr.bf16.mxu0 %v9571_v59  ;;  %v9579_v47 = vpack.c.bf16 %v10733_v52, %v8245_v2  ;;  %v9458_v52 = vld [vmem:[%s11558_s1 + $0x178] sm:$0xff]  ;;  %v11589_v27 = vld [vmem:[#allocation7_spill] sm:$0xff] }
 0xbe8   : > { %9574 = vmatpush1.bf16.msra.mxu0 %v9573_v5  ;;  %8153 = vmatprep.mubr.f32.mxu0 %v11587_v11  ;;  %v8244_v0 = vsel %vm673_vm4, %v10023_v54, %v8240_v41 }
 0xbe9   : > { %v8242_v43 = vpop.permute.xlu0 %8241  ;;  %9457 = vmatmul.mubr.msk.f32.vlgmr.msra.gmra.mrb[10].mxu1 %vm6217_vm1, %v9452_v40  ;;  %9576 = vmatprep.subr.bf16.mxu1 %v9575_v50 }
 0xbea   : > { %v8243_v28 = vsel %vm673_vm4, %v8240_v41, %v8242_v43  ;;  %9580 = vmatprep.subr.bf16.mxu0 %v9579_v47  ;;  %9578 = vmatpush1.bf16.msra.mxu1 %v9577_v42  ;;  %v8246_v48 = vsel %vm673_vm4, %v8242_v43, %v10022_v55  ;;  %v11590_v47 = vld [vmem:[#allocation8_spill] sm:$0xff] }
 0xbeb   : > { %v9583_v49 = vpack.c.bf16 %v10746_v57, %v8243_v28  ;;  %8224 = vmatprep.mubr.f32.mxu1 %v11587_v11  ;;  %v8550_v46 = vpop.permute.xlu1 %8549  ;;  %v9581_v62 = vpack.c.bf16 %v10742_v56, %v8246_v48  ;;  %v9585_v57 = vpack.c.bf16 %v10750_v58, %v8244_v0  ;;  %v11591_v48 = vld [vmem:[#allocation10_spill] sm:$0xff] }
 0xbed   : > { %v10026_v18 = vpop.permute.xlu0 %10025  ;;  %9584 = vmatprep.subr.bf16.mxu1 %v9583_v49 }
 0xbee   : > { %v10028_v51 = vunpack.i.h.bf16 %v10026_v18  ;;  %v10027_v19 = vunpack.i.l.bf16 %v10026_v18 }
 0xbef   : > { %9459 = vmatmul.mubr.msk.f32.vlgmr.msra.gmra.mrb[10].mxu0 %vm6217_vm1, %v9458_v52  ;;  %v10031_v56 = vpop.permute.xlu1 %10030 }
 0xbf0   : > { %9582 = vmatpush1.bf16.msra.mxu0 %v9581_v62  ;;  %8316 = vmatprep.mubr.f32.mxu0 %v11587_v11  ;;  %v8558_v58 = vsel %vm988_vm5, %v10027_v19, %v10028_v51  ;;  %v10033_v37 = vunpack.i.h.bf16 %v10031_v56  ;;  %v10032_v60 = vunpack.i.l.bf16 %v10031_v56  ;;  %v8559_v16 = vsel %vm988_vm5, %v8550_v46, %v10027_v19  ;;  %v9476_v56 = vld [vmem:[%s11558_s1 + $0x1a8] sm:$0xff] }
 0xbf1   : > { %9588 = vmatprep.subr.bf16.mxu0 %v9587_v32  ;;  %v8556_v36 = vpop.permute.xlu0 %8555  ;;  %9460 = vmatmul.mubr.msk.f32.vlgmr.msra.gmra.mrb[10].mxu1 %vm6217_vm1, %v9458_v52  ;;  %v9595_v21 = vpack.c.bf16 %v10762_v61, %v8558_v58  ;;  %v9464_v61 = vld [vmem:[%s11558_s1 + $0x188] sm:$0xff]  ;;  %v9597_v22 = vpack.c.bf16 %v10777_v8, %v8559_v16  ;;  %v11592_v52 = vld [vmem:[#allocation9_spill] sm:$0xff]  ;;  %v9473_v32 = vld [vmem:[%s11558_s1 + $0x1a0] sm:$0xff] }
 0xbf2   : > { %9586 = vmatpush1.bf16.msra.mxu1 %v9585_v57  ;;  %8387 = vmatprep.mubr.f32.mxu1 %v11587_v11  ;;  %v8560_v35 = vsel %vm988_vm5, %v8556_v36, %v8550_v46  ;;  %v8721_v17 = vsel %vm1152_vm6, %v10032_v60, %v10033_v37  ;;  %v11593_v46 = vld [vmem:[#allocation12_spill] sm:$0xff]  ;;  %v10063_v16 = vld [vmem:[%s11559_s2 + $0x18] sm:$0xff] }
 0xbf3   : > { %9592 = vmatprep.subr.bf16.mxu1 %v9591_v4  ;;  %v9599_v30 = vpack.c.bf16 %v10773_v7, %v8560_v35  ;;  %v8719_v31 = vpop.permute.xlu1 %8718  ;;  %v8557_v7 = vsel %vm988_vm5, %v10028_v51, %v8556_v36  ;;  %v9603_v3 = vpack.c.bf16 %v10790_v12, %v8721_v17  ;;  %v11594_v51 = vld [vmem:[#allocation11_spill] sm:$0xff]  ;;  %v11595_v36 = vld [vmem:[#allocation13_spill] sm:$0xff] }
 0xbf4   : > { %v9601_v44 = vpack.c.bf16 %v10785_v10, %v8557_v7  ;;  %v9467_v10 = vld [vmem:[%s11558_s1 + $0x190] sm:$0xff] }
 0xbf5   : > { %v8713_v24 = vpop.permute.xlu0 %8712 }
 0xbf6   : > { %v8723_v34 = vsel %vm1152_vm6, %v8719_v31, %v8713_v24  ;;  %v8722_v8 = vsel %vm1152_vm6, %v8713_v24, %v10032_v60 }
 0xbf7   : > { %9462 = vmatmul.mubr.msk.f32.vlgmr.msra.gmra.mrb[10].mxu0 %vm6217_vm1, %v9461_v15  ;;  %v8876_v20 = vpop.permute.xlu1 %8875  ;;  %v9607_v53 = vpack.c.bf16 %v10800_v23, %v8723_v34  ;;  %v8720_v23 = vsel %vm1152_vm6, %v10033_v37, %v8719_v31  ;;  %v9605_v54 = vpack.c.bf16 %v10804_v26, %v8722_v8  ;;  %v10062_v37 = vld [vmem:[%s11559_s2 + $0x10] sm:$0xff] }
 0xbf8   : > { %9590 = vmatpush1.bf16.msra.mxu0 %v9589_v29  ;;  %8467 = vmatprep.mubr.f32.mxu0 %v11587_v11  ;;  %v9609_v5 = vpack.c.bf16 %v11588_v45, %v8720_v23  ;;  %v10061_v29 = vld [vmem:[%s11559_s2 + $0x8] sm:$0xff] }
 0xbf9   : > { %9596 = vmatprep.subr.bf16.mxu0 %v9595_v21  ;;  %9463 = vmatmul.mubr.msk.f32.vlgmr.msra.gmra.mrb[10].mxu1 %vm6217_vm1, %v9461_v15  ;;  %v10036_v13 = vpop.permute.xlu0 %10035  ;;  %v10060_v15 = vld [vmem:[%s11559_s2] sm:$0xff] }
 0xbfa   : > { %9594 = vmatpush1.bf16.msra.mxu1 %v9593_v1  ;;  %8538 = vmatprep.mubr.f32.mxu1 %v11587_v11  ;;  %v10038_v63 = vunpack.i.h.bf16 %v10036_v13  ;;  %v10037_v9 = vunpack.i.l.bf16 %v10036_v13 }
 0xbfb   : > { %9600 = vmatprep.subr.bf16.mxu1 %v9599_v30  ;;  %v10041_v39 = vpop.permute.xlu1 %10040 }
 0xbfc   : > { %v8884_v12 = vsel %vm1316_vm7, %v10037_v9, %v10038_v63  ;;  %v10043_v25 = vunpack.i.h.bf16 %v10041_v39  ;;  %v10042_v59 = vunpack.i.l.bf16 %v10041_v39  ;;  %v8885_v26 = vsel %vm1316_vm7, %v8876_v20, %v10037_v9 }
 0xbfd   : > { %v8882_v38 = vpop.permute.xlu0 %8881  ;;  %v9611_v40 = vpack.c.bf16 %v10817_v33, %v8884_v12  ;;  %v9470_v33 = vld [vmem:[%s11558_s1 + $0x198] sm:$0xff]  ;;  %v9613_v43 = vpack.c.bf16 %v11590_v47, %v8885_v26 }
 0xbfe   : > { %v8886_v55 = vsel %vm1316_vm7, %v8882_v38, %v8876_v20  ;;  %v9047_v50 = vsel %vm1480_vm8, %v10042_v59, %v10043_v25  ;;  %v8883_v42 = vsel %vm1316_vm7, %v10038_v63, %v8882_v38 }
 0xbff   : > { %9465 = vmatmul.mubr.msk.f32.vlgmr.msra.gmra.mrb[10].mxu0 %vm6217_vm1, %v9464_v61  ;;  %v9615_v14 = vpack.c.bf16 %v11589_v27, %v8886_v55  ;;  %v9045_v41 = vpop.permute.xlu1 %9044  ;;  %v9619_v49 = vpack.c.bf16 %v11591_v48, %v9047_v50  ;;  %v9617_v0 = vpack.c.bf16 %v11592_v52, %v8883_v42 }
 0xc00   : > { %9598 = vmatpush1.bf16.msra.mxu0 %v9597_v22  ;;  %8630 = vmatprep.mubr.f32.mxu0 %v11587_v11  ;;  %v9046_v57 = vsel %vm1480_vm8, %v10043_v25, %v9045_v41 }
 0xc01   : > { %9604 = vmatprep.subr.bf16.mxu0 %v9603_v3  ;;  %9466 = vmatmul.mubr.msk.f32.vlgmr.msra.gmra.mrb[10].mxu1 %vm6217_vm1, %v9464_v61  ;;  %v9039_v2 = vpop.permute.xlu0 %9038  ;;  %v9625_v4 = vpack.c.bf16 %v11595_v36, %v9046_v57 }
 0xc02   : > { %9602 = vmatpush1.bf16.msra.mxu1 %v9601_v44  ;;  %8701 = vmatprep.mubr.f32.mxu1 %v11587_v11  ;;  %v9049_v28 = vsel %vm1480_vm8, %v9045_v41, %v9039_v2  ;;  %v9048_v62 = vsel %vm1480_vm8, %v9039_v2, %v10042_v59 }
 0xc03   : > { %9608 = vmatprep.subr.bf16.mxu1 %v9607_v53  ;;  %v9623_v18 = vpack.c.bf16 %v11593_v46, %v9049_v28  ;;  %v9621_v19 = vpack.c.bf16 %v11594_v51, %v9048_v62 }
 0xc07   : > { %9468 = vmatmul.mubr.msk.f32.vlgmr.msra.gmra.mrb[10].mxu0 %vm6217_vm1, %v9467_v10 }
 0xc08   : > { %9606 = vmatpush1.bf16.msra.mxu0 %v9605_v54  ;;  %8793 = vmatprep.mubr.f32.mxu0 %v11587_v11 }
 0xc09   : > { %9612 = vmatprep.subr.bf16.mxu0 %v9611_v40  ;;  %9469 = vmatmul.mubr.msk.f32.vlgmr.msra.gmra.mrb[10].mxu1 %vm6217_vm1, %v9467_v10 }
 0xc0a   : > { %9610 = vmatpush1.bf16.msra.mxu1 %v9609_v5  ;;  %8864 = vmatprep.mubr.f32.mxu1 %v11587_v11 }
 0xc0b   : > { %9616 = vmatprep.subr.bf16.mxu1 %v9615_v14 }
 0xc0f   : > { %9471 = vmatmul.mubr.msk.f32.vlgmr.msra.gmra.mrb[10].mxu0 %vm6217_vm1, %v9470_v33 }
 0xc10   : > { %9614 = vmatpush1.bf16.msra.mxu0 %v9613_v43  ;;  %8956 = vmatprep.mubr.f32.mxu0 %v11587_v11 }
 0xc11   : > { %9620 = vmatprep.subr.bf16.mxu0 %v9619_v49  ;;  %9472 = vmatmul.mubr.msk.f32.vlgmr.msra.gmra.mrb[10].mxu1 %vm6217_vm1, %v9470_v33  ;;  %v11596_v49 = vld [vmem:[#allocation3_spill] sm:$0xff] }
 0xc12   : > { %9618 = vmatpush1.bf16.msra.mxu1 %v9617_v0  ;;  %9027 = vmatprep.mubr.f32.mxu1 %v11587_v11  ;;  %v11597_v0 = vld [vmem:[#allocation2_spill] sm:$0xff] }
 0xc13   : > { %9624 = vmatprep.subr.bf16.mxu1 %v9623_v18  ;;  %v11598_v18 = vld [vmem:[#allocation4_spill] sm:$0xff] }
 0xc17   : > { %9474 = vmatmul.mubr.msk.f32.vlgmr.msra.gmra.mrb[10].mxu0 %vm6217_vm1, %v9473_v32 }
 0xc18   : > { %9622 = vmatpush1.bf16.msra.mxu0 %v9621_v19  ;;  %9119 = vmatprep.mubr.f32.mxu0 %v11587_v11 }
 0xc19   : > { %9475 = vmatmul.mubr.msk.f32.vlgmr.msra.gmra.mrb[10].mxu1 %vm6217_vm1, %v9473_v32  ;;  %v11599_v32 = vld [vmem:[#allocation5_spill] sm:$0xff] }
 0xc1a   : > { %9626 = vmatpush1.bf16.msra.mxu1 %v9625_v4  ;;  %9190 = vmatprep.mubr.f32.mxu1 %v11587_v11 }
 0xc1f   : > { %9477 = vmatmul.mubr.msk.f32.vlgmr.msra.gmra.mrb[10].mxu0 %vm6217_vm1, %v9476_v56 }
 0xc21   : > { %9478 = vmatmul.mubr.msk.f32.vlgmr.msra.gmra.mrb[10].mxu1 %vm6217_vm1, %v9476_v56 }
 0xcf2   : > { %v9121_v6 = vpop.f32.mrb[10].mxu0 }
 0xcf3   : > { %v9201_v58 = vmul.f32 %v10060_v15, %v9121_v6  ;;  %v9123_v35 = vpop.f32.mrb[11].mxu0 }
 0xcf4   : > { %v9202_v11 = vmul.f32 %v10061_v29, %v9123_v35  ;;  %v9192_v24 = vpop.f32.mrb[10].mxu1 }
 0xcf5   : > { %v9210_v21 = vmul.f32 %v9201_v58, %v9201_v58  ;;  %v9203_v60 = vmul.f32 %v10062_v37, %v9192_v24  ;;  %v9194_v1 = vpop.f32.mrb[11].mxu1 }
 0xcf6   : > { %v9205_v30 = vadd.f32 %v9202_v11, %v9201_v58  ;;  %v9211_v31 = vmul.f32 %v9202_v11, %v9202_v11  ;;  %v9204_v61 = vmul.f32 %v10063_v16, %v9194_v1 }
 0xcf7   : > { %v9212_v17 = vmul.f32 %v9203_v60, %v9203_v60 }
 0xcf8   : > { %v9214_v7 = vadd.f32 %v9211_v31, %v9210_v21  ;;  %v9206_v13 = vadd.f32 %v9205_v30, %v9203_v60  ;;  %v9213_v22 = vmul.f32 %v9204_v61, %v9204_v61 }
 0xcfa   : > { %v9207_v34 = vadd.f32 %v9206_v13, %v9204_v61  ;;  %v9215_v20 = vadd.f32 %v9214_v7, %v9212_v17 }
 0xcfc   : > { %9208 = vadd.xlane.f32.xlu0 %v9207_v34  ;;  %v9216_v3 = vadd.f32 %v9215_v20, %v9213_v22 }
 0xcfe   : > { %9217 = vadd.xlane.f32.xlu1 %v9216_v3 }
 0xd89   : > { %v9209_v44 = vpop.xlane.xlu0 %9208 }
 0xd8a   : > { %v9219_v63 = vmul.f32 0.00390625, %v9209_v44 }
 0xd8b   : > { %v9218_v9 = vpop.xlane.xlu1 %9217 }
 0xd8c   : > { %v9220_v53 = vmul.f32 0.00390625, %v9218_v9  ;;  %v9221_v8 = vmul.f32 %v9219_v63, %v9219_v63  ;;  %v9224_v23 = vsub.f32 %v9201_v58, %v9219_v63  ;;  %v9225_v39 = vsub.f32 %v9202_v11, %v9219_v63 }
 0xd8d   : > { %v9226_v54 = vsub.f32 %v9203_v60, %v9219_v63  ;;  %v9227_v55 = vsub.f32 %v9204_v61, %v9219_v63 }
 0xd8e   : > { %v9222_v38 = vsub.f32 %v9220_v53, %v9221_v8 }
 0xd90   : > { %v9223_v10 = vmax.f32 %v9222_v38, 0.0 }
 0xd92   : > { %v9228_v12 = vadd.f32 1e-05, %v9223_v10 }
 0xd94   : > { %10054 = vrsqrt.f32 %v9228_v12 }
 0xd9e   : > { %v10055_v40 = vpop.eup %10054 }
 0xd9f   : > { %v9230_v45 = vmul.f32 %v10055_v40, %v9224_v23  ;;  %v9231_v5 = vmul.f32 %v10055_v40, %v9225_v39  ;;  %v9232_v25 = vmul.f32 %v10055_v40, %v9226_v54  ;;  %v9233_v59 = vmul.f32 %v10055_v40, %v9227_v55 }
 0xda1   : > { %v9234_v27 = vmul.f32 0.2, %v9230_v45  ;;  %v9235_v14 = vmul.f32 0.2, %v9231_v5  ;;  %v9236_v26 = vmul.f32 0.2, %v9232_v25 }
 0xda2   : > { %v9237_v2 = vmul.f32 0.2, %v9233_v59 }
 0xda3   : > { %v9238_v33 = vmax.f32 %v9230_v45, %v9234_v27  ;;  %v9239_v50 = vmax.f32 %v9231_v5, %v9235_v14  ;;  %v9240_v42 = vmax.f32 %v9232_v25, %v9236_v26 }
 0xda4   : > { %v9241_v41 = vmax.f32 %v9233_v59, %v9237_v2 }
 0xda5   : > { %v9242_v47 = vmul.f32 %v10060_v15, %v9238_v33  ;;  %v9243_v43 = vmul.f32 %v10061_v29, %v9239_v50  ;;  %v9244_v28 = vmul.f32 %v10062_v37, %v9240_v42 }
 0xda6   : > { %v9245_v48 = vmul.f32 %v10063_v16, %v9241_v41 }
 0xda7   : > { %v9246_v52 = vadd.f32 %v9242_v47, %v11596_v49  ;;  %v9247_v46 = vadd.f32 %v9243_v43, %v11597_v0  ;;  %v9248_v62 = vadd.f32 %v9244_v28, %v11598_v18 }
 0xda8   : > { %v9249_v57 = vadd.f32 %v9245_v48, %v11599_v32 }
 0xda9   : > { %9250 = vst [vmem:[%s170_s22] sm:$0xff] %v9246_v52  ;;  %9251 = vst [vmem:[%s170_s22 + $0x8] sm:$0xff] %v9247_v46 }
 0xdaa   : > { %9252 = vst [vmem:[%s170_s22 + $0x10] sm:$0xff] %v9248_v62  ;;  %9253 = vst [vmem:[%s170_s22 + $0x18] sm:$0xff] %v9249_v57 }
 0xdab PF: > { %s13_s12 = sadd.s32 1, %s10070_s12  }
 0xdac   : > { %p10_p4 = scmp.ge.s32.totalorder %s13_s12, 4  }
 0xdae   :  { %12 = sbr.rel (!%p10_p4) target bundleno = 1 (0x1), region = 115 }

</bundles_post_ra>
